<compile_context>
chip_gen: v6e
topology: v6e:2x2x1
jax: 0.10.0
libtpu: 0.0.40
codegen_flags: <defaults>
</compile_context>

<pallas_src>
import jax
import jax.numpy as jnp
from jax.experimental import pallas as pl
from jax.experimental.pallas import tpu as pltpu

BN_EPS = 1e-5        # torch.nn.BatchNorm2d default eps
C_PAD = 128          # every conv channel dim zero-padded to one 128-lane vreg
TILE_M_MAX = 256     # GEMM row tile (raise for large batches; VMEM-safe on v7x)

_COMPILER_PARAMS = pltpu.CompilerParams(
    dimension_semantics=("parallel",),
    vmem_limit_bytes=32 * 1024 * 1024,
)


def _round_up(x, m):
    return -(-x // m) * m


# --------------------------- index maps (module level) ----------------------
def _idx_row(i):
    return (i, 0)


def _idx_const2(i):
    return (0, 0)


def _idx_stats(i):
    return (i, 0, 0)


# ------------------------------ Pallas kernels ------------------------------
def _conv_gemm_stats_kernel(a_ref, w_ref, y_ref, st_ref):
    """bf16 GEMM tile (MXU, f32 accumulate) + per-tile per-channel sum/sumsq."""
    y = jnp.dot(a_ref[...], w_ref[...], preferred_element_type=jnp.float32)
    y_ref[...] = y
    s = jnp.sum(y, axis=0, keepdims=True)          # (1, Cp)
    q = jnp.sum(y * y, axis=0, keepdims=True)      # (1, Cp)
    st_ref[...] = jnp.concatenate([s, q], axis=0)[None, :, :]


def _bn_relu_kernel(y_ref, s_ref, b_ref, o_ref):
    o_ref[...] = jnp.maximum(y_ref[...] * s_ref[...] + b_ref[...], 0.0)


def _bn_add_bn_relu_kernel(y_ref, r_ref, s1_ref, b1_ref, s2_ref, b2_ref, o_ref):
    out = (y_ref[...] * s1_ref[...] + b1_ref[...]
           + r_ref[...] * s2_ref[...] + b2_ref[...])
    o_ref[...] = jnp.maximum(out, 0.0)


def _fc_kernel(a_ref, w_ref, b_ref, o_ref):
    o_ref[...] = jnp.dot(a_ref[...], w_ref[...],
                         preferred_element_type=jnp.float32) + b_ref[...]


# ------------------------------ Pallas wrappers ------------------------------
def pallas_conv_gemm_stats(a, w):
    """a: (M_pad, K) bf16, w: (K, Cp) bf16 -> (y (M_pad, Cp) f32, stats (2, Cp))."""
    m_pad, k = a.shape
    cp = w.shape[1]
    tile_m = min(TILE_M_MAX, m_pad)
    n_tiles = m_pad // tile_m
    y, st = pl.pallas_call(
        _conv_gemm_stats_kernel,
        out_shape=(jax.ShapeDtypeStruct((m_pad, cp), jnp.float32),
                   jax.ShapeDtypeStruct((n_tiles, 2, cp), jnp.float32)),
        grid=(n_tiles,),
        in_specs=[pl.BlockSpec((tile_m, k), _idx_row),
                  pl.BlockSpec((k, cp), _idx_const2)],
        out_specs=(pl.BlockSpec((tile_m, cp), _idx_row),
                   pl.BlockSpec((1, 2, cp), _idx_stats)),
        compiler_params=_COMPILER_PARAMS,
    )(a, w)
    return y, jnp.sum(st, axis=0)          # tiny cross-tile reduction -> (2, Cp)


def pallas_bn_relu(y, scale, shift):
    m_pad, cp = y.shape
    tile_m = min(TILE_M_MAX, m_pad)
    return pl.pallas_call(
        _bn_relu_kernel,
        out_shape=jax.ShapeDtypeStruct((m_pad, cp), jnp.float32),
        grid=(m_pad // tile_m,),
        in_specs=[pl.BlockSpec((tile_m, cp), _idx_row),
                  pl.BlockSpec((1, cp), _idx_const2),
                  pl.BlockSpec((1, cp), _idx_const2)],
        out_specs=pl.BlockSpec((tile_m, cp), _idx_row),
        compiler_params=_COMPILER_PARAMS,
    )(y, scale, shift)


def pallas_bn_add_bn_relu(y, r, s1, b1, s2, b2):
    m_pad, cp = y.shape
    tile_m = min(TILE_M_MAX, m_pad)
    return pl.pallas_call(
        _bn_add_bn_relu_kernel,
        out_shape=jax.ShapeDtypeStruct((m_pad, cp), jnp.float32),
        grid=(m_pad // tile_m,),
        in_specs=[pl.BlockSpec((tile_m, cp), _idx_row),
                  pl.BlockSpec((tile_m, cp), _idx_row),
                  pl.BlockSpec((1, cp), _idx_const2),
                  pl.BlockSpec((1, cp), _idx_const2),
                  pl.BlockSpec((1, cp), _idx_const2),
                  pl.BlockSpec((1, cp), _idx_const2)],
        out_specs=pl.BlockSpec((tile_m, cp), _idx_row),
        compiler_params=_COMPILER_PARAMS,
    )(y, r, s1, b1, s2, b2)


def pallas_fc(a, w, b):
    m, k = a.shape
    n = w.shape[1]
    return pl.pallas_call(
        _fc_kernel,
        out_shape=jax.ShapeDtypeStruct((m, n), jnp.float32),
        grid=(1,),
        in_specs=[pl.BlockSpec((m, k), _idx_const2),
                  pl.BlockSpec((k, n), _idx_const2),
                  pl.BlockSpec((1, n), _idx_const2)],
        out_specs=pl.BlockSpec((m, n), _idx_const2),
    )(a, w, b)


# ------------------------- plain-JAX reference ops ---------------------------
def ref_conv_gemm_stats(a, w):
    y = jnp.dot(a, w, preferred_element_type=jnp.float32)
    return y, jnp.stack([jnp.sum(y, axis=0), jnp.sum(y * y, axis=0)], axis=0)


def ref_bn_relu(y, scale, shift):
    return jnp.maximum(y * scale + shift, 0.0)


def ref_bn_add_bn_relu(y, r, s1, b1, s2, b2):
    return jnp.maximum(y * s1 + b1 + r * s2 + b2, 0.0)


def ref_fc(a, w, b):
    return jnp.dot(a, w, preferred_element_type=jnp.float32) + b


PALLAS_OPS = {"conv_gemm_stats": pallas_conv_gemm_stats, "bn_relu": pallas_bn_relu,
              "bn_add_bn_relu": pallas_bn_add_bn_relu, "fc": pallas_fc}
REF_OPS = {"conv_gemm_stats": ref_conv_gemm_stats, "bn_relu": ref_bn_relu,
           "bn_add_bn_relu": ref_bn_add_bn_relu, "fc": ref_fc}


# --------------------------------- glue --------------------------------------
def _im2col(x, kh, kw, stride, pad, m_pad):
    """NHWC -> (m_pad, kh*kw*C) bf16, K ordered (kh, kw, cin); extra rows zero."""
    x = x.astype(jnp.bfloat16)
    if pad:
        x = jnp.pad(x, ((0, 0), (pad, pad), (pad, pad), (0, 0)))
    n, hp, wp, c = x.shape
    ho = (hp - kh) // stride + 1
    wo = (wp - kw) // stride + 1
    cols = []
    for di in range(kh):
        for dj in range(kw):
            cols.append(x[:, di:di + stride * ho:stride,
                          dj:dj + stride * wo:stride, :])
    a = jnp.stack(cols, axis=3).reshape(n * ho * wo, kh * kw * c)
    return jnp.pad(a, ((0, m_pad - a.shape[0]), (0, 0)))


def _conv_w_to_mat(w_oihw, cin_pad, cout_pad):
    """(Cout, Cin, KH, KW) -> (KH*KW*cin_pad, cout_pad) bf16, matching im2col K."""
    cout, cin, kh, kw = w_oihw.shape
    wm = jnp.transpose(w_oihw, (2, 3, 1, 0))                  # (KH, KW, Cin, Cout)
    wm = jnp.pad(wm, ((0, 0), (0, 0), (0, cin_pad - cin), (0, cout_pad - cout)))
    return wm.reshape(kh * kw * cin_pad, cout_pad).astype(jnp.bfloat16)


def _bn_scale_shift(stats, gamma, beta, m_true):
    """Per-channel affine (scale, shift) from training-mode batch statistics."""
    mean = stats[0] / m_true
    var = jnp.maximum(stats[1] / m_true - mean * mean, 0.0)   # biased variance
    scale = gamma * jax.lax.rsqrt(var + BN_EPS)
    shift = beta - mean * scale
    return scale[None, :], shift[None, :]                     # (1, Cp) each


def _conv_bn_gemm(x, w_mat, kh, kw, stride, pad, ops):
    n, h, w, _ = x.shape
    ho = (h + 2 * pad - kh) // stride + 1
    wo = (w + 2 * pad - kw) // stride + 1
    m = n * ho * wo
    m8 = _round_up(m, 8)
    m_pad = _round_up(m8, min(TILE_M_MAX, m8))
    a = _im2col(x, kh, kw, stride, pad, m_pad)
    y, stats = ops["conv_gemm_stats"](a, w_mat)
    return y, stats, (ho, wo, m, m_pad)


def _basic_block_enc(x, blk, ops):
    n, h, w, _ = x.shape
    s1 = blk["stride"] * blk["scale_factor"]

    # conv1 -> bn1 -> relu
    y1, st1, (ho, wo, m, _) = _conv_bn_gemm(x, blk["w1"], 3, 3, s1, 1, ops)
    sc1, sh1 = _bn_scale_shift(st1, blk["g1"], blk["be1"], m)
    h1 = ops["bn_relu"](y1, sc1, sh1)[:m].reshape(n, ho, wo, C_PAD)

    # conv2 -> bn2 (normalization fused into the add + relu epilogue below)
    y2, st2, (ho2, wo2, m2, m_pad2) = _conv_bn_gemm(h1, blk["w2"], 3, 3, 1, 1, ops)
    sc2, sh2 = _bn_scale_shift(st2, blk["g2"], blk["be2"], m2)

    # shortcut branch
    if blk["w_sc"] is None:
        r = x.reshape(n * h * w, C_PAD)
        r = jnp.pad(r, ((0, m_pad2 - r.shape[0]), (0, 0)))
        sc_r = jnp.ones((1, C_PAD), jnp.float32)
        sh_r = jnp.zeros((1, C_PAD), jnp.float32)
    else:
        r, st_sc, (_, _, m_sc, _) = _conv_bn_gemm(x, blk["w_sc"], 1, 1, s1, 0, ops)
        sc_r, sh_r = _bn_scale_shift(st_sc, blk["g_sc"], blk["be_sc"], m_sc)

    out = ops["bn_add_bn_relu"](y2, r, sc2, sh2, sc_r, sh_r)
    return out[:m2].reshape(n, ho2, wo2, C_PAD)


def resnet20enc_forward(x_nchw, params, ops):
    x = jnp.transpose(x_nchw, (0, 2, 3, 1)).astype(jnp.float32)   # NCHW -> NHWC
    n = x.shape[0]

    # stem: conv1(nc->32, k3 s2 p1, bias=False) + bn1 + relu
    y, st, (ho, wo, m, _) = _conv_bn_gemm(x, params["stem_w"], 3, 3, 2, 1, ops)
    sc, sh = _bn_scale_shift(st, params["stem_g"], params["stem_b"], m)
    h = ops["bn_relu"](y, sc, sh)[:m].reshape(n, ho, wo, C_PAD)

    for blk in params["blocks"]:
        h = _basic_block_enc(h, blk, ops)

    # adaptive_avg_pool2d(x, 1) + flatten   (last layer has 128 real channels)
    feature = jnp.mean(h, axis=(1, 2))                            # (N, 128)
    fc_out = ops["fc"](feature.astype(jnp.bfloat16), params["fc_w"], params["fc_b"])
    z_dim = params["z_dim"]
    return fc_out[:, :z_dim], fc_out[:, z_dim:], feature


# ------------------------------- parameters ----------------------------------
def init_params(key, nc=1, z_dim=10, num_blocks=(2, 2, 2, 2)):
    keys = iter(jax.random.split(key, 96))

    def conv_w(cout, cin, k):
        fan_in = cin * k * k
        return jax.random.normal(next(keys), (cout, cin, k, k),
                                 jnp.float32) * (2.0 / fan_in) ** 0.5

    def bn_pair(c_real):   # padded channels keep gamma=0, beta=0 -> stay zero
        g = jnp.zeros((C_PAD,), jnp.float32).at[:c_real].set(
            1.0 + 0.1 * jax.random.normal(next(keys), (c_real,), jnp.float32))
        b = jnp.zeros((C_PAD,), jnp.float32).at[:c_real].set(
            0.1 * jax.random.normal(next(keys), (c_real,), jnp.float32))
        return g, b

    params = {"z_dim": z_dim}
    params["stem_w"] = _conv_w_to_mat(conv_w(32, nc, 3), nc, C_PAD)  # K stays 9*nc
    params["stem_g"], params["stem_b"] = bn_pair(32)

    blocks = []
    in_planes = 32
    layer_cfg = [(64, num_blocks[0], 2, 1), (64, num_blocks[1], 1, 1),
                 (128, num_blocks[2], 2, 1), (128, num_blocks[3], 1, 2)]
    for planes_arg, num, stride, scale_factor in layer_cfg:
        strides = [stride] + [1] * (num - 1)
        for s in strides:
            planes = in_planes * s
            blk = {"stride": s, "scale_factor": scale_factor}
            blk["w1"] = _conv_w_to_mat(conv_w(planes, in_planes, 3), C_PAD, C_PAD)
            blk["g1"], blk["be1"] = bn_pair(planes)
            blk["w2"] = _conv_w_to_mat(conv_w(planes, planes, 3), C_PAD, C_PAD)
            blk["g2"], blk["be2"] = bn_pair(planes)
            if s == 1 and scale_factor == 1:
                blk["w_sc"] = None
                blk["g_sc"] = None
                blk["be_sc"] = None
            else:
                blk["w_sc"] = _conv_w_to_mat(conv_w(planes, in_planes, 1), C_PAD, C_PAD)
                blk["g_sc"], blk["be_sc"] = bn_pair(planes)
            blocks.append(blk)
            in_planes = planes_arg
    params["blocks"] = blocks

    params["fc_w"] = (jax.random.normal(next(keys), (128, 2 * z_dim), jnp.float32)
                      * (1.0 / 128.0 ** 0.5)).astype(jnp.bfloat16)
    params["fc_b"] = 0.05 * jax.random.normal(next(keys), (1, 2 * z_dim), jnp.float32)
    return params


if __name__ == "__main__":
    key = jax.random.PRNGKey(0)
    pkey, zkey = jax.random.split(key)
    params = init_params(pkey, nc=1, z_dim=10)
    # NCHW input like PyTorch: (2, 1, 32, 32); six stride-2 stages -> 1x1 spatial.
    z = jax.random.normal(zkey, (2, 1, 32, 32), jnp.float32)

    fwd_pallas = jax.jit(lambda x: resnet20enc_forward(x, params, PALLAS_OPS))
    fwd_ref = jax.jit(lambda x: resnet20enc_forward(x, params, REF_OPS))

    mu, logvar, feature = jax.block_until_ready(fwd_pallas(z))
    assert mu.shape == (2, 10) and logvar.shape == (2, 10) and feature.shape == (2, 128)

    mu_r, logvar_r, feat_r = jax.block_until_ready(fwd_ref(z))
    for got, want in ((mu, mu_r), (logvar, logvar_r), (feature, feat_r)):
        assert jnp.allclose(got, want, rtol=1e-2, atol=1e-3), "mismatch vs JAX reference"

    # TODO(synk): BatchNorm running_mean/running_var updates (training-time side
    # effects) are not modeled; only batch-statistics normalization is reproduced.
    print("KERNEL_OK")
</pallas_src>

<mosaic_0001>
module attributes {stable_mosaic.version = 11 : i64} {
  func.func @_conv_gemm_stats_kernel(%arg0: i32, %arg1: memref<256x9xbf16, #tpu.memory_space<vmem>>, %arg2: memref<9x128xbf16, #tpu.memory_space<vmem>>, %arg3: memref<256x128xf32, #tpu.memory_space<vmem>>, %arg4: memref<1x2x128xf32, #tpu.memory_space<vmem>>) attributes {dimension_semantics = [#tpu.dimension_semantics<parallel>], iteration_bounds = array<i64: 2>, scalar_prefetch = 0 : i64, scratch_operands = 0 : i64, tpu.core_type = #tpu.core_type<tc>, window_params = [{transform_indices = @transform_0, window_bounds = array<i64: 256, 9>}, {pipeline_mode = #tpu.pipeline_mode<synchronous>, transform_indices = @transform_1, window_bounds = array<i64: 9, 128>}, {transform_indices = @transform_2, window_bounds = array<i64: 256, 128>}, {transform_indices = @transform_3, window_bounds = array<i64: 1, 2, 128>}]} {
    %c0 = arith.constant 0 : index
    %c0_0 = arith.constant 0 : index
    %0 = vector.load %arg1[%c0, %c0_0] : memref<256x9xbf16, #tpu.memory_space<vmem>>, vector<256x9xbf16>
    %c0_1 = arith.constant 0 : index
    %c0_2 = arith.constant 0 : index
    %1 = vector.load %arg2[%c0_1, %c0_2] : memref<9x128xbf16, #tpu.memory_space<vmem>>, vector<9x128xbf16>
    %cst = arith.constant dense<0.000000e+00> : vector<256x128xf32>
    %2 = tpu.matmul %0, %1, %cst {dimension_numbers = #tpu.dot_dimension_numbers<[1], [0], [0], [1], [0, 0, 1, 1], [], []>} : vector<256x9xbf16>, vector<9x128xbf16>, vector<256x128xf32> -> vector<256x128xf32>
    %c0_3 = arith.constant 0 : index
    %c0_4 = arith.constant 0 : index
    %3 = vector.load %arg3[%c0_3, %c0_4] : memref<256x128xf32, #tpu.memory_space<vmem>>, vector<256x128xf32>
    tpu.vector_store %arg3[%c0_3, %c0_4], %2 {strides = array<i32>} : memref<256x128xf32, #tpu.memory_space<vmem>>, vector<256x128xf32>,
    %cst_5 = arith.constant dense<0.000000e+00> : vector<128xf32>
    %4 = vector.multi_reduction <add>, %2, %cst_5 [0] : vector<256x128xf32> to vector<128xf32>
    %5 = vector.shape_cast %4 : vector<128xf32> to vector<1x128xf32>
    %6 = arith.mulf %2, %2 : vector<256x128xf32>
    %cst_6 = arith.constant dense<0.000000e+00> : vector<128xf32>
    %7 = vector.multi_reduction <add>, %6, %cst_6 [0] : vector<256x128xf32> to vector<128xf32>
    %8 = vector.shape_cast %7 : vector<128xf32> to vector<1x128xf32>
    %9 = tpu.concatenate %5, %8 in 0 : vector<1x128xf32>, vector<1x128xf32> -> vector<2x128xf32>
    %10 = vector.shape_cast %9 : vector<2x128xf32> to vector<1x2x128xf32>
    %c0_7 = arith.constant 0 : index
    %c0_8 = arith.constant 0 : index
    %c0_9 = arith.constant 0 : index
    %11 = vector.load %arg4[%c0_7, %c0_8, %c0_9] : memref<1x2x128xf32, #tpu.memory_space<vmem>>, vector<1x2x128xf32>
    tpu.vector_store %arg4[%c0_7, %c0_8, %c0_9], %10 {strides = array<i32>} : memref<1x2x128xf32, #tpu.memory_space<vmem>>, vector<1x2x128xf32>,
    return
  }
  func.func @transform_0(%arg0: i32) -> (i32, i32) {
    %c0_i32 = arith.constant 0 : i32
    %c0_i32_0 = arith.constant 0 : i32
    return %arg0, %c0_i32 : i32, i32
  }
  func.func @transform_1(%arg0: i32) -> (i32, i32) {
    %c0_i32 = arith.constant 0 : i32
    %c0_i32_0 = arith.constant 0 : i32
    %c0_i32_1 = arith.constant 0 : i32
    return %c0_i32, %c0_i32_0 : i32, i32
  }
  func.func @transform_2(%arg0: i32) -> (i32, i32) {
    %c0_i32 = arith.constant 0 : i32
    %c0_i32_0 = arith.constant 0 : i32
    return %arg0, %c0_i32 : i32, i32
  }
  func.func @transform_3(%arg0: i32) -> (i32, i32, i32) {
    %c0_i32 = arith.constant 0 : i32
    %c0_i32_0 = arith.constant 0 : i32
    %c0_i32_1 = arith.constant 0 : i32
    return %arg0, %c0_i32, %c0_i32_0 : i32, i32, i32
  }
}

module attributes {stable_mosaic.version = 11 : i64} {
  func.func @_bn_relu_kernel(%arg0: i32, %arg1: memref<256x128xf32, #tpu.memory_space<vmem>>, %arg2: memref<1x128xf32, #tpu.memory_space<vmem>>, %arg3: memref<1x128xf32, #tpu.memory_space<vmem>>, %arg4: memref<256x128xf32, #tpu.memory_space<vmem>>) attributes {dimension_semantics = [#tpu.dimension_semantics<parallel>], iteration_bounds = array<i64: 2>, scalar_prefetch = 0 : i64, scratch_operands = 0 : i64, tpu.core_type = #tpu.core_type<tc>, window_params = [{transform_indices = @transform_0, window_bounds = array<i64: 256, 128>}, {pipeline_mode = #tpu.pipeline_mode<synchronous>, transform_indices = @transform_1, window_bounds = array<i64: 1, 128>}, {pipeline_mode = #tpu.pipeline_mode<synchronous>, transform_indices = @transform_2, window_bounds = array<i64: 1, 128>}, {transform_indices = @transform_3, window_bounds = array<i64: 256, 128>}]} {
    %c0 = arith.constant 0 : index
    %c0_0 = arith.constant 0 : index
    %0 = vector.load %arg1[%c0, %c0_0] : memref<256x128xf32, #tpu.memory_space<vmem>>, vector<256x128xf32>
    %c0_1 = arith.constant 0 : index
    %c0_2 = arith.constant 0 : index
    %1 = vector.load %arg2[%c0_1, %c0_2] : memref<1x128xf32, #tpu.memory_space<vmem>>, vector<1x128xf32>
    %2 = vector.broadcast %1 : vector<1x128xf32> to vector<256x128xf32>
    %3 = arith.mulf %0, %2 : vector<256x128xf32>
    %c0_3 = arith.constant 0 : index
    %c0_4 = arith.constant 0 : index
    %4 = vector.load %arg3[%c0_3, %c0_4] : memref<1x128xf32, #tpu.memory_space<vmem>>, vector<1x128xf32>
    %5 = vector.broadcast %4 : vector<1x128xf32> to vector<256x128xf32>
    %6 = arith.addf %3, %5 : vector<256x128xf32>
    %cst = arith.constant 0.000000e+00 : f32
    %7 = vector.broadcast %cst : f32 to vector<256x128xf32>
    %8 = arith.maximumf %6, %7 : vector<256x128xf32>
    %c0_5 = arith.constant 0 : index
    %c0_6 = arith.constant 0 : index
    %9 = vector.load %arg4[%c0_5, %c0_6] : memref<256x128xf32, #tpu.memory_space<vmem>>, vector<256x128xf32>
    tpu.vector_store %arg4[%c0_5, %c0_6], %8 {strides = array<i32>} : memref<256x128xf32, #tpu.memory_space<vmem>>, vector<256x128xf32>,
    return
  }
  func.func @transform_0(%arg0: i32) -> (i32, i32) {
    %c0_i32 = arith.constant 0 : i32
    %c0_i32_0 = arith.constant 0 : i32
    return %arg0, %c0_i32 : i32, i32
  }
  func.func @transform_1(%arg0: i32) -> (i32, i32) {
    %c0_i32 = arith.constant 0 : i32
    %c0_i32_0 = arith.constant 0 : i32
    %c0_i32_1 = arith.constant 0 : i32
    return %c0_i32, %c0_i32_0 : i32, i32
  }
  func.func @transform_2(%arg0: i32) -> (i32, i32) {
    %c0_i32 = arith.constant 0 : i32
    %c0_i32_0 = arith.constant 0 : i32
    %c0_i32_1 = arith.constant 0 : i32
    return %c0_i32, %c0_i32_0 : i32, i32
  }
  func.func @transform_3(%arg0: i32) -> (i32, i32) {
    %c0_i32 = arith.constant 0 : i32
    %c0_i32_0 = arith.constant 0 : i32
    return %arg0, %c0_i32 : i32, i32
  }
}

module attributes {stable_mosaic.version = 11 : i64} {
  func.func @_conv_gemm_stats_kernel(%arg0: i32, %arg1: memref<128x128xbf16, #tpu.memory_space<vmem>>, %arg2: memref<128x128xbf16, #tpu.memory_space<vmem>>, %arg3: memref<128x128xf32, #tpu.memory_space<vmem>>, %arg4: memref<1x2x128xf32, #tpu.memory_space<vmem>>) attributes {dimension_semantics = [#tpu.dimension_semantics<parallel>], iteration_bounds = array<i64: 1>, scalar_prefetch = 0 : i64, scratch_operands = 0 : i64, tpu.core_type = #tpu.core_type<tc>, window_params = [{transform_indices = @transform_0, window_bounds = array<i64: 128, 128>}, {pipeline_mode = #tpu.pipeline_mode<synchronous>, transform_indices = @transform_1, window_bounds = array<i64: 128, 128>}, {transform_indices = @transform_2, window_bounds = array<i64: 128, 128>}, {transform_indices = @transform_3, window_bounds = array<i64: 1, 2, 128>}]} {
    %c0 = arith.constant 0 : index
    %c0_0 = arith.constant 0 : index
    %0 = vector.load %arg1[%c0, %c0_0] : memref<128x128xbf16, #tpu.memory_space<vmem>>, vector<128x128xbf16>
    %c0_1 = arith.constant 0 : index
    %c0_2 = arith.constant 0 : index
    %1 = vector.load %arg2[%c0_1, %c0_2] : memref<128x128xbf16, #tpu.memory_space<vmem>>, vector<128x128xbf16>
    %cst = arith.constant dense<0.000000e+00> : vector<128x128xf32>
    %2 = tpu.matmul %0, %1, %cst {dimension_numbers = #tpu.dot_dimension_numbers<[1], [0], [0], [1], [0, 0, 1, 1], [], []>} : vector<128x128xbf16>, vector<128x128xbf16>, vector<128x128xf32> -> vector<128x128xf32>
    %c0_3 = arith.constant 0 : index
    %c0_4 = arith.constant 0 : index
    %3 = vector.load %arg3[%c0_3, %c0_4] : memref<128x128xf32, #tpu.memory_space<vmem>>, vector<128x128xf32>
    tpu.vector_store %arg3[%c0_3, %c0_4], %2 {strides = array<i32>} : memref<128x128xf32, #tpu.memory_space<vmem>>, vector<128x128xf32>,
    %cst_5 = arith.constant dense<0.000000e+00> : vector<128xf32>
    %4 = vector.multi_reduction <add>, %2, %cst_5 [0] : vector<128x128xf32> to vector<128xf32>
    %5 = vector.shape_cast %4 : vector<128xf32> to vector<1x128xf32>
    %6 = arith.mulf %2, %2 : vector<128x128xf32>
    %cst_6 = arith.constant dense<0.000000e+00> : vector<128xf32>
    %7 = vector.multi_reduction <add>, %6, %cst_6 [0] : vector<128x128xf32> to vector<128xf32>
    %8 = vector.shape_cast %7 : vector<128xf32> to vector<1x128xf32>
    %9 = tpu.concatenate %5, %8 in 0 : vector<1x128xf32>, vector<1x128xf32> -> vector<2x128xf32>
    %10 = vector.shape_cast %9 : vector<2x128xf32> to vector<1x2x128xf32>
    %c0_7 = arith.constant 0 : index
    %c0_8 = arith.constant 0 : index
    %c0_9 = arith.constant 0 : index
    %11 = vector.load %arg4[%c0_7, %c0_8, %c0_9] : memref<1x2x128xf32, #tpu.memory_space<vmem>>, vector<1x2x128xf32>
    tpu.vector_store %arg4[%c0_7, %c0_8, %c0_9], %10 {strides = array<i32>} : memref<1x2x128xf32, #tpu.memory_space<vmem>>, vector<1x2x128xf32>,
    return
  }
  func.func @transform_0(%arg0: i32) -> (i32, i32) {
    %c0_i32 = arith.constant 0 : i32
    %c0_i32_0 = arith.constant 0 : i32
    return %arg0, %c0_i32 : i32, i32
  }
  func.func @transform_1(%arg0: i32) -> (i32, i32) {
    %c0_i32 = arith.constant 0 : i32
    %c0_i32_0 = arith.constant 0 : i32
    %c0_i32_1 = arith.constant 0 : i32
    return %c0_i32, %c0_i32_0 : i32, i32
  }
  func.func @transform_2(%arg0: i32) -> (i32, i32) {
    %c0_i32 = arith.constant 0 : i32
    %c0_i32_0 = arith.constant 0 : i32
    return %arg0, %c0_i32 : i32, i32
  }
  func.func @transform_3(%arg0: i32) -> (i32, i32, i32) {
    %c0_i32 = arith.constant 0 : i32
    %c0_i32_0 = arith.constant 0 : i32
    %c0_i32_1 = arith.constant 0 : i32
    return %arg0, %c0_i32, %c0_i32_0 : i32, i32, i32
  }
}

module attributes {stable_mosaic.version = 11 : i64} {
  func.func @_conv_gemm_stats_kernel(%arg0: i32, %arg1: memref<128x1152xbf16, #tpu.memory_space<vmem>>, %arg2: memref<1152x128xbf16, #tpu.memory_space<vmem>>, %arg3: memref<128x128xf32, #tpu.memory_space<vmem>>, %arg4: memref<1x2x128xf32, #tpu.memory_space<vmem>>) attributes {dimension_semantics = [#tpu.dimension_semantics<parallel>], iteration_bounds = array<i64: 1>, scalar_prefetch = 0 : i64, scratch_operands = 0 : i64, tpu.core_type = #tpu.core_type<tc>, window_params = [{transform_indices = @transform_0, window_bounds = array<i64: 128, 1152>}, {pipeline_mode = #tpu.pipeline_mode<synchronous>, transform_indices = @transform_1, window_bounds = array<i64: 1152, 128>}, {transform_indices = @transform_2, window_bounds = array<i64: 128, 128>}, {transform_indices = @transform_3, window_bounds = array<i64: 1, 2, 128>}]} {
    %c0 = arith.constant 0 : index
    %c0_0 = arith.constant 0 : index
    %0 = vector.load %arg1[%c0, %c0_0] : memref<128x1152xbf16, #tpu.memory_space<vmem>>, vector<128x1152xbf16>
    %c0_1 = arith.constant 0 : index
    %c0_2 = arith.constant 0 : index
    %1 = vector.load %arg2[%c0_1, %c0_2] : memref<1152x128xbf16, #tpu.memory_space<vmem>>, vector<1152x128xbf16>
    %cst = arith.constant dense<0.000000e+00> : vector<128x128xf32>
    %2 = tpu.matmul %0, %1, %cst {dimension_numbers = #tpu.dot_dimension_numbers<[1], [0], [0], [1], [0, 0, 1, 1], [], []>} : vector<128x1152xbf16>, vector<1152x128xbf16>, vector<128x128xf32> -> vector<128x128xf32>
    %c0_3 = arith.constant 0 : index
    %c0_4 = arith.constant 0 : index
    %3 = vector.load %arg3[%c0_3, %c0_4] : memref<128x128xf32, #tpu.memory_space<vmem>>, vector<128x128xf32>
    tpu.vector_store %arg3[%c0_3, %c0_4], %2 {strides = array<i32>} : memref<128x128xf32, #tpu.memory_space<vmem>>, vector<128x128xf32>,
    %cst_5 = arith.constant dense<0.000000e+00> : vector<128xf32>
    %4 = vector.multi_reduction <add>, %2, %cst_5 [0] : vector<128x128xf32> to vector<128xf32>
    %5 = vector.shape_cast %4 : vector<128xf32> to vector<1x128xf32>
    %6 = arith.mulf %2, %2 : vector<128x128xf32>
    %cst_6 = arith.constant dense<0.000000e+00> : vector<128xf32>
    %7 = vector.multi_reduction <add>, %6, %cst_6 [0] : vector<128x128xf32> to vector<128xf32>
    %8 = vector.shape_cast %7 : vector<128xf32> to vector<1x128xf32>
    %9 = tpu.concatenate %5, %8 in 0 : vector<1x128xf32>, vector<1x128xf32> -> vector<2x128xf32>
    %10 = vector.shape_cast %9 : vector<2x128xf32> to vector<1x2x128xf32>
    %c0_7 = arith.constant 0 : index
    %c0_8 = arith.constant 0 : index
    %c0_9 = arith.constant 0 : index
    %11 = vector.load %arg4[%c0_7, %c0_8, %c0_9] : memref<1x2x128xf32, #tpu.memory_space<vmem>>, vector<1x2x128xf32>
    tpu.vector_store %arg4[%c0_7, %c0_8, %c0_9], %10 {strides = array<i32>} : memref<1x2x128xf32, #tpu.memory_space<vmem>>, vector<1x2x128xf32>,
    return
  }
  func.func @transform_0(%arg0: i32) -> (i32, i32) {
    %c0_i32 = arith.constant 0 : i32
    %c0_i32_0 = arith.constant 0 : i32
    return %arg0, %c0_i32 : i32, i32
  }
  func.func @transform_1(%arg0: i32) -> (i32, i32) {
    %c0_i32 = arith.constant 0 : i32
    %c0_i32_0 = arith.constant 0 : i32
    %c0_i32_1 = arith.constant 0 : i32
    return %c0_i32, %c0_i32_0 : i32, i32
  }
  func.func @transform_2(%arg0: i32) -> (i32, i32) {
    %c0_i32 = arith.constant 0 : i32
    %c0_i32_0 = arith.constant 0 : i32
    return %arg0, %c0_i32 : i32, i32
  }
  func.func @transform_3(%arg0: i32) -> (i32, i32, i32) {
    %c0_i32 = arith.constant 0 : i32
    %c0_i32_0 = arith.constant 0 : i32
    %c0_i32_1 = arith.constant 0 : i32
    return %arg0, %c0_i32, %c0_i32_0 : i32, i32, i32
  }
}

module attributes {stable_mosaic.version = 11 : i64} {
  func.func @_bn_relu_kernel(%arg0: i32, %arg1: memref<128x128xf32, #tpu.memory_space<vmem>>, %arg2: memref<1x128xf32, #tpu.memory_space<vmem>>, %arg3: memref<1x128xf32, #tpu.memory_space<vmem>>, %arg4: memref<128x128xf32, #tpu.memory_space<vmem>>) attributes {dimension_semantics = [#tpu.dimension_semantics<parallel>], iteration_bounds = array<i64: 1>, scalar_prefetch = 0 : i64, scratch_operands = 0 : i64, tpu.core_type = #tpu.core_type<tc>, window_params = [{transform_indices = @transform_0, window_bounds = array<i64: 128, 128>}, {pipeline_mode = #tpu.pipeline_mode<synchronous>, transform_indices = @transform_1, window_bounds = array<i64: 1, 128>}, {pipeline_mode = #tpu.pipeline_mode<synchronous>, transform_indices = @transform_2, window_bounds = array<i64: 1, 128>}, {transform_indices = @transform_3, window_bounds = array<i64: 128, 128>}]} {
    %c0 = arith.constant 0 : index
    %c0_0 = arith.constant 0 : index
    %0 = vector.load %arg1[%c0, %c0_0] : memref<128x128xf32, #tpu.memory_space<vmem>>, vector<128x128xf32>
    %c0_1 = arith.constant 0 : index
    %c0_2 = arith.constant 0 : index
    %1 = vector.load %arg2[%c0_1, %c0_2] : memref<1x128xf32, #tpu.memory_space<vmem>>, vector<1x128xf32>
    %2 = vector.broadcast %1 : vector<1x128xf32> to vector<128x128xf32>
    %3 = arith.mulf %0, %2 : vector<128x128xf32>
    %c0_3 = arith.constant 0 : index
    %c0_4 = arith.constant 0 : index
    %4 = vector.load %arg3[%c0_3, %c0_4] : memref<1x128xf32, #tpu.memory_space<vmem>>, vector<1x128xf32>
    %5 = vector.broadcast %4 : vector<1x128xf32> to vector<128x128xf32>
    %6 = arith.addf %3, %5 : vector<128x128xf32>
    %cst = arith.constant 0.000000e+00 : f32
    %7 = vector.broadcast %cst : f32 to vector<128x128xf32>
    %8 = arith.maximumf %6, %7 : vector<128x128xf32>
    %c0_5 = arith.constant 0 : index
    %c0_6 = arith.constant 0 : index
    %9 = vector.load %arg4[%c0_5, %c0_6] : memref<128x128xf32, #tpu.memory_space<vmem>>, vector<128x128xf32>
    tpu.vector_store %arg4[%c0_5, %c0_6], %8 {strides = array<i32>} : memref<128x128xf32, #tpu.memory_space<vmem>>, vector<128x128xf32>,
    return
  }
  func.func @transform_0(%arg0: i32) -> (i32, i32) {
    %c0_i32 = arith.constant 0 : i32
    %c0_i32_0 = arith.constant 0 : i32
    return %arg0, %c0_i32 : i32, i32
  }
  func.func @transform_1(%arg0: i32) -> (i32, i32) {
    %c0_i32 = arith.constant 0 : i32
    %c0_i32_0 = arith.constant 0 : i32
    %c0_i32_1 = arith.constant 0 : i32
    return %c0_i32, %c0_i32_0 : i32, i32
  }
  func.func @transform_2(%arg0: i32) -> (i32, i32) {
    %c0_i32 = arith.constant 0 : i32
    %c0_i32_0 = arith.constant 0 : i32
    %c0_i32_1 = arith.constant 0 : i32
    return %c0_i32, %c0_i32_0 : i32, i32
  }
  func.func @transform_3(%arg0: i32) -> (i32, i32) {
    %c0_i32 = arith.constant 0 : i32
    %c0_i32_0 = arith.constant 0 : i32
    return %arg0, %c0_i32 : i32, i32
  }
}

module attributes {stable_mosaic.version = 11 : i64} {
  func.func @_bn_add_bn_relu_kernel(%arg0: i32, %arg1: memref<128x128xf32, #tpu.memory_space<vmem>>, %arg2: memref<128x128xf32, #tpu.memory_space<vmem>>, %arg3: memref<1x128xf32, #tpu.memory_space<vmem>>, %arg4: memref<1x128xf32, #tpu.memory_space<vmem>>, %arg5: memref<1x128xf32, #tpu.memory_space<vmem>>, %arg6: memref<1x128xf32, #tpu.memory_space<vmem>>, %arg7: memref<128x128xf32, #tpu.memory_space<vmem>>) attributes {dimension_semantics = [#tpu.dimension_semantics<parallel>], iteration_bounds = array<i64: 1>, scalar_prefetch = 0 : i64, scratch_operands = 0 : i64, tpu.core_type = #tpu.core_type<tc>, window_params = [{transform_indices = @transform_0, window_bounds = array<i64: 128, 128>}, {transform_indices = @transform_1, window_bounds = array<i64: 128, 128>}, {pipeline_mode = #tpu.pipeline_mode<synchronous>, transform_indices = @transform_2, window_bounds = array<i64: 1, 128>}, {pipeline_mode = #tpu.pipeline_mode<synchronous>, transform_indices = @transform_3, window_bounds = array<i64: 1, 128>}, {pipeline_mode = #tpu.pipeline_mode<synchronous>, transform_indices = @transform_4, window_bounds = array<i64: 1, 128>}, {pipeline_mode = #tpu.pipeline_mode<synchronous>, transform_indices = @transform_5, window_bounds = array<i64: 1, 128>}, {transform_indices = @transform_6, window_bounds = array<i64: 128, 128>}]} {
    %c0 = arith.constant 0 : index
    %c0_0 = arith.constant 0 : index
    %0 = vector.load %arg1[%c0, %c0_0] : memref<128x128xf32, #tpu.memory_space<vmem>>, vector<128x128xf32>
    %c0_1 = arith.constant 0 : index
    %c0_2 = arith.constant 0 : index
    %1 = vector.load %arg3[%c0_1, %c0_2] : memref<1x128xf32, #tpu.memory_space<vmem>>, vector<1x128xf32>
    %2 = vector.broadcast %1 : vector<1x128xf32> to vector<128x128xf32>
    %3 = arith.mulf %0, %2 : vector<128x128xf32>
    %c0_3 = arith.constant 0 : index
    %c0_4 = arith.constant 0 : index
    %4 = vector.load %arg4[%c0_3, %c0_4] : memref<1x128xf32, #tpu.memory_space<vmem>>, vector<1x128xf32>
    %5 = vector.broadcast %4 : vector<1x128xf32> to vector<128x128xf32>
    %6 = arith.addf %3, %5 : vector<128x128xf32>
    %c0_5 = arith.constant 0 : index
    %c0_6 = arith.constant 0 : index
    %7 = vector.load %arg2[%c0_5, %c0_6] : memref<128x128xf32, #tpu.memory_space<vmem>>, vector<128x128xf32>
    %c0_7 = arith.constant 0 : index
    %c0_8 = arith.constant 0 : index
    %8 = vector.load %arg5[%c0_7, %c0_8] : memref<1x128xf32, #tpu.memory_space<vmem>>, vector<1x128xf32>
    %9 = vector.broadcast %8 : vector<1x128xf32> to vector<128x128xf32>
    %10 = arith.mulf %7, %9 : vector<128x128xf32>
    %11 = arith.addf %6, %10 : vector<128x128xf32>
    %c0_9 = arith.constant 0 : index
    %c0_10 = arith.constant 0 : index
    %12 = vector.load %arg6[%c0_9, %c0_10] : memref<1x128xf32, #tpu.memory_space<vmem>>, vector<1x128xf32>
    %13 = vector.broadcast %12 : vector<1x128xf32> to vector<128x128xf32>
    %14 = arith.addf %11, %13 : vector<128x128xf32>
    %cst = arith.constant 0.000000e+00 : f32
    %15 = vector.broadcast %cst : f32 to vector<128x128xf32>
    %16 = arith.maximumf %14, %15 : vector<128x128xf32>
    %c0_11 = arith.constant 0 : index
    %c0_12 = arith.constant 0 : index
    %17 = vector.load %arg7[%c0_11, %c0_12] : memref<128x128xf32, #tpu.memory_space<vmem>>, vector<128x128xf32>
    tpu.vector_store %arg7[%c0_11, %c0_12], %16 {strides = array<i32>} : memref<128x128xf32, #tpu.memory_space<vmem>>, vector<128x128xf32>,
    return
  }
  func.func @transform_0(%arg0: i32) -> (i32, i32) {
    %c0_i32 = arith.constant 0 : i32
    %c0_i32_0 = arith.constant 0 : i32
    return %arg0, %c0_i32 : i32, i32
  }
  func.func @transform_1(%arg0: i32) -> (i32, i32) {
    %c0_i32 = arith.constant 0 : i32
    %c0_i32_0 = arith.constant 0 : i32
    return %arg0, %c0_i32 : i32, i32
  }
  func.func @transform_2(%arg0: i32) -> (i32, i32) {
    %c0_i32 = arith.constant 0 : i32
    %c0_i32_0 = arith.constant 0 : i32
    %c0_i32_1 = arith.constant 0 : i32
    return %c0_i32, %c0_i32_0 : i32, i32
  }
  func.func @transform_3(%arg0: i32) -> (i32, i32) {
    %c0_i32 = arith.constant 0 : i32
    %c0_i32_0 = arith.constant 0 : i32
    %c0_i32_1 = arith.constant 0 : i32
    return %c0_i32, %c0_i32_0 : i32, i32
  }
  func.func @transform_4(%arg0: i32) -> (i32, i32) {
    %c0_i32 = arith.constant 0 : i32
    %c0_i32_0 = arith.constant 0 : i32
    %c0_i32_1 = arith.constant 0 : i32
    return %c0_i32, %c0_i32_0 : i32, i32
  }
  func.func @transform_5(%arg0: i32) -> (i32, i32) {
    %c0_i32 = arith.constant 0 : i32
    %c0_i32_0 = arith.constant 0 : i32
    %c0_i32_1 = arith.constant 0 : i32
    return %c0_i32, %c0_i32_0 : i32, i32
  }
  func.func @transform_6(%arg0: i32) -> (i32, i32) {
    %c0_i32 = arith.constant 0 : i32
    %c0_i32_0 = arith.constant 0 : i32
    return %arg0, %c0_i32 : i32, i32
  }
}

module attributes {stable_mosaic.version = 11 : i64} {
  func.func @_conv_gemm_stats_kernel(%arg0: i32, %arg1: memref<32x128xbf16, #tpu.memory_space<vmem>>, %arg2: memref<128x128xbf16, #tpu.memory_space<vmem>>, %arg3: memref<32x128xf32, #tpu.memory_space<vmem>>, %arg4: memref<1x2x128xf32, #tpu.memory_space<vmem>>) attributes {dimension_semantics = [#tpu.dimension_semantics<parallel>], iteration_bounds = array<i64: 1>, scalar_prefetch = 0 : i64, scratch_operands = 0 : i64, tpu.core_type = #tpu.core_type<tc>, window_params = [{transform_indices = @transform_0, window_bounds = array<i64: 32, 128>}, {pipeline_mode = #tpu.pipeline_mode<synchronous>, transform_indices = @transform_1, window_bounds = array<i64: 128, 128>}, {transform_indices = @transform_2, window_bounds = array<i64: 32, 128>}, {transform_indices = @transform_3, window_bounds = array<i64: 1, 2, 128>}]} {
    %c0 = arith.constant 0 : index
    %c0_0 = arith.constant 0 : index
    %0 = vector.load %arg1[%c0, %c0_0] : memref<32x128xbf16, #tpu.memory_space<vmem>>, vector<32x128xbf16>
    %c0_1 = arith.constant 0 : index
    %c0_2 = arith.constant 0 : index
    %1 = vector.load %arg2[%c0_1, %c0_2] : memref<128x128xbf16, #tpu.memory_space<vmem>>, vector<128x128xbf16>
    %cst = arith.constant dense<0.000000e+00> : vector<32x128xf32>
    %2 = tpu.matmul %0, %1, %cst {dimension_numbers = #tpu.dot_dimension_numbers<[1], [0], [0], [1], [0, 0, 1, 1], [], []>} : vector<32x128xbf16>, vector<128x128xbf16>, vector<32x128xf32> -> vector<32x128xf32>
    %c0_3 = arith.constant 0 : index
    %c0_4 = arith.constant 0 : index
    %3 = vector.load %arg3[%c0_3, %c0_4] : memref<32x128xf32, #tpu.memory_space<vmem>>, vector<32x128xf32>
    tpu.vector_store %arg3[%c0_3, %c0_4], %2 {strides = array<i32>} : memref<32x128xf32, #tpu.memory_space<vmem>>, vector<32x128xf32>,
    %cst_5 = arith.constant dense<0.000000e+00> : vector<128xf32>
    %4 = vector.multi_reduction <add>, %2, %cst_5 [0] : vector<32x128xf32> to vector<128xf32>
    %5 = vector.shape_cast %4 : vector<128xf32> to vector<1x128xf32>
    %6 = arith.mulf %2, %2 : vector<32x128xf32>
    %cst_6 = arith.constant dense<0.000000e+00> : vector<128xf32>
    %7 = vector.multi_reduction <add>, %6, %cst_6 [0] : vector<32x128xf32> to vector<128xf32>
    %8 = vector.shape_cast %7 : vector<128xf32> to vector<1x128xf32>
    %9 = tpu.concatenate %5, %8 in 0 : vector<1x128xf32>, vector<1x128xf32> -> vector<2x128xf32>
    %10 = vector.shape_cast %9 : vector<2x128xf32> to vector<1x2x128xf32>
    %c0_7 = arith.constant 0 : index
    %c0_8 = arith.constant 0 : index
    %c0_9 = arith.constant 0 : index
    %11 = vector.load %arg4[%c0_7, %c0_8, %c0_9] : memref<1x2x128xf32, #tpu.memory_space<vmem>>, vector<1x2x128xf32>
    tpu.vector_store %arg4[%c0_7, %c0_8, %c0_9], %10 {strides = array<i32>} : memref<1x2x128xf32, #tpu.memory_space<vmem>>, vector<1x2x128xf32>,
    return
  }
  func.func @transform_0(%arg0: i32) -> (i32, i32) {
    %c0_i32 = arith.constant 0 : i32
    %c0_i32_0 = arith.constant 0 : i32
    return %arg0, %c0_i32 : i32, i32
  }
  func.func @transform_1(%arg0: i32) -> (i32, i32) {
    %c0_i32 = arith.constant 0 : i32
    %c0_i32_0 = arith.constant 0 : i32
    %c0_i32_1 = arith.constant 0 : i32
    return %c0_i32, %c0_i32_0 : i32, i32
  }
  func.func @transform_2(%arg0: i32) -> (i32, i32) {
    %c0_i32 = arith.constant 0 : i32
    %c0_i32_0 = arith.constant 0 : i32
    return %arg0, %c0_i32 : i32, i32
  }
  func.func @transform_3(%arg0: i32) -> (i32, i32, i32) {
    %c0_i32 = arith.constant 0 : i32
    %c0_i32_0 = arith.constant 0 : i32
    %c0_i32_1 = arith.constant 0 : i32
    return %arg0, %c0_i32, %c0_i32_0 : i32, i32, i32
  }
}

module attributes {stable_mosaic.version = 11 : i64} {
  func.func @_conv_gemm_stats_kernel(%arg0: i32, %arg1: memref<32x1152xbf16, #tpu.memory_space<vmem>>, %arg2: memref<1152x128xbf16, #tpu.memory_space<vmem>>, %arg3: memref<32x128xf32, #tpu.memory_space<vmem>>, %arg4: memref<1x2x128xf32, #tpu.memory_space<vmem>>) attributes {dimension_semantics = [#tpu.dimension_semantics<parallel>], iteration_bounds = array<i64: 1>, scalar_prefetch = 0 : i64, scratch_operands = 0 : i64, tpu.core_type = #tpu.core_type<tc>, window_params = [{transform_indices = @transform_0, window_bounds = array<i64: 32, 1152>}, {pipeline_mode = #tpu.pipeline_mode<synchronous>, transform_indices = @transform_1, window_bounds = array<i64: 1152, 128>}, {transform_indices = @transform_2, window_bounds = array<i64: 32, 128>}, {transform_indices = @transform_3, window_bounds = array<i64: 1, 2, 128>}]} {
    %c0 = arith.constant 0 : index
    %c0_0 = arith.constant 0 : index
    %0 = vector.load %arg1[%c0, %c0_0] : memref<32x1152xbf16, #tpu.memory_space<vmem>>, vector<32x1152xbf16>
    %c0_1 = arith.constant 0 : index
    %c0_2 = arith.constant 0 : index
    %1 = vector.load %arg2[%c0_1, %c0_2] : memref<1152x128xbf16, #tpu.memory_space<vmem>>, vector<1152x128xbf16>
    %cst = arith.constant dense<0.000000e+00> : vector<32x128xf32>
    %2 = tpu.matmul %0, %1, %cst {dimension_numbers = #tpu.dot_dimension_numbers<[1], [0], [0], [1], [0, 0, 1, 1], [], []>} : vector<32x1152xbf16>, vector<1152x128xbf16>, vector<32x128xf32> -> vector<32x128xf32>
    %c0_3 = arith.constant 0 : index
    %c0_4 = arith.constant 0 : index
    %3 = vector.load %arg3[%c0_3, %c0_4] : memref<32x128xf32, #tpu.memory_space<vmem>>, vector<32x128xf32>
    tpu.vector_store %arg3[%c0_3, %c0_4], %2 {strides = array<i32>} : memref<32x128xf32, #tpu.memory_space<vmem>>, vector<32x128xf32>,
    %cst_5 = arith.constant dense<0.000000e+00> : vector<128xf32>
    %4 = vector.multi_reduction <add>, %2, %cst_5 [0] : vector<32x128xf32> to vector<128xf32>
    %5 = vector.shape_cast %4 : vector<128xf32> to vector<1x128xf32>
    %6 = arith.mulf %2, %2 : vector<32x128xf32>
    %cst_6 = arith.constant dense<0.000000e+00> : vector<128xf32>
    %7 = vector.multi_reduction <add>, %6, %cst_6 [0] : vector<32x128xf32> to vector<128xf32>
    %8 = vector.shape_cast %7 : vector<128xf32> to vector<1x128xf32>
    %9 = tpu.concatenate %5, %8 in 0 : vector<1x128xf32>, vector<1x128xf32> -> vector<2x128xf32>
    %10 = vector.shape_cast %9 : vector<2x128xf32> to vector<1x2x128xf32>
    %c0_7 = arith.constant 0 : index
    %c0_8 = arith.constant 0 : index
    %c0_9 = arith.constant 0 : index
    %11 = vector.load %arg4[%c0_7, %c0_8, %c0_9] : memref<1x2x128xf32, #tpu.memory_space<vmem>>, vector<1x2x128xf32>
    tpu.vector_store %arg4[%c0_7, %c0_8, %c0_9], %10 {strides = array<i32>} : memref<1x2x128xf32, #tpu.memory_space<vmem>>, vector<1x2x128xf32>,
    return
  }
  func.func @transform_0(%arg0: i32) -> (i32, i32) {
    %c0_i32 = arith.constant 0 : i32
    %c0_i32_0 = arith.constant 0 : i32
    return %arg0, %c0_i32 : i32, i32
  }
  func.func @transform_1(%arg0: i32) -> (i32, i32) {
    %c0_i32 = arith.constant 0 : i32
    %c0_i32_0 = arith.constant 0 : i32
    %c0_i32_1 = arith.constant 0 : i32
    return %c0_i32, %c0_i32_0 : i32, i32
  }
  func.func @transform_2(%arg0: i32) -> (i32, i32) {
    %c0_i32 = arith.constant 0 : i32
    %c0_i32_0 = arith.constant 0 : i32
    return %arg0, %c0_i32 : i32, i32
  }
  func.func @transform_3(%arg0: i32) -> (i32, i32, i32) {
    %c0_i32 = arith.constant 0 : i32
    %c0_i32_0 = arith.constant 0 : i32
    %c0_i32_1 = arith.constant 0 : i32
    return %arg0, %c0_i32, %c0_i32_0 : i32, i32, i32
  }
}

module attributes {stable_mosaic.version = 11 : i64} {
  func.func @_bn_relu_kernel(%arg0: i32, %arg1: memref<32x128xf32, #tpu.memory_space<vmem>>, %arg2: memref<1x128xf32, #tpu.memory_space<vmem>>, %arg3: memref<1x128xf32, #tpu.memory_space<vmem>>, %arg4: memref<32x128xf32, #tpu.memory_space<vmem>>) attributes {dimension_semantics = [#tpu.dimension_semantics<parallel>], iteration_bounds = array<i64: 1>, scalar_prefetch = 0 : i64, scratch_operands = 0 : i64, tpu.core_type = #tpu.core_type<tc>, window_params = [{transform_indices = @transform_0, window_bounds = array<i64: 32, 128>}, {pipeline_mode = #tpu.pipeline_mode<synchronous>, transform_indices = @transform_1, window_bounds = array<i64: 1, 128>}, {pipeline_mode = #tpu.pipeline_mode<synchronous>, transform_indices = @transform_2, window_bounds = array<i64: 1, 128>}, {transform_indices = @transform_3, window_bounds = array<i64: 32, 128>}]} {
    %c0 = arith.constant 0 : index
    %c0_0 = arith.constant 0 : index
    %0 = vector.load %arg1[%c0, %c0_0] : memref<32x128xf32, #tpu.memory_space<vmem>>, vector<32x128xf32>
    %c0_1 = arith.constant 0 : index
    %c0_2 = arith.constant 0 : index
    %1 = vector.load %arg2[%c0_1, %c0_2] : memref<1x128xf32, #tpu.memory_space<vmem>>, vector<1x128xf32>
    %2 = vector.broadcast %1 : vector<1x128xf32> to vector<32x128xf32>
    %3 = arith.mulf %0, %2 : vector<32x128xf32>
    %c0_3 = arith.constant 0 : index
    %c0_4 = arith.constant 0 : index
    %4 = vector.load %arg3[%c0_3, %c0_4] : memref<1x128xf32, #tpu.memory_space<vmem>>, vector<1x128xf32>
    %5 = vector.broadcast %4 : vector<1x128xf32> to vector<32x128xf32>
    %6 = arith.addf %3, %5 : vector<32x128xf32>
    %cst = arith.constant 0.000000e+00 : f32
    %7 = vector.broadcast %cst : f32 to vector<32x128xf32>
    %8 = arith.maximumf %6, %7 : vector<32x128xf32>
    %c0_5 = arith.constant 0 : index
    %c0_6 = arith.constant 0 : index
    %9 = vector.load %arg4[%c0_5, %c0_6] : memref<32x128xf32, #tpu.memory_space<vmem>>, vector<32x128xf32>
    tpu.vector_store %arg4[%c0_5, %c0_6], %8 {strides = array<i32>} : memref<32x128xf32, #tpu.memory_space<vmem>>, vector<32x128xf32>,
    return
  }
  func.func @transform_0(%arg0: i32) -> (i32, i32) {
    %c0_i32 = arith.constant 0 : i32
    %c0_i32_0 = arith.constant 0 : i32
    return %arg0, %c0_i32 : i32, i32
  }
  func.func @transform_1(%arg0: i32) -> (i32, i32) {
    %c0_i32 = arith.constant 0 : i32
    %c0_i32_0 = arith.constant 0 : i32
    %c0_i32_1 = arith.constant 0 : i32
    return %c0_i32, %c0_i32_0 : i32, i32
  }
  func.func @transform_2(%arg0: i32) -> (i32, i32) {
    %c0_i32 = arith.constant 0 : i32
    %c0_i32_0 = arith.constant 0 : i32
    %c0_i32_1 = arith.constant 0 : i32
    return %c0_i32, %c0_i32_0 : i32, i32
  }
  func.func @transform_3(%arg0: i32) -> (i32, i32) {
    %c0_i32 = arith.constant 0 : i32
    %c0_i32_0 = arith.constant 0 : i32
    return %arg0, %c0_i32 : i32, i32
  }
}

module attributes {stable_mosaic.version = 11 : i64} {
  func.func @_bn_add_bn_relu_kernel(%arg0: i32, %arg1: memref<32x128xf32, #tpu.memory_space<vmem>>, %arg2: memref<32x128xf32, #tpu.memory_space<vmem>>, %arg3: memref<1x128xf32, #tpu.memory_space<vmem>>, %arg4: memref<1x128xf32, #tpu.memory_space<vmem>>, %arg5: memref<1x128xf32, #tpu.memory_space<vmem>>, %arg6: memref<1x128xf32, #tpu.memory_space<vmem>>, %arg7: memref<32x128xf32, #tpu.memory_space<vmem>>) attributes {dimension_semantics = [#tpu.dimension_semantics<parallel>], iteration_bounds = array<i64: 1>, scalar_prefetch = 0 : i64, scratch_operands = 0 : i64, tpu.core_type = #tpu.core_type<tc>, window_params = [{transform_indices = @transform_0, window_bounds = array<i64: 32, 128>}, {transform_indices = @transform_1, window_bounds = array<i64: 32, 128>}, {pipeline_mode = #tpu.pipeline_mode<synchronous>, transform_indices = @transform_2, window_bounds = array<i64: 1, 128>}, {pipeline_mode = #tpu.pipeline_mode<synchronous>, transform_indices = @transform_3, window_bounds = array<i64: 1, 128>}, {pipeline_mode = #tpu.pipeline_mode<synchronous>, transform_indices = @transform_4, window_bounds = array<i64: 1, 128>}, {pipeline_mode = #tpu.pipeline_mode<synchronous>, transform_indices = @transform_5, window_bounds = array<i64: 1, 128>}, {transform_indices = @transform_6, window_bounds = array<i64: 32, 128>}]} {
    %c0 = arith.constant 0 : index
    %c0_0 = arith.constant 0 : index
    %0 = vector.load %arg1[%c0, %c0_0] : memref<32x128xf32, #tpu.memory_space<vmem>>, vector<32x128xf32>
    %c0_1 = arith.constant 0 : index
    %c0_2 = arith.constant 0 : index
    %1 = vector.load %arg3[%c0_1, %c0_2] : memref<1x128xf32, #tpu.memory_space<vmem>>, vector<1x128xf32>
    %2 = vector.broadcast %1 : vector<1x128xf32> to vector<32x128xf32>
    %3 = arith.mulf %0, %2 : vector<32x128xf32>
    %c0_3 = arith.constant 0 : index
    %c0_4 = arith.constant 0 : index
    %4 = vector.load %arg4[%c0_3, %c0_4] : memref<1x128xf32, #tpu.memory_space<vmem>>, vector<1x128xf32>
    %5 = vector.broadcast %4 : vector<1x128xf32> to vector<32x128xf32>
    %6 = arith.addf %3, %5 : vector<32x128xf32>
    %c0_5 = arith.constant 0 : index
    %c0_6 = arith.constant 0 : index
    %7 = vector.load %arg2[%c0_5, %c0_6] : memref<32x128xf32, #tpu.memory_space<vmem>>, vector<32x128xf32>
    %c0_7 = arith.constant 0 : index
    %c0_8 = arith.constant 0 : index
    %8 = vector.load %arg5[%c0_7, %c0_8] : memref<1x128xf32, #tpu.memory_space<vmem>>, vector<1x128xf32>
    %9 = vector.broadcast %8 : vector<1x128xf32> to vector<32x128xf32>
    %10 = arith.mulf %7, %9 : vector<32x128xf32>
    %11 = arith.addf %6, %10 : vector<32x128xf32>
    %c0_9 = arith.constant 0 : index
    %c0_10 = arith.constant 0 : index
    %12 = vector.load %arg6[%c0_9, %c0_10] : memref<1x128xf32, #tpu.memory_space<vmem>>, vector<1x128xf32>
    %13 = vector.broadcast %12 : vector<1x128xf32> to vector<32x128xf32>
    %14 = arith.addf %11, %13 : vector<32x128xf32>
    %cst = arith.constant 0.000000e+00 : f32
    %15 = vector.broadcast %cst : f32 to vector<32x128xf32>
    %16 = arith.maximumf %14, %15 : vector<32x128xf32>
    %c0_11 = arith.constant 0 : index
    %c0_12 = arith.constant 0 : index
    %17 = vector.load %arg7[%c0_11, %c0_12] : memref<32x128xf32, #tpu.memory_space<vmem>>, vector<32x128xf32>
    tpu.vector_store %arg7[%c0_11, %c0_12], %16 {strides = array<i32>} : memref<32x128xf32, #tpu.memory_space<vmem>>, vector<32x128xf32>,
    return
  }
  func.func @transform_0(%arg0: i32) -> (i32, i32) {
    %c0_i32 = arith.constant 0 : i32
    %c0_i32_0 = arith.constant 0 : i32
    return %arg0, %c0_i32 : i32, i32
  }
  func.func @transform_1(%arg0: i32) -> (i32, i32) {
    %c0_i32 = arith.constant 0 : i32
    %c0_i32_0 = arith.constant 0 : i32
    return %arg0, %c0_i32 : i32, i32
  }
  func.func @transform_2(%arg0: i32) -> (i32, i32) {
    %c0_i32 = arith.constant 0 : i32
    %c0_i32_0 = arith.constant 0 : i32
    %c0_i32_1 = arith.constant 0 : i32
    return %c0_i32, %c0_i32_0 : i32, i32
  }
  func.func @transform_3(%arg0: i32) -> (i32, i32) {
    %c0_i32 = arith.constant 0 : i32
    %c0_i32_0 = arith.constant 0 : i32
    %c0_i32_1 = arith.constant 0 : i32
    return %c0_i32, %c0_i32_0 : i32, i32
  }
  func.func @transform_4(%arg0: i32) -> (i32, i32) {
    %c0_i32 = arith.constant 0 : i32
    %c0_i32_0 = arith.constant 0 : i32
    %c0_i32_1 = arith.constant 0 : i32
    return %c0_i32, %c0_i32_0 : i32, i32
  }
  func.func @transform_5(%arg0: i32) -> (i32, i32) {
    %c0_i32 = arith.constant 0 : i32
    %c0_i32_0 = arith.constant 0 : i32
    %c0_i32_1 = arith.constant 0 : i32
    return %c0_i32, %c0_i32_0 : i32, i32
  }
  func.func @transform_6(%arg0: i32) -> (i32, i32) {
    %c0_i32 = arith.constant 0 : i32
    %c0_i32_0 = arith.constant 0 : i32
    return %arg0, %c0_i32 : i32, i32
  }
}

module attributes {stable_mosaic.version = 11 : i64} {
  func.func @_conv_gemm_stats_kernel(%arg0: i32, %arg1: memref<8x128xbf16, #tpu.memory_space<vmem>>, %arg2: memref<128x128xbf16, #tpu.memory_space<vmem>>, %arg3: memref<8x128xf32, #tpu.memory_space<vmem>>, %arg4: memref<1x2x128xf32, #tpu.memory_space<vmem>>) attributes {dimension_semantics = [#tpu.dimension_semantics<parallel>], iteration_bounds = array<i64: 1>, scalar_prefetch = 0 : i64, scratch_operands = 0 : i64, tpu.core_type = #tpu.core_type<tc>, window_params = [{transform_indices = @transform_0, window_bounds = array<i64: 8, 128>}, {pipeline_mode = #tpu.pipeline_mode<synchronous>, transform_indices = @transform_1, window_bounds = array<i64: 128, 128>}, {transform_indices = @transform_2, window_bounds = array<i64: 8, 128>}, {transform_indices = @transform_3, window_bounds = array<i64: 1, 2, 128>}]} {
    %c0 = arith.constant 0 : index
    %c0_0 = arith.constant 0 : index
    %0 = vector.load %arg1[%c0, %c0_0] : memref<8x128xbf16, #tpu.memory_space<vmem>>, vector<8x128xbf16>
    %c0_1 = arith.constant 0 : index
    %c0_2 = arith.constant 0 : index
    %1 = vector.load %arg2[%c0_1, %c0_2] : memref<128x128xbf16, #tpu.memory_space<vmem>>, vector<128x128xbf16>
    %cst = arith.constant dense<0.000000e+00> : vector<8x128xf32>
    %2 = tpu.matmul %0, %1, %cst {dimension_numbers = #tpu.dot_dimension_numbers<[1], [0], [0], [1], [0, 0, 1, 1], [], []>} : vector<8x128xbf16>, vector<128x128xbf16>, vector<8x128xf32> -> vector<8x128xf32>
    %c0_3 = arith.constant 0 : index
    %c0_4 = arith.constant 0 : index
    %3 = vector.load %arg3[%c0_3, %c0_4] : memref<8x128xf32, #tpu.memory_space<vmem>>, vector<8x128xf32>
    tpu.vector_store %arg3[%c0_3, %c0_4], %2 {strides = array<i32>} : memref<8x128xf32, #tpu.memory_space<vmem>>, vector<8x128xf32>,
    %cst_5 = arith.constant dense<0.000000e+00> : vector<128xf32>
    %4 = vector.multi_reduction <add>, %2, %cst_5 [0] : vector<8x128xf32> to vector<128xf32>
    %5 = vector.shape_cast %4 : vector<128xf32> to vector<1x128xf32>
    %6 = arith.mulf %2, %2 : vector<8x128xf32>
    %cst_6 = arith.constant dense<0.000000e+00> : vector<128xf32>
    %7 = vector.multi_reduction <add>, %6, %cst_6 [0] : vector<8x128xf32> to vector<128xf32>
    %8 = vector.shape_cast %7 : vector<128xf32> to vector<1x128xf32>
    %9 = tpu.concatenate %5, %8 in 0 : vector<1x128xf32>, vector<1x128xf32> -> vector<2x128xf32>
    %10 = vector.shape_cast %9 : vector<2x128xf32> to vector<1x2x128xf32>
    %c0_7 = arith.constant 0 : index
    %c0_8 = arith.constant 0 : index
    %c0_9 = arith.constant 0 : index
    %11 = vector.load %arg4[%c0_7, %c0_8, %c0_9] : memref<1x2x128xf32, #tpu.memory_space<vmem>>, vector<1x2x128xf32>
    tpu.vector_store %arg4[%c0_7, %c0_8, %c0_9], %10 {strides = array<i32>} : memref<1x2x128xf32, #tpu.memory_space<vmem>>, vector<1x2x128xf32>,
    return
  }
  func.func @transform_0(%arg0: i32) -> (i32, i32) {
    %c0_i32 = arith.constant 0 : i32
    %c0_i32_0 = arith.constant 0 : i32
    return %arg0, %c0_i32 : i32, i32
  }
  func.func @transform_1(%arg0: i32) -> (i32, i32) {
    %c0_i32 = arith.constant 0 : i32
    %c0_i32_0 = arith.constant 0 : i32
    %c0_i32_1 = arith.constant 0 : i32
    return %c0_i32, %c0_i32_0 : i32, i32
  }
  func.func @transform_2(%arg0: i32) -> (i32, i32) {
    %c0_i32 = arith.constant 0 : i32
    %c0_i32_0 = arith.constant 0 : i32
    return %arg0, %c0_i32 : i32, i32
  }
  func.func @transform_3(%arg0: i32) -> (i32, i32, i32) {
    %c0_i32 = arith.constant 0 : i32
    %c0_i32_0 = arith.constant 0 : i32
    %c0_i32_1 = arith.constant 0 : i32
    return %arg0, %c0_i32, %c0_i32_0 : i32, i32, i32
  }
}

module attributes {stable_mosaic.version = 11 : i64} {
  func.func @_bn_relu_kernel(%arg0: i32, %arg1: memref<8x128xf32, #tpu.memory_space<vmem>>, %arg2: memref<1x128xf32, #tpu.memory_space<vmem>>, %arg3: memref<1x128xf32, #tpu.memory_space<vmem>>, %arg4: memref<8x128xf32, #tpu.memory_space<vmem>>) attributes {dimension_semantics = [#tpu.dimension_semantics<parallel>], iteration_bounds = array<i64: 1>, scalar_prefetch = 0 : i64, scratch_operands = 0 : i64, tpu.core_type = #tpu.core_type<tc>, window_params = [{transform_indices = @transform_0, window_bounds = array<i64: 8, 128>}, {pipeline_mode = #tpu.pipeline_mode<synchronous>, transform_indices = @transform_1, window_bounds = array<i64: 1, 128>}, {pipeline_mode = #tpu.pipeline_mode<synchronous>, transform_indices = @transform_2, window_bounds = array<i64: 1, 128>}, {transform_indices = @transform_3, window_bounds = array<i64: 8, 128>}]} {
    %c0 = arith.constant 0 : index
    %c0_0 = arith.constant 0 : index
    %0 = vector.load %arg1[%c0, %c0_0] : memref<8x128xf32, #tpu.memory_space<vmem>>, vector<8x128xf32>
    %c0_1 = arith.constant 0 : index
    %c0_2 = arith.constant 0 : index
    %1 = vector.load %arg2[%c0_1, %c0_2] : memref<1x128xf32, #tpu.memory_space<vmem>>, vector<1x128xf32>
    %2 = vector.broadcast %1 : vector<1x128xf32> to vector<8x128xf32>
    %3 = arith.mulf %0, %2 : vector<8x128xf32>
    %c0_3 = arith.constant 0 : index
    %c0_4 = arith.constant 0 : index
    %4 = vector.load %arg3[%c0_3, %c0_4] : memref<1x128xf32, #tpu.memory_space<vmem>>, vector<1x128xf32>
    %5 = vector.broadcast %4 : vector<1x128xf32> to vector<8x128xf32>
    %6 = arith.addf %3, %5 : vector<8x128xf32>
    %cst = arith.constant 0.000000e+00 : f32
    %7 = vector.broadcast %cst : f32 to vector<8x128xf32>
    %8 = arith.maximumf %6, %7 : vector<8x128xf32>
    %c0_5 = arith.constant 0 : index
    %c0_6 = arith.constant 0 : index
    %9 = vector.load %arg4[%c0_5, %c0_6] : memref<8x128xf32, #tpu.memory_space<vmem>>, vector<8x128xf32>
    tpu.vector_store %arg4[%c0_5, %c0_6], %8 {strides = array<i32>} : memref<8x128xf32, #tpu.memory_space<vmem>>, vector<8x128xf32>,
    return
  }
  func.func @transform_0(%arg0: i32) -> (i32, i32) {
    %c0_i32 = arith.constant 0 : i32
    %c0_i32_0 = arith.constant 0 : i32
    return %arg0, %c0_i32 : i32, i32
  }
  func.func @transform_1(%arg0: i32) -> (i32, i32) {
    %c0_i32 = arith.constant 0 : i32
    %c0_i32_0 = arith.constant 0 : i32
    %c0_i32_1 = arith.constant 0 : i32
    return %c0_i32, %c0_i32_0 : i32, i32
  }
  func.func @transform_2(%arg0: i32) -> (i32, i32) {
    %c0_i32 = arith.constant 0 : i32
    %c0_i32_0 = arith.constant 0 : i32
    %c0_i32_1 = arith.constant 0 : i32
    return %c0_i32, %c0_i32_0 : i32, i32
  }
  func.func @transform_3(%arg0: i32) -> (i32, i32) {
    %c0_i32 = arith.constant 0 : i32
    %c0_i32_0 = arith.constant 0 : i32
    return %arg0, %c0_i32 : i32, i32
  }
}

module attributes {stable_mosaic.version = 11 : i64} {
  func.func @_conv_gemm_stats_kernel(%arg0: i32, %arg1: memref<8x1152xbf16, #tpu.memory_space<vmem>>, %arg2: memref<1152x128xbf16, #tpu.memory_space<vmem>>, %arg3: memref<8x128xf32, #tpu.memory_space<vmem>>, %arg4: memref<1x2x128xf32, #tpu.memory_space<vmem>>) attributes {dimension_semantics = [#tpu.dimension_semantics<parallel>], iteration_bounds = array<i64: 1>, scalar_prefetch = 0 : i64, scratch_operands = 0 : i64, tpu.core_type = #tpu.core_type<tc>, window_params = [{transform_indices = @transform_0, window_bounds = array<i64: 8, 1152>}, {pipeline_mode = #tpu.pipeline_mode<synchronous>, transform_indices = @transform_1, window_bounds = array<i64: 1152, 128>}, {transform_indices = @transform_2, window_bounds = array<i64: 8, 128>}, {transform_indices = @transform_3, window_bounds = array<i64: 1, 2, 128>}]} {
    %c0 = arith.constant 0 : index
    %c0_0 = arith.constant 0 : index
    %0 = vector.load %arg1[%c0, %c0_0] : memref<8x1152xbf16, #tpu.memory_space<vmem>>, vector<8x1152xbf16>
    %c0_1 = arith.constant 0 : index
    %c0_2 = arith.constant 0 : index
    %1 = vector.load %arg2[%c0_1, %c0_2] : memref<1152x128xbf16, #tpu.memory_space<vmem>>, vector<1152x128xbf16>
    %cst = arith.constant dense<0.000000e+00> : vector<8x128xf32>
    %2 = tpu.matmul %0, %1, %cst {dimension_numbers = #tpu.dot_dimension_numbers<[1], [0], [0], [1], [0, 0, 1, 1], [], []>} : vector<8x1152xbf16>, vector<1152x128xbf16>, vector<8x128xf32> -> vector<8x128xf32>
    %c0_3 = arith.constant 0 : index
    %c0_4 = arith.constant 0 : index
    %3 = vector.load %arg3[%c0_3, %c0_4] : memref<8x128xf32, #tpu.memory_space<vmem>>, vector<8x128xf32>
    tpu.vector_store %arg3[%c0_3, %c0_4], %2 {strides = array<i32>} : memref<8x128xf32, #tpu.memory_space<vmem>>, vector<8x128xf32>,
    %cst_5 = arith.constant dense<0.000000e+00> : vector<128xf32>
    %4 = vector.multi_reduction <add>, %2, %cst_5 [0] : vector<8x128xf32> to vector<128xf32>
    %5 = vector.shape_cast %4 : vector<128xf32> to vector<1x128xf32>
    %6 = arith.mulf %2, %2 : vector<8x128xf32>
    %cst_6 = arith.constant dense<0.000000e+00> : vector<128xf32>
    %7 = vector.multi_reduction <add>, %6, %cst_6 [0] : vector<8x128xf32> to vector<128xf32>
    %8 = vector.shape_cast %7 : vector<128xf32> to vector<1x128xf32>
    %9 = tpu.concatenate %5, %8 in 0 : vector<1x128xf32>, vector<1x128xf32> -> vector<2x128xf32>
    %10 = vector.shape_cast %9 : vector<2x128xf32> to vector<1x2x128xf32>
    %c0_7 = arith.constant 0 : index
    %c0_8 = arith.constant 0 : index
    %c0_9 = arith.constant 0 : index
    %11 = vector.load %arg4[%c0_7, %c0_8, %c0_9] : memref<1x2x128xf32, #tpu.memory_space<vmem>>, vector<1x2x128xf32>
    tpu.vector_store %arg4[%c0_7, %c0_8, %c0_9], %10 {strides = array<i32>} : memref<1x2x128xf32, #tpu.memory_space<vmem>>, vector<1x2x128xf32>,
    return
  }
  func.func @transform_0(%arg0: i32) -> (i32, i32) {
    %c0_i32 = arith.constant 0 : i32
    %c0_i32_0 = arith.constant 0 : i32
    return %arg0, %c0_i32 : i32, i32
  }
  func.func @transform_1(%arg0: i32) -> (i32, i32) {
    %c0_i32 = arith.constant 0 : i32
    %c0_i32_0 = arith.constant 0 : i32
    %c0_i32_1 = arith.constant 0 : i32
    return %c0_i32, %c0_i32_0 : i32, i32
  }
  func.func @transform_2(%arg0: i32) -> (i32, i32) {
    %c0_i32 = arith.constant 0 : i32
    %c0_i32_0 = arith.constant 0 : i32
    return %arg0, %c0_i32 : i32, i32
  }
  func.func @transform_3(%arg0: i32) -> (i32, i32, i32) {
    %c0_i32 = arith.constant 0 : i32
    %c0_i32_0 = arith.constant 0 : i32
    %c0_i32_1 = arith.constant 0 : i32
    return %arg0, %c0_i32, %c0_i32_0 : i32, i32, i32
  }
}

module attributes {stable_mosaic.version = 11 : i64} {
  func.func @_bn_add_bn_relu_kernel(%arg0: i32, %arg1: memref<8x128xf32, #tpu.memory_space<vmem>>, %arg2: memref<8x128xf32, #tpu.memory_space<vmem>>, %arg3: memref<1x128xf32, #tpu.memory_space<vmem>>, %arg4: memref<1x128xf32, #tpu.memory_space<vmem>>, %arg5: memref<1x128xf32, #tpu.memory_space<vmem>>, %arg6: memref<1x128xf32, #tpu.memory_space<vmem>>, %arg7: memref<8x128xf32, #tpu.memory_space<vmem>>) attributes {dimension_semantics = [#tpu.dimension_semantics<parallel>], iteration_bounds = array<i64: 1>, scalar_prefetch = 0 : i64, scratch_operands = 0 : i64, tpu.core_type = #tpu.core_type<tc>, window_params = [{transform_indices = @transform_0, window_bounds = array<i64: 8, 128>}, {transform_indices = @transform_1, window_bounds = array<i64: 8, 128>}, {pipeline_mode = #tpu.pipeline_mode<synchronous>, transform_indices = @transform_2, window_bounds = array<i64: 1, 128>}, {pipeline_mode = #tpu.pipeline_mode<synchronous>, transform_indices = @transform_3, window_bounds = array<i64: 1, 128>}, {pipeline_mode = #tpu.pipeline_mode<synchronous>, transform_indices = @transform_4, window_bounds = array<i64: 1, 128>}, {pipeline_mode = #tpu.pipeline_mode<synchronous>, transform_indices = @transform_5, window_bounds = array<i64: 1, 128>}, {transform_indices = @transform_6, window_bounds = array<i64: 8, 128>}]} {
    %c0 = arith.constant 0 : index
    %c0_0 = arith.constant 0 : index
    %0 = vector.load %arg1[%c0, %c0_0] : memref<8x128xf32, #tpu.memory_space<vmem>>, vector<8x128xf32>
    %c0_1 = arith.constant 0 : index
    %c0_2 = arith.constant 0 : index
    %1 = vector.load %arg3[%c0_1, %c0_2] : memref<1x128xf32, #tpu.memory_space<vmem>>, vector<1x128xf32>
    %2 = vector.broadcast %1 : vector<1x128xf32> to vector<8x128xf32>
    %3 = arith.mulf %0, %2 : vector<8x128xf32>
    %c0_3 = arith.constant 0 : index
    %c0_4 = arith.constant 0 : index
    %4 = vector.load %arg4[%c0_3, %c0_4] : memref<1x128xf32, #tpu.memory_space<vmem>>, vector<1x128xf32>
    %5 = vector.broadcast %4 : vector<1x128xf32> to vector<8x128xf32>
    %6 = arith.addf %3, %5 : vector<8x128xf32>
    %c0_5 = arith.constant 0 : index
    %c0_6 = arith.constant 0 : index
    %7 = vector.load %arg2[%c0_5, %c0_6] : memref<8x128xf32, #tpu.memory_space<vmem>>, vector<8x128xf32>
    %c0_7 = arith.constant 0 : index
    %c0_8 = arith.constant 0 : index
    %8 = vector.load %arg5[%c0_7, %c0_8] : memref<1x128xf32, #tpu.memory_space<vmem>>, vector<1x128xf32>
    %9 = vector.broadcast %8 : vector<1x128xf32> to vector<8x128xf32>
    %10 = arith.mulf %7, %9 : vector<8x128xf32>
    %11 = arith.addf %6, %10 : vector<8x128xf32>
    %c0_9 = arith.constant 0 : index
    %c0_10 = arith.constant 0 : index
    %12 = vector.load %arg6[%c0_9, %c0_10] : memref<1x128xf32, #tpu.memory_space<vmem>>, vector<1x128xf32>
    %13 = vector.broadcast %12 : vector<1x128xf32> to vector<8x128xf32>
    %14 = arith.addf %11, %13 : vector<8x128xf32>
    %cst = arith.constant 0.000000e+00 : f32
    %15 = vector.broadcast %cst : f32 to vector<8x128xf32>
    %16 = arith.maximumf %14, %15 : vector<8x128xf32>
    %c0_11 = arith.constant 0 : index
    %c0_12 = arith.constant 0 : index
    %17 = vector.load %arg7[%c0_11, %c0_12] : memref<8x128xf32, #tpu.memory_space<vmem>>, vector<8x128xf32>
    tpu.vector_store %arg7[%c0_11, %c0_12], %16 {strides = array<i32>} : memref<8x128xf32, #tpu.memory_space<vmem>>, vector<8x128xf32>,
    return
  }
  func.func @transform_0(%arg0: i32) -> (i32, i32) {
    %c0_i32 = arith.constant 0 : i32
    %c0_i32_0 = arith.constant 0 : i32
    return %arg0, %c0_i32 : i32, i32
  }
  func.func @transform_1(%arg0: i32) -> (i32, i32) {
    %c0_i32 = arith.constant 0 : i32
    %c0_i32_0 = arith.constant 0 : i32
    return %arg0, %c0_i32 : i32, i32
  }
  func.func @transform_2(%arg0: i32) -> (i32, i32) {
    %c0_i32 = arith.constant 0 : i32
    %c0_i32_0 = arith.constant 0 : i32
    %c0_i32_1 = arith.constant 0 : i32
    return %c0_i32, %c0_i32_0 : i32, i32
  }
  func.func @transform_3(%arg0: i32) -> (i32, i32) {
    %c0_i32 = arith.constant 0 : i32
    %c0_i32_0 = arith.constant 0 : i32
    %c0_i32_1 = arith.constant 0 : i32
    return %c0_i32, %c0_i32_0 : i32, i32
  }
  func.func @transform_4(%arg0: i32) -> (i32, i32) {
    %c0_i32 = arith.constant 0 : i32
    %c0_i32_0 = arith.constant 0 : i32
    %c0_i32_1 = arith.constant 0 : i32
    return %c0_i32, %c0_i32_0 : i32, i32
  }
  func.func @transform_5(%arg0: i32) -> (i32, i32) {
    %c0_i32 = arith.constant 0 : i32
    %c0_i32_0 = arith.constant 0 : i32
    %c0_i32_1 = arith.constant 0 : i32
    return %c0_i32, %c0_i32_0 : i32, i32
  }
  func.func @transform_6(%arg0: i32) -> (i32, i32) {
    %c0_i32 = arith.constant 0 : i32
    %c0_i32_0 = arith.constant 0 : i32
    return %arg0, %c0_i32 : i32, i32
  }
}

module attributes {stable_mosaic.version = 11 : i64} {
  func.func @_fc_kernel(%arg0: i32, %arg1: memref<2x128xbf16, #tpu.memory_space<vmem>>, %arg2: memref<128x20xbf16, #tpu.memory_space<vmem>>, %arg3: memref<1x20xf32, #tpu.memory_space<vmem>>, %arg4: memref<2x20xf32, #tpu.memory_space<vmem>>) attributes {dimension_semantics = [#tpu.dimension_semantics<arbitrary>], iteration_bounds = array<i64: 1>, scalar_prefetch = 0 : i64, scratch_operands = 0 : i64, tpu.core_type = #tpu.core_type<tc>, window_params = [{pipeline_mode = #tpu.pipeline_mode<synchronous>, transform_indices = @transform_0, window_bounds = array<i64: 2, 128>}, {pipeline_mode = #tpu.pipeline_mode<synchronous>, transform_indices = @transform_1, window_bounds = array<i64: 128, 20>}, {pipeline_mode = #tpu.pipeline_mode<synchronous>, transform_indices = @transform_2, window_bounds = array<i64: 1, 20>}, {pipeline_mode = #tpu.pipeline_mode<synchronous>, transform_indices = @transform_3, window_bounds = array<i64: 2, 20>}]} {
    %c0 = arith.constant 0 : index
    %c0_0 = arith.constant 0 : index
    %0 = vector.load %arg1[%c0, %c0_0] : memref<2x128xbf16, #tpu.memory_space<vmem>>, vector<2x128xbf16>
    %c0_1 = arith.constant 0 : index
    %c0_2 = arith.constant 0 : index
    %1 = vector.load %arg2[%c0_1, %c0_2] : memref<128x20xbf16, #tpu.memory_space<vmem>>, vector<128x20xbf16>
    %cst = arith.constant dense<0.000000e+00> : vector<2x20xf32>
    %2 = tpu.matmul %0, %1, %cst {dimension_numbers = #tpu.dot_dimension_numbers<[1], [0], [0], [1], [0, 0, 1, 1], [], []>} : vector<2x128xbf16>, vector<128x20xbf16>, vector<2x20xf32> -> vector<2x20xf32>
    %c0_3 = arith.constant 0 : index
    %c0_4 = arith.constant 0 : index
    %3 = vector.load %arg3[%c0_3, %c0_4] : memref<1x20xf32, #tpu.memory_space<vmem>>, vector<1x20xf32>
    %4 = vector.broadcast %3 : vector<1x20xf32> to vector<2x20xf32>
    %5 = arith.addf %2, %4 : vector<2x20xf32>
    %c0_5 = arith.constant 0 : index
    %c0_6 = arith.constant 0 : index
    %6 = vector.load %arg4[%c0_5, %c0_6] : memref<2x20xf32, #tpu.memory_space<vmem>>, vector<2x20xf32>
    tpu.vector_store %arg4[%c0_5, %c0_6], %5 {strides = array<i32>} : memref<2x20xf32, #tpu.memory_space<vmem>>, vector<2x20xf32>,
    return
  }
  func.func @transform_0(%arg0: i32) -> (i32, i32) {
    %c0_i32 = arith.constant 0 : i32
    %c0_i32_0 = arith.constant 0 : i32
    %c0_i32_1 = arith.constant 0 : i32
    return %c0_i32, %c0_i32_0 : i32, i32
  }
  func.func @transform_1(%arg0: i32) -> (i32, i32) {
    %c0_i32 = arith.constant 0 : i32
    %c0_i32_0 = arith.constant 0 : i32
    %c0_i32_1 = arith.constant 0 : i32
    return %c0_i32, %c0_i32_0 : i32, i32
  }
  func.func @transform_2(%arg0: i32) -> (i32, i32) {
    %c0_i32 = arith.constant 0 : i32
    %c0_i32_0 = arith.constant 0 : i32
    %c0_i32_1 = arith.constant 0 : i32
    return %c0_i32, %c0_i32_0 : i32, i32
  }
  func.func @transform_3(%arg0: i32) -> (i32, i32) {
    %c0_i32 = arith.constant 0 : i32
    %c0_i32_0 = arith.constant 0 : i32
    %c0_i32_1 = arith.constant 0 : i32
    return %c0_i32, %c0_i32_0 : i32, i32
  }
}

</mosaic_0001>

<bundles_post_ra>
// kernel: _lambda_.40
= control target key start
LH: loop header
LB: loop body
LE: loop exit
PB: predicated region body
PF: predicated region fallthrough
CT: control target
= control target key end

     0   :  { %s453_s12 = smov 0   ;;  %s612_s0 = inlined_call_operand.vmem [shape: f32[512,128], index: 0, kind: input, shape index: {}]   ;;  %s613_s1 = inlined_call_operand.vmem [shape: f32[1,128], index: 1, kind: input, shape index: {}]   ;;  %s614_s2 = inlined_call_operand.vmem [shape: f32[1,128], index: 2, kind: input, shape index: {}]   ;;  %s615_s3 = inlined_call_operand.vmem [shape: f32[512,128], index: 3, kind: output, shape index: {}]  }
   0x1 LB: > { %s404_s13 = sadd.s32 4294967295, %s431_s12   ;;  %p408_p0 = scmp.ge.s32.totalorder %s431_s12, 1  ;;  %s431_s12 = sphi %s453_s12, %s13_s12  }
   0x2   : > { %p138_p1 = scmp.lt.s32.totalorder %s431_s12, 3 }
   0x4   : > { %p139_p2 = pnand %p408_p0, %p138_p1 }
   0x5   : > { %s409_s14 = sshll.u32 (!%p139_p2), %s404_s13, 5 }
   0x6   : > { %142 = sbr.rel (%p139_p2) target bundleno = 44 (0x2c), region = 32  ;;  %p163_p3 = scmp.lt.s32.totalorder (!%p139_p2), %s409_s14, 63 }
   0xb   : > { %s617_s14 = smov (!%p163_p3, %s409_s14), 63  ;;  %v464_v0 = vld [vmem:[%s613_s1] ss:$0 sm:$0xff] }
   0xc   : > { %s410_s15 = sshll.u32 %s617_s14, 3  ;;  %v474_v1 = vld [vmem:[%s614_s2] ss:$0 sm:$0xff] }
   0xd   : > { %s469_s20 = scalar_lea.vmem %s612_s0, %s410_s15  ;;  %s497_s25 = scalar_lea.vmem %s615_s3, %s410_s15 }
   0xe   : > { %v174_v2 = vld [vmem:[%s469_s20] sm:$0xff]  ;;  %v175_v3 = vld [vmem:[%s469_s20 + $0x8] sm:$0xff]  ;;  %v176_v4 = vld [vmem:[%s469_s20 + $0x10] sm:$0xff] }
   0xf   : > { %v213_v5 = vmul.f32 %v464_v0, %v174_v2  ;;  %v214_v6 = vmul.f32 %v464_v0, %v175_v3  ;;  %v215_v7 = vmul.f32 %v464_v0, %v176_v4  ;;  %v177_v8 = vld [vmem:[%s469_s20 + $0x18] sm:$0xff]  ;;  %v178_v9 = vld [vmem:[%s469_s20 + $0x20] sm:$0xff]  ;;  %v179_v10 = vld [vmem:[%s469_s20 + $0x28] sm:$0xff] }
  0x10   : > { %v216_v11 = vmul.f32 %v464_v0, %v177_v8  ;;  %v217_v12 = vmul.f32 %v464_v0, %v178_v9  ;;  %v218_v13 = vmul.f32 %v464_v0, %v179_v10  ;;  %v180_v14 = vld [vmem:[%s469_s20 + $0x30] sm:$0xff]  ;;  %v181_v15 = vld [vmem:[%s469_s20 + $0x38] sm:$0xff]  ;;  %v182_v24 = vld [vmem:[%s469_s20 + $0x40] sm:$0xff] }
  0x11   : > { %v252_v16 = vadd.f32 %v474_v1, %v213_v5  ;;  %v253_v17 = vadd.f32 %v474_v1, %v214_v6  ;;  %v254_v18 = vadd.f32 %v474_v1, %v215_v7  ;;  %v219_v19 = vmul.f32 %v464_v0, %v180_v14  ;;  %v183_v25 = vld [vmem:[%s469_s20 + $0x48] sm:$0xff]  ;;  %v184_v26 = vld [vmem:[%s469_s20 + $0x50] sm:$0xff]  ;;  %v185_v31 = vld [vmem:[%s469_s20 + $0x58] sm:$0xff] }
  0x12   : > { %v255_v20 = vadd.f32 %v474_v1, %v216_v11  ;;  %v256_v21 = vadd.f32 %v474_v1, %v217_v12  ;;  %v257_v22 = vadd.f32 %v474_v1, %v218_v13  ;;  %v220_v23 = vmul.f32 %v464_v0, %v181_v15  ;;  %v186_v32 = vld [vmem:[%s469_s20 + $0x60] sm:$0xff]  ;;  %v187_v33 = vld [vmem:[%s469_s20 + $0x68] sm:$0xff]  ;;  %v188_v38 = vld [vmem:[%s469_s20 + $0x70] sm:$0xff] }
  0x13   : > { %v284_v27 = vmax.f32 %v252_v16, 0.0  ;;  %v285_v28 = vmax.f32 %v253_v17, 0.0  ;;  %v286_v29 = vmax.f32 %v254_v18, 0.0  ;;  %v258_v30 = vadd.f32 %v474_v1, %v219_v19  ;;  %v189_v43 = vld [vmem:[%s469_s20 + $0x78] sm:$0xff]  ;;  %v190_v56 = vld [vmem:[%s469_s20 + $0x80] sm:$0xff]  ;;  %v191_v57 = vld [vmem:[%s469_s20 + $0x88] sm:$0xff] }
  0x14   : > { %v287_v34 = vmax.f32 %v255_v20, 0.0  ;;  %v288_v35 = vmax.f32 %v256_v21, 0.0  ;;  %v289_v36 = vmax.f32 %v257_v22, 0.0  ;;  %v259_v37 = vadd.f32 %v474_v1, %v220_v23  ;;  %v192_v58 = vld [vmem:[%s469_s20 + $0x90] sm:$0xff]  ;;  %v193_v63 = vld [vmem:[%s469_s20 + $0x98] sm:$0xff]  ;;  %v194_v2 = vld [vmem:[%s469_s20 + $0xa0] sm:$0xff] }
  0x15   : > { %316 = vst [vmem:[%s497_s25] sm:$0xff] %v284_v27  ;;  %317 = vst [vmem:[%s497_s25 + $0x8] sm:$0xff] %v285_v28  ;;  %v290_v39 = vmax.f32 %v258_v30, 0.0  ;;  %v221_v40 = vmul.f32 %v464_v0, %v182_v24  ;;  %v222_v41 = vmul.f32 %v464_v0, %v183_v25  ;;  %v223_v42 = vmul.f32 %v464_v0, %v184_v26  ;;  %v195_v3 = vld [vmem:[%s469_s20 + $0xa8] sm:$0xff]  ;;  %v196_v8 = vld [vmem:[%s469_s20 + $0xb0] sm:$0xff] }
  0x16   : > { %318 = vst [vmem:[%s497_s25 + $0x10] sm:$0xff] %v286_v29  ;;  %319 = vst [vmem:[%s497_s25 + $0x18] sm:$0xff] %v287_v34  ;;  %v291_v44 = vmax.f32 %v259_v37, 0.0  ;;  %v224_v45 = vmul.f32 %v464_v0, %v185_v31  ;;  %v225_v46 = vmul.f32 %v464_v0, %v186_v32  ;;  %v226_v47 = vmul.f32 %v464_v0, %v187_v33  ;;  %v197_v13 = vld [vmem:[%s469_s20 + $0xb8] sm:$0xff]  ;;  %v198_v26 = vld [vmem:[%s469_s20 + $0xc0] sm:$0xff] }
  0x17   : > { %320 = vst [vmem:[%s497_s25 + $0x20] sm:$0xff] %v288_v35  ;;  %321 = vst [vmem:[%s497_s25 + $0x28] sm:$0xff] %v289_v36  ;;  %v260_v48 = vadd.f32 %v474_v1, %v221_v40  ;;  %v261_v49 = vadd.f32 %v474_v1, %v222_v41  ;;  %v262_v50 = vadd.f32 %v474_v1, %v223_v42  ;;  %v199_v27 = vld [vmem:[%s469_s20 + $0xc8] sm:$0xff]  ;;  %v200_v28 = vld [vmem:[%s469_s20 + $0xd0] sm:$0xff] }
  0x18   : > { %322 = vst [vmem:[%s497_s25 + $0x30] sm:$0xff] %v290_v39  ;;  %v227_v51 = vmul.f32 %v464_v0, %v188_v38  ;;  %323 = vst [vmem:[%s497_s25 + $0x38] sm:$0xff] %v291_v44  ;;  %v263_v52 = vadd.f32 %v474_v1, %v224_v45  ;;  %v264_v53 = vadd.f32 %v474_v1, %v225_v46  ;;  %v201_v33 = vld [vmem:[%s469_s20 + $0xd8] sm:$0xff]  ;;  %v202_v34 = vld [vmem:[%s469_s20 + $0xe0] sm:$0xff] }
  0x19   : > { %v265_v54 = vadd.f32 %v474_v1, %v226_v47  ;;  %v228_v55 = vmul.f32 %v464_v0, %v189_v43  ;;  %v292_v59 = vmax.f32 %v260_v48, 0.0  ;;  %v293_v60 = vmax.f32 %v261_v49, 0.0  ;;  %v203_v35 = vld [vmem:[%s469_s20 + $0xe8] sm:$0xff]  ;;  %v204_v40 = vld [vmem:[%s469_s20 + $0xf0] sm:$0xff]  ;;  %v205_v45 = vld [vmem:[%s469_s20 + $0xf8] sm:$0xff] }
  0x1a   : > { %v294_v61 = vmax.f32 %v262_v50, 0.0  ;;  %v266_v62 = vadd.f32 %v474_v1, %v227_v51  ;;  %v295_v4 = vmax.f32 %v263_v52, 0.0  ;;  %v296_v5 = vmax.f32 %v264_v53, 0.0 }
  0x1b   : > { %v297_v6 = vmax.f32 %v265_v54, 0.0  ;;  %v267_v7 = vadd.f32 %v474_v1, %v228_v55  ;;  %324 = vst [vmem:[%s497_s25 + $0x40] sm:$0xff] %v292_v59  ;;  %325 = vst [vmem:[%s497_s25 + $0x48] sm:$0xff] %v293_v60  ;;  %v229_v10 = vmul.f32 %v464_v0, %v190_v56  ;;  %v230_v11 = vmul.f32 %v464_v0, %v191_v57 }
  0x1c   : > { %326 = vst [vmem:[%s497_s25 + $0x50] sm:$0xff] %v294_v61  ;;  %v298_v9 = vmax.f32 %v266_v62, 0.0  ;;  %v231_v12 = vmul.f32 %v464_v0, %v192_v58  ;;  %327 = vst [vmem:[%s497_s25 + $0x58] sm:$0xff] %v295_v4  ;;  %v232_v15 = vmul.f32 %v464_v0, %v193_v63  ;;  %v233_v16 = vmul.f32 %v464_v0, %v194_v2 }
  0x1d   : > { %328 = vst [vmem:[%s497_s25 + $0x60] sm:$0xff] %v296_v5  ;;  %329 = vst [vmem:[%s497_s25 + $0x68] sm:$0xff] %v297_v6  ;;  %v299_v14 = vmax.f32 %v267_v7, 0.0  ;;  %v234_v17 = vmul.f32 %v464_v0, %v195_v3  ;;  %v268_v18 = vadd.f32 %v474_v1, %v229_v10  ;;  %v269_v19 = vadd.f32 %v474_v1, %v230_v11 }
  0x1e   : > { %330 = vst [vmem:[%s497_s25 + $0x70] sm:$0xff] %v298_v9  ;;  %v270_v20 = vadd.f32 %v474_v1, %v231_v12  ;;  %v235_v21 = vmul.f32 %v464_v0, %v196_v8  ;;  %v271_v22 = vadd.f32 %v474_v1, %v232_v15  ;;  %v272_v23 = vadd.f32 %v474_v1, %v233_v16 }
  0x1f   : > { %331 = vst [vmem:[%s497_s25 + $0x78] sm:$0xff] %v299_v14  ;;  %v273_v24 = vadd.f32 %v474_v1, %v234_v17  ;;  %v236_v25 = vmul.f32 %v464_v0, %v197_v13  ;;  %v300_v29 = vmax.f32 %v268_v18, 0.0  ;;  %v301_v30 = vmax.f32 %v269_v19, 0.0 }
  0x20   : > { %v302_v31 = vmax.f32 %v270_v20, 0.0  ;;  %v274_v32 = vadd.f32 %v474_v1, %v235_v21  ;;  %v303_v36 = vmax.f32 %v271_v22, 0.0  ;;  %v304_v37 = vmax.f32 %v272_v23, 0.0 }
  0x21   : > { %v305_v38 = vmax.f32 %v273_v24, 0.0  ;;  %v275_v39 = vadd.f32 %v474_v1, %v236_v25  ;;  %332 = vst [vmem:[%s497_s25 + $0x80] sm:$0xff] %v300_v29  ;;  %333 = vst [vmem:[%s497_s25 + $0x88] sm:$0xff] %v301_v30  ;;  %v237_v42 = vmul.f32 %v464_v0, %v198_v26  ;;  %v238_v43 = vmul.f32 %v464_v0, %v199_v27 }
  0x22   : > { %334 = vst [vmem:[%s497_s25 + $0x90] sm:$0xff] %v302_v31  ;;  %v306_v41 = vmax.f32 %v274_v32, 0.0  ;;  %v239_v44 = vmul.f32 %v464_v0, %v200_v28  ;;  %335 = vst [vmem:[%s497_s25 + $0x98] sm:$0xff] %v303_v36  ;;  %v240_v47 = vmul.f32 %v464_v0, %v201_v33  ;;  %v241_v48 = vmul.f32 %v464_v0, %v202_v34 }
  0x23   : > { %336 = vst [vmem:[%s497_s25 + $0xa0] sm:$0xff] %v304_v37  ;;  %337 = vst [vmem:[%s497_s25 + $0xa8] sm:$0xff] %v305_v38  ;;  %v307_v46 = vmax.f32 %v275_v39, 0.0  ;;  %v242_v49 = vmul.f32 %v464_v0, %v203_v35  ;;  %v276_v50 = vadd.f32 %v474_v1, %v237_v42  ;;  %v277_v51 = vadd.f32 %v474_v1, %v238_v43 }
  0x24   : > { %338 = vst [vmem:[%s497_s25 + $0xb0] sm:$0xff] %v306_v41  ;;  %v278_v52 = vadd.f32 %v474_v1, %v239_v44  ;;  %v243_v53 = vmul.f32 %v464_v0, %v204_v40  ;;  %v279_v54 = vadd.f32 %v474_v1, %v240_v47  ;;  %v280_v55 = vadd.f32 %v474_v1, %v241_v48 }
  0x25   : > { %339 = vst [vmem:[%s497_s25 + $0xb8] sm:$0xff] %v307_v46  ;;  %v281_v56 = vadd.f32 %v474_v1, %v242_v49  ;;  %v244_v57 = vmul.f32 %v464_v0, %v205_v45  ;;  %v308_v58 = vmax.f32 %v276_v50, 0.0  ;;  %v309_v59 = vmax.f32 %v277_v51, 0.0 }
  0x26   : > { %v310_v60 = vmax.f32 %v278_v52, 0.0  ;;  %v282_v61 = vadd.f32 %v474_v1, %v243_v53  ;;  %v311_v62 = vmax.f32 %v279_v54, 0.0  ;;  %v312_v63 = vmax.f32 %v280_v55, 0.0 }
  0x27   : > { %v313_v2 = vmax.f32 %v281_v56, 0.0  ;;  %v283_v3 = vadd.f32 %v474_v1, %v244_v57  ;;  %340 = vst [vmem:[%s497_s25 + $0xc0] sm:$0xff] %v308_v58  ;;  %341 = vst [vmem:[%s497_s25 + $0xc8] sm:$0xff] %v309_v59 }
  0x28   : > { %342 = vst [vmem:[%s497_s25 + $0xd0] sm:$0xff] %v310_v60  ;;  %v314_v4 = vmax.f32 %v282_v61, 0.0  ;;  %343 = vst [vmem:[%s497_s25 + $0xd8] sm:$0xff] %v311_v62 }
  0x29   : > { %344 = vst [vmem:[%s497_s25 + $0xe0] sm:$0xff] %v312_v63  ;;  %345 = vst [vmem:[%s497_s25 + $0xe8] sm:$0xff] %v313_v2  ;;  %v315_v0 = vmax.f32 %v283_v3, 0.0 }
  0x2a   : > { %346 = vst [vmem:[%s497_s25 + $0xf0] sm:$0xff] %v314_v4 }
  0x2b   : > { %347 = vst [vmem:[%s497_s25 + $0xf8] sm:$0xff] %v315_v0 }
  0x2c PF: > { %s13_s12 = sadd.s32 1, %s431_s12  }
  0x2d   : > { %p10_p4 = scmp.ge.s32.totalorder %s13_s12, 4  }
  0x2f   :  { %12 = sbr.rel (!%p10_p4) target bundleno = 1 (0x1), region = 62 }

// kernel: _lambda_.44
= control target key start
LH: loop header
LB: loop body
LE: loop exit
PB: predicated region body
PF: predicated region fallthrough
CT: control target
= control target key end

     0   :  { %vm313_vm0 = vcmask 1040384   ;;  %s539_s1 = inlined_call_operand.vmem [shape: bf16[128,128], index: 1, kind: input, shape index: {}]   ;;  %s540_s0 = inlined_call_operand.vmem [shape: bf16[128,128], index: 0, kind: input, shape index: {}]   ;;  %s541_s2 = inlined_call_operand.vmem [shape: f32[128,128], index: 2, kind: output, shape index: {0}]   ;;  %s542_s3 = inlined_call_operand.vmem [shape: f32[1,2,128], index: 3, kind: output, shape index: {1}]  }
   0x1   :  { %v404_v0 = vld [vmem:[%s539_s1 + $0x38] sm:$0xff]   ;;  %v405_v1 = vld [vmem:[%s539_s1 + $0x30] sm:$0xff]   ;;  %v406_v2 = vld [vmem:[%s539_s1 + $0x28] sm:$0xff]  }
   0x2   :  { %356 = vmatprep.subr.bf16.mxu0 %v404_v0  ;;  %388 = vmatprep.subr.bf16.mxu1 %v404_v0  ;;  %v407_v3 = vld [vmem:[%s539_s1 + $0x20] sm:$0xff]   ;;  %v408_v5 = vld [vmem:[%s539_s1 + $0x18] sm:$0xff]   ;;  %v409_v7 = vld [vmem:[%s539_s1 + $0x10] sm:$0xff]  }
   0x3   :  { %357 = vmatpush3.bf16.msra.mxu0 %v404_v0  ;;  %396 = vmatpush3.bf16.msra.mxu1 %v404_v0  ;;  %v412_v4 = vld [vmem:[%s540_s0] sm:$0xff]   ;;  %v410_v8 = vld [vmem:[%s539_s1 + $0x8] sm:$0xff]   ;;  %v414_v12 = vld [vmem:[%s540_s0 + $0x10] sm:$0xff]  }
   0x4   :  { %358 = vmatprep.subr.bf16.mxu0 %v405_v1  ;;  %389 = vmatprep.subr.bf16.mxu1 %v405_v1  ;;  %v416_v6 = vld [vmem:[%s540_s0 + $0x20] sm:$0xff]   ;;  %v413_v10 = vld [vmem:[%s540_s0 + $0x8] sm:$0xff]   ;;  %v418_v13 = vld [vmem:[%s540_s0 + $0x30] sm:$0xff]  }
   0x5   :  { %372 = vmatprep.mubr.bf16.mxu0 %v412_v4  ;;  %380 = vmatprep.mubr.bf16.mxu1 %v416_v6  ;;  %v411_v9 = vld [vmem:[%s539_s1] sm:$0xff]   ;;  %v417_v11 = vld [vmem:[%s540_s0 + $0x28] sm:$0xff]   ;;  %v415_v14 = vld [vmem:[%s540_s0 + $0x18] sm:$0xff]  }
   0x6   :  { %v419_v15 = vld [vmem:[%s540_s0 + $0x38] sm:$0xff]  }
   0x7   :  { %359 = vmatpush3.bf16.msra.mxu0 %v405_v1  ;;  %397 = vmatpush3.bf16.msra.mxu1 %v405_v1 }
   0x8   :  { %360 = vmatprep.subr.bf16.mxu0 %v406_v2  ;;  %390 = vmatprep.subr.bf16.mxu1 %v406_v2 }
   0xb   :  { %361 = vmatpush3.bf16.msra.mxu0 %v406_v2  ;;  %398 = vmatpush3.bf16.msra.mxu1 %v406_v2 }
   0xc   :  { %362 = vmatprep.subr.bf16.mxu0 %v407_v3  ;;  %391 = vmatprep.subr.bf16.mxu1 %v407_v3 }
   0xf   :  { %363 = vmatpush3.bf16.msra.mxu0 %v407_v3  ;;  %399 = vmatpush3.bf16.msra.mxu1 %v407_v3 }
  0x10   :  { %364 = vmatprep.subr.bf16.mxu0 %v408_v5  ;;  %392 = vmatprep.subr.bf16.mxu1 %v408_v5 }
  0x13   :  { %365 = vmatpush3.bf16.msra.mxu0 %v408_v5  ;;  %400 = vmatpush3.bf16.msra.mxu1 %v408_v5 }
  0x14   :  { %366 = vmatprep.subr.bf16.mxu0 %v409_v7  ;;  %393 = vmatprep.subr.bf16.mxu1 %v409_v7 }
  0x17   :  { %367 = vmatpush3.bf16.msra.mxu0 %v409_v7  ;;  %401 = vmatpush3.bf16.msra.mxu1 %v409_v7 }
  0x18   :  { %368 = vmatprep.subr.bf16.mxu0 %v410_v8  ;;  %394 = vmatprep.subr.bf16.mxu1 %v410_v8 }
  0x1b   :  { %369 = vmatpush3.bf16.msra.mxu0 %v410_v8  ;;  %402 = vmatpush3.bf16.msra.mxu1 %v410_v8 }
  0x1c   :  { %370 = vmatprep.subr.bf16.mxu0 %v411_v9  ;;  %395 = vmatprep.subr.bf16.mxu1 %v411_v9 }
  0x1f   :  { %371 = vmatpush3.bf16.msra.mxu0 %v411_v9  ;;  %403 = vmatpush3.bf16.msra.mxu1 %v411_v9 }
  0x22   :  { %373 = vmatmul.mubr.bf16.vlgmr.msra.gmra.mxu0 %v413_v10  ;;  %381 = vmatmul.mubr.bf16.vlgmr.msra.gmra.mxu1 %v417_v11 }
  0x23   :  { %376 = vmatprep.mubr.bf16.mxu0 %v414_v12  ;;  %384 = vmatprep.mubr.bf16.mxu1 %v418_v13 }
  0x2a   :  { %377 = vmatmul.mubr.bf16.gmra.mxu0 %v415_v14  ;;  %385 = vmatmul.mubr.bf16.gmra.mxu1 %v419_v15 }
  0xe2   :  { %v374_v16 = vpop.f32.mrf.mxu0  ;;  %v382_v17 = vpop.f32.mrf.mxu1 }
  0xe3   :  { %241 = vst [vmem:[%s541_s2 + $0x10] sm:$0xff] %v374_v16  ;;  %249 = vst [vmem:[%s541_s2 + $0x50] sm:$0xff] %v382_v17  ;;  %v278_v29 = vmul.f32 %v374_v16, %v374_v16  ;;  %v286_v59 = vmul.f32 %v382_v17, %v382_v17 }
  0xe4   :  { %v176_v18 = vpop.f32.mrf.mxu0  ;;  %v208_v19 = vpop.f32.mrf.mxu1 }
  0xe5   :  { %239 = vst [vmem:[%s541_s2] sm:$0xff] %v176_v18  ;;  %247 = vst [vmem:[%s541_s2 + $0x40] sm:$0xff] %v208_v19  ;;  %v276_v24 = vmul.f32 %v176_v18, %v176_v18  ;;  %v284_v53 = vmul.f32 %v208_v19, %v208_v19 }
  0xe6   :  { %v375_v20 = vpop.f32.mrf.mxu0  ;;  %v383_v21 = vpop.f32.mrf.mxu1 }
  0xe7   :  { %242 = vst [vmem:[%s541_s2 + $0x18] sm:$0xff] %v375_v20  ;;  %250 = vst [vmem:[%s541_s2 + $0x58] sm:$0xff] %v383_v21  ;;  %v279_v34 = vmul.f32 %v375_v20, %v375_v20  ;;  %v287_v62 = vmul.f32 %v383_v21, %v383_v21 }
  0xe8   :  { %v179_v22 = vpop.f32.mrf.mxu0  ;;  %v211_v23 = vpop.f32.mrf.mxu1 }
  0xe9   :  { %240 = vst [vmem:[%s541_s2 + $0x8] sm:$0xff] %v179_v22  ;;  %v255_v25 = vadd.f32 %v179_v22, %v176_v18  ;;  %v277_v26 = vmul.f32 %v179_v22, %v179_v22  ;;  %248 = vst [vmem:[%s541_s2 + $0x48] sm:$0xff] %v211_v23  ;;  %v285_v57 = vmul.f32 %v211_v23, %v211_v23 }
  0xea   :  { %v378_v27 = vpop.f32.mrf.mxu0  ;;  %v386_v28 = vpop.f32.mrf.mxu1 }
  0xeb   :  { %v256_v30 = vadd.f32 %v374_v16, %v255_v25  ;;  %v292_v31 = vadd.f32 %v277_v26, %v276_v24  ;;  %245 = vst [vmem:[%s541_s2 + $0x30] sm:$0xff] %v378_v27  ;;  %253 = vst [vmem:[%s541_s2 + $0x70] sm:$0xff] %v386_v28  ;;  %v282_v47 = vmul.f32 %v378_v27, %v378_v27 }
  0xec   :  { %v192_v32 = vpop.f32.mrf.mxu0  ;;  %v224_v33 = vpop.f32.mrf.mxu1  ;;  %v290_v7 = vmul.f32 %v386_v28, %v386_v28 }
  0xed   :  { %v293_v35 = vadd.f32 %v292_v31, %v278_v29  ;;  %243 = vst [vmem:[%s541_s2 + $0x20] sm:$0xff] %v192_v32  ;;  %v257_v36 = vadd.f32 %v375_v20, %v256_v30  ;;  %251 = vst [vmem:[%s541_s2 + $0x60] sm:$0xff] %v224_v33  ;;  %v280_v40 = vmul.f32 %v192_v32, %v192_v32 }
  0xee   :  { %v379_v37 = vpop.f32.mrf.mxu0  ;;  %v387_v38 = vpop.f32.mrf.mxu1  ;;  %v288_v2 = vmul.f32 %v224_v33, %v224_v33 }
  0xef   :  { %v258_v39 = vadd.f32 %v257_v36, %v192_v32  ;;  %v294_v41 = vadd.f32 %v293_v35, %v279_v34  ;;  %246 = vst [vmem:[%s541_s2 + $0x38] sm:$0xff] %v379_v37  ;;  %254 = vst [vmem:[%s541_s2 + $0x78] sm:$0xff] %v387_v38  ;;  %v283_v50 = vmul.f32 %v379_v37, %v379_v37 }
  0xf0   :  { %v195_v42 = vpop.f32.mrf.mxu0  ;;  %v227_v43 = vpop.f32.mrf.mxu1  ;;  %v291_v10 = vmul.f32 %v387_v38, %v387_v38 }
  0xf1   :  { %v295_v44 = vadd.f32 %v294_v41, %v280_v40  ;;  %244 = vst [vmem:[%s541_s2 + $0x28] sm:$0xff] %v195_v42  ;;  %v259_v45 = vadd.f32 %v258_v39, %v195_v42  ;;  %v281_v46 = vmul.f32 %v195_v42, %v195_v42  ;;  %252 = vst [vmem:[%s541_s2 + $0x68] sm:$0xff] %v227_v43 }
  0xf2   :  { %v289_v6 = vmul.f32 %v227_v43, %v227_v43 }
  0xf3   :  { %v260_v48 = vadd.f32 %v378_v27, %v259_v45  ;;  %v296_v49 = vadd.f32 %v295_v44, %v281_v46 }
  0xf5   :  { %v261_v51 = vadd.f32 %v379_v37, %v260_v48  ;;  %v297_v52 = vadd.f32 %v296_v49, %v282_v47 }
  0xf7   :  { %v298_v54 = vadd.f32 %v297_v52, %v283_v50  ;;  %v262_v55 = vadd.f32 %v261_v51, %v208_v19 }
  0xf9   :  { %v263_v56 = vadd.f32 %v262_v55, %v211_v23  ;;  %v299_v58 = vadd.f32 %v298_v54, %v284_v53 }
  0xfb   :  { %v264_v60 = vadd.f32 %v382_v17, %v263_v56  ;;  %v300_v61 = vadd.f32 %v299_v58, %v285_v57 }
  0xfd   :  { %v301_v63 = vadd.f32 %v300_v61, %v286_v59  ;;  %v265_v0 = vadd.f32 %v383_v21, %v264_v60 }
  0xff   :  { %v266_v1 = vadd.f32 %v265_v0, %v224_v33  ;;  %v302_v3 = vadd.f32 %v301_v63, %v287_v62 }
 0x101   :  { %v303_v4 = vadd.f32 %v302_v3, %v288_v2  ;;  %v267_v5 = vadd.f32 %v266_v1, %v227_v43 }
 0x103   :  { %v268_v8 = vadd.f32 %v386_v28, %v267_v5  ;;  %v304_v9 = vadd.f32 %v303_v4, %v289_v6 }
 0x105   :  { %v269_v11 = vadd.f32 %v387_v38, %v268_v8  ;;  %v305_v12 = vadd.f32 %v304_v9, %v290_v7 }
 0x107   :  { %v270_v13 = vrot.slane %v269_v11, 4  ;;  %v306_v14 = vadd.f32 %v305_v12, %v291_v10 }
 0x109   :  { %v271_v15 = vadd.f32 %v270_v13, %v269_v11  ;;  %v307_v16 = vrot.slane %v306_v14, 4 }
 0x10b   :  { %v272_v17 = vrot.slane %v271_v15, 2  ;;  %v308_v18 = vadd.f32 %v307_v16, %v306_v14 }
 0x10d   :  { %v273_v19 = vadd.f32 %v272_v17, %v271_v15  ;;  %v309_v20 = vrot.slane %v308_v18, 2 }
 0x10f   :  { %v274_v21 = vrot.slane %v273_v19, 1  ;;  %v310_v22 = vadd.f32 %v309_v20, %v308_v18 }
 0x111   :  { %v311_v23 = vrot.slane %v310_v22, 1  ;;  %v275_v24 = vadd.f32 %v274_v21, %v273_v19 }
 0x113   :  { %v312_v25 = vadd.f32 %v311_v23, %v310_v22 }
 0x115   :  { %v314_v26 = vsel %vm313_vm0, %v275_v24, %v312_v25 }
 0x116   :  { %315 = vst [vmem:[%s542_s3] sm:$0x3] %v314_v26 }

// kernel: _lambda_.39
= control target key start
LH: loop header
LB: loop body
LE: loop exit
PB: predicated region body
PF: predicated region fallthrough
CT: control target
= control target key end

     0   :  { %s903_s12 = smov 0   ;;  %s1057_s0 = inlined_call_operand.vmem [shape: bf16[512,9], index: 0, kind: input, shape index: {}]   ;;  %s1058_s1 = inlined_call_operand.vmem [shape: bf16[9,128], index: 1, kind: input, shape index: {}]   ;;  %s1059_s2 = inlined_call_operand.vmem [shape: f32[512,128], index: 2, kind: output, shape index: {0}]   ;;  %s1060_s3 = inlined_call_operand.vmem [shape: f32[2,2,128], index: 3, kind: output, shape index: {1}]  }
   0x1 LB: > { %s909_s13 = sadd.s32 4294967295, %s880_s12   ;;  %p754_p0 = scmp.ge.s32.totalorder %s880_s12, 1  ;;  %s880_s12 = sphi %s903_s12, %s14_s12  }
   0x2   : > { %p141_p1 = scmp.lt.s32.totalorder %s880_s12, 3 }
   0x4   : > { %p142_p2 = pnand %p754_p0, %p141_p1 }
   0x5   : > { %s755_s16 = sshll.u32 (!%p142_p2), %s909_s13, 5  ;;  %p181_p4 = scmp.lt.s32.totalorder (!%p142_p2), %s909_s13, 1 }
   0x6   : > { %145 = sbr.rel (%p142_p2) target bundleno = 297 (0x129), region = 28  ;;  %p170_p3 = scmp.lt.s32.totalorder (!%p142_p2), %s755_s16, 63 }
   0xb   : > { %v857_v0 = vld [vmem:[%s1058_s1] sm:$0x1f]   ;;  %vm354_vm0 = vcmask 1043456   ;;  %vm355_vm1 = vcmask 1044480   ;;  %v882_v1 = vmov 65535   ;;  %s1062_s16 = smov (!%p170_p3, %s755_s16), 63 }
   0xc   : > { %v356_v2 = vsel %vm354_vm0, 4294967295, %v882_v1  ;;  %s756_s17 = sshll.u32 %s1062_s16, 2  ;;  %vm305_vm2 = vcmask 72704   ;;  %s758_s21 = sshll.u32 %s1062_s16, 3  ;;  %vm660_vm3 = vcmask 1040384  }
   0xd   : > { %v357_v3 = vsel %vm355_vm1, %v356_v2, 0  ;;  %s923_s20 = scalar_lea.vmem %s1057_s0, %s756_s17  ;;  %s961_s24 = scalar_lea.vmem %s1059_s2, %s758_s21 }
   0xe   : > { %v359_v4 = vand.u32 %v857_v0, %v357_v3  ;;  %v858_v5 = vld [vmem:[%s923_s20] sm:$0xff]   ;;  %v859_v6 = vld [vmem:[%s923_s20 + $0x8] sm:$0xff]   ;;  %v860_v7 = vld [vmem:[%s923_s20 + $0x10] sm:$0xff]   ;;  %s1064_s13 = smov (!%p181_p4, %s909_s13), 1 }
   0xf   : > { %814 = vmatprep.mubr.msk.bf16.mxu0 %vm305_vm2, %v858_v5  ;;  %v861_v8 = vld [vmem:[%s923_s20 + $0x18] sm:$0xff]   ;;  %v862_v9 = vld [vmem:[%s923_s20 + $0x20] sm:$0xff]   ;;  %v867_v11 = vld [vmem:[%s923_s20 + $0x48] sm:$0xff]   ;;  %s759_s25 = sshll.u32 %s1064_s13, 1 }
  0x10   : > { %812 = vmatprep.subr.bf16.mxu0 %v359_v4  ;;  %846 = vmatprep.subr.bf16.mxu1 %v359_v4  ;;  %v866_v10 = vld [vmem:[%s923_s20 + $0x40] sm:$0xff]   ;;  %v868_v12 = vld [vmem:[%s923_s20 + $0x50] sm:$0xff]   ;;  %v863_v13 = vld [vmem:[%s923_s20 + $0x28] sm:$0xff]   ;;  %s184_s28 = scalar_lea.vmem %s1060_s3, %s759_s25 }
  0x11   : > { %813 = vmatpush3.bf16.msra.mxu0 %v359_v4  ;;  %847 = vmatpush3.bf16.msra.mxu1 %v359_v4  ;;  %v869_v14 = vld [vmem:[%s923_s20 + $0x58] sm:$0xff]   ;;  %v864_v15 = vld [vmem:[%s923_s20 + $0x30] sm:$0xff]   ;;  %v870_v16 = vld [vmem:[%s923_s20 + $0x60] sm:$0xff]  }
  0x12   : > { %830 = vmatprep.mubr.msk.bf16.mxu1 %vm305_vm2, %v866_v10  ;;  %v865_v17 = vld [vmem:[%s923_s20 + $0x38] sm:$0xff]   ;;  %v871_v18 = vld [vmem:[%s923_s20 + $0x68] sm:$0xff]   ;;  %v872_v19 = vld [vmem:[%s923_s20 + $0x70] sm:$0xff]  }
  0x13   : > { %v873_v20 = vld [vmem:[%s923_s20 + $0x78] sm:$0xff]  }
  0x14   : > { %815 = vmatmul.mubr.msk.bf16.vlgmr.msra.gmra.mxu0 %vm305_vm2, %v859_v6  ;;  %831 = vmatmul.mubr.msk.bf16.vlgmr.msra.gmra.mxu1 %vm305_vm2, %v867_v11 }
  0x15   : > { %818 = vmatprep.mubr.msk.bf16.mxu0 %vm305_vm2, %v860_v7  ;;  %834 = vmatprep.mubr.msk.bf16.mxu1 %vm305_vm2, %v868_v12 }
  0x1c   : > { %819 = vmatmul.mubr.msk.bf16.gmra.mxu0 %vm305_vm2, %v861_v8  ;;  %835 = vmatmul.mubr.msk.bf16.gmra.mxu1 %vm305_vm2, %v869_v14 }
  0x1d   : > { %822 = vmatprep.mubr.msk.bf16.mxu0 %vm305_vm2, %v862_v9  ;;  %838 = vmatprep.mubr.msk.bf16.mxu1 %vm305_vm2, %v870_v16 }
  0x24   : > { %823 = vmatmul.mubr.msk.bf16.gmra.mxu0 %vm305_vm2, %v863_v13  ;;  %839 = vmatmul.mubr.msk.bf16.gmra.mxu1 %vm305_vm2, %v871_v18 }
  0x25   : > { %826 = vmatprep.mubr.msk.bf16.mxu0 %vm305_vm2, %v864_v15  ;;  %842 = vmatprep.mubr.msk.bf16.mxu1 %vm305_vm2, %v872_v19 }
  0x2c   : > { %827 = vmatmul.mubr.msk.bf16.gmra.mxu0 %vm305_vm2, %v865_v17  ;;  %843 = vmatmul.mubr.msk.bf16.gmra.mxu1 %vm305_vm2, %v873_v20 }
  0xd4   : > { %v816_v21 = vpop.f32.mrf.mxu0  ;;  %v967_v29 = vpop.f32.mrf.mxu1 }
  0xd5   : > { %524 = vst [vmem:[%s961_s24 + $0x10] sm:$0xff] %v816_v21  ;;  %v593_v30 = vmul.f32 %v816_v21, %v816_v21  ;;  %540 = vst [vmem:[%s961_s24 + $0x90] sm:$0xff] %v967_v29 }
  0xd6   : > { %v395_v22 = vpop.f32.mrf.mxu0  ;;  %v972_v34 = vpop.f32.mrf.mxu1 }
  0xd7   : > { %522 = vst [vmem:[%s961_s24] sm:$0xff] %v395_v22  ;;  %v591_v25 = vmul.f32 %v395_v22, %v395_v22  ;;  %538 = vst [vmem:[%s961_s24 + $0x80] sm:$0xff] %v972_v34 }
  0xd8   : > { %v817_v23 = vpop.f32.mrf.mxu0  ;;  %v977_v39 = vpop.f32.mrf.mxu1 }
  0xd9   : > { %525 = vst [vmem:[%s961_s24 + $0x18] sm:$0xff] %v817_v23  ;;  %v594_v35 = vmul.f32 %v817_v23, %v817_v23  ;;  %541 = vst [vmem:[%s961_s24 + $0x98] sm:$0xff] %v977_v39 }
  0xda   : > { %v398_v24 = vpop.f32.mrf.mxu0  ;;  %v982_v44 = vpop.f32.mrf.mxu1 }
  0xdb   : > { %523 = vst [vmem:[%s961_s24 + $0x8] sm:$0xff] %v398_v24  ;;  %v554_v26 = vadd.f32 %v398_v24, %v395_v22  ;;  %v592_v27 = vmul.f32 %v398_v24, %v398_v24  ;;  %539 = vst [vmem:[%s961_s24 + $0x88] sm:$0xff] %v982_v44 }
  0xdc   : > { %v820_v28 = vpop.f32.mrf.mxu0  ;;  %v987_v49 = vpop.f32.mrf.mxu1 }
  0xdd   : > { %v555_v31 = vadd.f32 %v816_v21, %v554_v26  ;;  %v623_v32 = vadd.f32 %v592_v27, %v591_v25  ;;  %528 = vst [vmem:[%s961_s24 + $0x30] sm:$0xff] %v820_v28  ;;  %v597_v50 = vmul.f32 %v820_v28, %v820_v28  ;;  %544 = vst [vmem:[%s961_s24 + $0xb0] sm:$0xff] %v987_v49 }
  0xde   : > { %v411_v33 = vpop.f32.mrf.mxu0  ;;  %v992_v54 = vpop.f32.mrf.mxu1 }
  0xdf   : > { %v624_v36 = vadd.f32 %v623_v32, %v593_v30  ;;  %526 = vst [vmem:[%s961_s24 + $0x20] sm:$0xff] %v411_v33  ;;  %v556_v37 = vadd.f32 %v817_v23, %v555_v31  ;;  %v595_v41 = vmul.f32 %v411_v33, %v411_v33  ;;  %542 = vst [vmem:[%s961_s24 + $0xa0] sm:$0xff] %v992_v54 }
  0xe0   : > { %v821_v38 = vpop.f32.mrf.mxu0  ;;  %v997_v59 = vpop.f32.mrf.mxu1 }
  0xe1   : > { %v557_v40 = vadd.f32 %v556_v37, %v411_v33  ;;  %v625_v42 = vadd.f32 %v624_v36, %v594_v35  ;;  %529 = vst [vmem:[%s961_s24 + $0x38] sm:$0xff] %v821_v38  ;;  %v598_v55 = vmul.f32 %v821_v38, %v821_v38  ;;  %545 = vst [vmem:[%s961_s24 + $0xb8] sm:$0xff] %v997_v59 }
  0xe2   : > { %v414_v43 = vpop.f32.mrf.mxu0  ;;  %v1002_v0 = vpop.f32.mrf.mxu1  ;;  %v607_v35 = vmul.f32 %v972_v34, %v972_v34 }
  0xe3   : > { %v626_v45 = vadd.f32 %v625_v42, %v595_v41  ;;  %527 = vst [vmem:[%s961_s24 + $0x28] sm:$0xff] %v414_v43  ;;  %v558_v46 = vadd.f32 %v557_v40, %v414_v43  ;;  %v596_v47 = vmul.f32 %v414_v43, %v414_v43  ;;  %543 = vst [vmem:[%s961_s24 + $0xa8] sm:$0xff] %v1002_v0 }
  0xe4   : > { %v824_v48 = vpop.f32.mrf.mxu0  ;;  %v1007_v5 = vpop.f32.mrf.mxu1  ;;  %v608_v41 = vmul.f32 %v982_v44, %v982_v44  ;;  %v609_v43 = vmul.f32 %v967_v29, %v967_v29 }
  0xe5   : > { %v559_v51 = vadd.f32 %v820_v28, %v558_v46  ;;  %v627_v52 = vadd.f32 %v626_v45, %v596_v47  ;;  %532 = vst [vmem:[%s961_s24 + $0x50] sm:$0xff] %v824_v48  ;;  %v601_v6 = vmul.f32 %v824_v48, %v824_v48  ;;  %548 = vst [vmem:[%s961_s24 + $0xd0] sm:$0xff] %v1007_v5 }
  0xe6   : > { %v427_v53 = vpop.f32.mrf.mxu0  ;;  %v491_v10 = vpop.f32.mrf.mxu1  ;;  %v610_v47 = vmul.f32 %v977_v39, %v977_v39 }
  0xe7   : > { %v628_v56 = vadd.f32 %v627_v52, %v597_v50  ;;  %530 = vst [vmem:[%s961_s24 + $0x40] sm:$0xff] %v427_v53  ;;  %v560_v57 = vadd.f32 %v821_v38, %v559_v51  ;;  %v599_v61 = vmul.f32 %v427_v53, %v427_v53  ;;  %546 = vst [vmem:[%s961_s24 + $0xc0] sm:$0xff] %v491_v10 }
  0xe8   : > { %v825_v58 = vpop.f32.mrf.mxu0  ;;  %v841_v15 = vpop.f32.mrf.mxu1  ;;  %v611_v51 = vmul.f32 %v992_v54, %v992_v54 }
  0xe9   : > { %v561_v60 = vadd.f32 %v560_v57, %v427_v53  ;;  %v629_v62 = vadd.f32 %v628_v56, %v598_v55  ;;  %533 = vst [vmem:[%s961_s24 + $0x58] sm:$0xff] %v825_v58  ;;  %v602_v11 = vmul.f32 %v825_v58, %v825_v58  ;;  %549 = vst [vmem:[%s961_s24 + $0xd8] sm:$0xff] %v841_v15 }
  0xea   : > { %v430_v63 = vpop.f32.mrf.mxu0  ;;  %v494_v20 = vpop.f32.mrf.mxu1  ;;  %v612_v55 = vmul.f32 %v1002_v0, %v1002_v0 }
  0xeb   : > { %v630_v1 = vadd.f32 %v629_v62, %v599_v61  ;;  %531 = vst [vmem:[%s961_s24 + $0x48] sm:$0xff] %v430_v63  ;;  %v562_v2 = vadd.f32 %v561_v60, %v430_v63  ;;  %v600_v3 = vmul.f32 %v430_v63, %v430_v63  ;;  %547 = vst [vmem:[%s961_s24 + $0xc8] sm:$0xff] %v494_v20 }
  0xec   : > { %v828_v4 = vpop.f32.mrf.mxu0  ;;  %v844_v24 = vpop.f32.mrf.mxu1  ;;  %v615_v61 = vmul.f32 %v491_v10, %v491_v10 }
  0xed   : > { %v563_v7 = vadd.f32 %v824_v48, %v562_v2  ;;  %v631_v8 = vadd.f32 %v630_v1, %v600_v3  ;;  %536 = vst [vmem:[%s961_s24 + $0x70] sm:$0xff] %v828_v4  ;;  %v605_v25 = vmul.f32 %v828_v4, %v828_v4  ;;  %552 = vst [vmem:[%s961_s24 + $0xf0] sm:$0xff] %v844_v24 }
  0xee   : > { %v443_v9 = vpop.f32.mrf.mxu0  ;;  %v507_v28 = vpop.f32.mrf.mxu1  ;;  %v616_v2 = vmul.f32 %v494_v20, %v494_v20 }
  0xef   : > { %v632_v12 = vadd.f32 %v631_v8, %v601_v6  ;;  %534 = vst [vmem:[%s961_s24 + $0x60] sm:$0xff] %v443_v9  ;;  %v564_v13 = vadd.f32 %v825_v58, %v563_v7  ;;  %v603_v17 = vmul.f32 %v443_v9, %v443_v9  ;;  %550 = vst [vmem:[%s961_s24 + $0xe0] sm:$0xff] %v507_v28 }
  0xf0   : > { %v829_v14 = vpop.f32.mrf.mxu0  ;;  %v845_v33 = vpop.f32.mrf.mxu1 }
  0xf1   : > { %v565_v16 = vadd.f32 %v564_v13, %v443_v9  ;;  %v633_v18 = vadd.f32 %v632_v12, %v602_v11  ;;  %537 = vst [vmem:[%s961_s24 + $0x78] sm:$0xff] %v829_v14  ;;  %v606_v30 = vmul.f32 %v829_v14, %v829_v14  ;;  %553 = vst [vmem:[%s961_s24 + $0xf8] sm:$0xff] %v845_v33 }
  0xf2   : > { %v446_v19 = vpop.f32.mrf.mxu0  ;;  %v510_v38 = vpop.f32.mrf.mxu1  ;;  %v619_v9 = vmul.f32 %v507_v28, %v507_v28  ;;  %v621_v13 = vmul.f32 %v844_v24, %v844_v24 }
  0xf3   : > { %v634_v21 = vadd.f32 %v633_v18, %v603_v17  ;;  %535 = vst [vmem:[%s961_s24 + $0x68] sm:$0xff] %v446_v19  ;;  %v566_v22 = vadd.f32 %v565_v16, %v446_v19  ;;  %v604_v23 = vmul.f32 %v446_v19, %v446_v19  ;;  %551 = vst [vmem:[%s961_s24 + $0xe8] sm:$0xff] %v510_v38 }
  0xf4   : > { %v620_v12 = vmul.f32 %v510_v38, %v510_v38  ;;  %v622_v17 = vmul.f32 %v845_v33, %v845_v33 }
  0xf5   : > { %v567_v26 = vadd.f32 %v828_v4, %v566_v22  ;;  %v635_v27 = vadd.f32 %v634_v21, %v604_v23 }
  0xf7   : > { %v568_v31 = vadd.f32 %v829_v14, %v567_v26  ;;  %v636_v32 = vadd.f32 %v635_v27, %v605_v25 }
  0xf9   : > { %v637_v36 = vadd.f32 %v636_v32, %v606_v30  ;;  %v569_v37 = vadd.f32 %v568_v31, %v972_v34 }
  0xfb   : > { %v570_v40 = vadd.f32 %v569_v37, %v982_v44  ;;  %v638_v42 = vadd.f32 %v637_v36, %v607_v35 }
  0xfd   : > { %v571_v45 = vadd.f32 %v967_v29, %v570_v40  ;;  %v639_v46 = vadd.f32 %v638_v42, %v608_v41  ;;  %v613_v29 = vmul.f32 %v987_v49, %v987_v49 }
  0xff   : > { %v640_v48 = vadd.f32 %v639_v46, %v609_v43  ;;  %v572_v34 = vadd.f32 %v977_v39, %v571_v45  ;;  %v614_v39 = vmul.f32 %v997_v59, %v997_v59 }
 0x101   : > { %v573_v50 = vadd.f32 %v572_v34, %v992_v54  ;;  %v641_v44 = vadd.f32 %v640_v48, %v610_v47 }
 0x103   : > { %v642_v52 = vadd.f32 %v641_v44, %v611_v51  ;;  %v574_v53 = vadd.f32 %v573_v50, %v1002_v0  ;;  %v617_v0 = vmul.f32 %v1007_v5, %v1007_v5 }
 0x105   : > { %v575_v56 = vadd.f32 %v987_v49, %v574_v53  ;;  %v643_v57 = vadd.f32 %v642_v52, %v612_v55  ;;  %v618_v49 = vmul.f32 %v841_v15, %v841_v15 }
 0x107   : > { %v644_v58 = vadd.f32 %v643_v57, %v613_v29  ;;  %v576_v60 = vadd.f32 %v997_v59, %v575_v56 }
 0x109   : > { %v577_v54 = vadd.f32 %v576_v60, %v491_v10  ;;  %v645_v62 = vadd.f32 %v644_v58, %v614_v39 }
 0x10b   : > { %v646_v63 = vadd.f32 %v645_v62, %v615_v61  ;;  %v578_v1 = vadd.f32 %v577_v54, %v494_v20 }
 0x10d   : > { %v579_v3 = vadd.f32 %v1007_v5, %v578_v1  ;;  %v647_v4 = vadd.f32 %v646_v63, %v616_v2 }
 0x10f   : > { %v648_v6 = vadd.f32 %v647_v4, %v617_v0  ;;  %v580_v7 = vadd.f32 %v841_v15, %v579_v3 }
 0x111   : > { %v581_v8 = vadd.f32 %v580_v7, %v507_v28  ;;  %v649_v11 = vadd.f32 %v648_v6, %v618_v49 }
 0x113   : > { %v650_v59 = vadd.f32 %v649_v11, %v619_v9  ;;  %v582_v10 = vadd.f32 %v581_v8, %v510_v38 }
 0x115   : > { %v583_v14 = vadd.f32 %v844_v24, %v582_v10  ;;  %v651_v16 = vadd.f32 %v650_v59, %v620_v12 }
 0x117   : > { %v584_v18 = vadd.f32 %v845_v33, %v583_v14  ;;  %v652_v19 = vadd.f32 %v651_v16, %v621_v13 }
 0x119   : > { %v585_v20 = vrot.slane %v584_v18, 4  ;;  %v653_v5 = vadd.f32 %v652_v19, %v622_v17 }
 0x11b   : > { %v586_v21 = vadd.f32 %v585_v20, %v584_v18  ;;  %v654_v22 = vrot.slane %v653_v5, 4 }
 0x11d   : > { %v587_v23 = vrot.slane %v586_v21, 2  ;;  %v655_v15 = vadd.f32 %v654_v22, %v653_v5 }
 0x11f   : > { %v588_v25 = vadd.f32 %v587_v23, %v586_v21  ;;  %v656_v26 = vrot.slane %v655_v15, 2 }
 0x121   : > { %v589_v27 = vrot.slane %v588_v25, 1  ;;  %v657_v28 = vadd.f32 %v656_v26, %v655_v15 }
 0x123   : > { %v658_v30 = vrot.slane %v657_v28, 1  ;;  %v590_v24 = vadd.f32 %v589_v27, %v588_v25 }
 0x125   : > { %v659_v31 = vadd.f32 %v658_v30, %v657_v28 }
 0x127   : > { %v661_v32 = vsel %vm660_vm3, %v590_v24, %v659_v31 }
 0x128   : > { %662 = vst [vmem:[%s184_s28] sm:$0x3] %v661_v32 }
 0x129 PF: > { %s14_s12 = sadd.s32 1, %s880_s12  }
 0x12a   : > { %p11_p5 = scmp.ge.s32.totalorder %s14_s12, 4  }
 0x12c   :  { %13 = sbr.rel (!%p11_p5) target bundleno = 1 (0x1), region = 70 }

// kernel: _lambda_.42
= control target key start
LH: loop header
LB: loop body
LE: loop exit
PB: predicated region body
PF: predicated region fallthrough
CT: control target
= control target key end

     0   :  { %s254_s0 = inlined_call_operand.vmem [shape: f32[128,128], index: 0, kind: input, shape index: {}]   ;;  %s255_s1 = inlined_call_operand.vmem [shape: f32[1,128], index: 1, kind: input, shape index: {}]   ;;  %s256_s2 = inlined_call_operand.vmem [shape: f32[1,128], index: 2, kind: input, shape index: {}]   ;;  %s257_s3 = inlined_call_operand.vmem [shape: f32[128,128], index: 3, kind: output, shape index: {}]  }
   0x1   :  { %v14_v0 = vld [vmem:[%s254_s0] sm:$0xff]  ;;  %v15_v4 = vld [vmem:[%s254_s0 + $0x8] sm:$0xff]  ;;  %v16_v5 = vld [vmem:[%s254_s0 + $0x10] sm:$0xff] }
   0x2   :  { %v112_v1 = vld [vmem:[%s255_s1] ss:$0 sm:$0xff]  ;;  %v17_v6 = vld [vmem:[%s254_s0 + $0x18] sm:$0xff]  ;;  %v19_v11 = vld [vmem:[%s254_s0 + $0x28] sm:$0xff] }
   0x3   :  { %v143_v2 = vld [vmem:[%s256_s2] ss:$0 sm:$0xff]  ;;  %v37_v3 = vmul.f32 %v112_v1, %v14_v0  ;;  %v38_v7 = vmul.f32 %v112_v1, %v15_v4  ;;  %v39_v8 = vmul.f32 %v112_v1, %v16_v5  ;;  %v40_v9 = vmul.f32 %v112_v1, %v17_v6  ;;  %v20_v12 = vld [vmem:[%s254_s0 + $0x30] sm:$0xff]  ;;  %v21_v17 = vld [vmem:[%s254_s0 + $0x38] sm:$0xff] }
   0x4   :  { %v18_v10 = vld [vmem:[%s254_s0 + $0x20] sm:$0xff]  ;;  %v42_v15 = vmul.f32 %v112_v1, %v19_v11  ;;  %v43_v16 = vmul.f32 %v112_v1, %v20_v12  ;;  %v44_v21 = vmul.f32 %v112_v1, %v21_v17  ;;  %v23_v27 = vld [vmem:[%s254_s0 + $0x48] sm:$0xff]  ;;  %v24_v28 = vld [vmem:[%s254_s0 + $0x50] sm:$0xff] }
   0x5   :  { %v60_v13 = vadd.f32 %v143_v2, %v37_v3  ;;  %v41_v14 = vmul.f32 %v112_v1, %v18_v10  ;;  %v61_v18 = vadd.f32 %v143_v2, %v38_v7  ;;  %v62_v19 = vadd.f32 %v143_v2, %v39_v8  ;;  %v22_v22 = vld [vmem:[%s254_s0 + $0x40] sm:$0xff]  ;;  %v25_v29 = vld [vmem:[%s254_s0 + $0x58] sm:$0xff]  ;;  %v27_v35 = vld [vmem:[%s254_s0 + $0x68] sm:$0xff] }
   0x6   :  { %v63_v20 = vadd.f32 %v143_v2, %v40_v9  ;;  %v65_v25 = vadd.f32 %v143_v2, %v42_v15  ;;  %v66_v26 = vadd.f32 %v143_v2, %v43_v16  ;;  %v67_v33 = vadd.f32 %v143_v2, %v44_v21  ;;  %v26_v34 = vld [vmem:[%s254_s0 + $0x60] sm:$0xff]  ;;  %v28_v36 = vld [vmem:[%s254_s0 + $0x70] sm:$0xff]  ;;  %v29_v41 = vld [vmem:[%s254_s0 + $0x78] sm:$0xff] }
   0x7   :  { %v76_v23 = vmax.f32 %v60_v13, 0.0  ;;  %v64_v24 = vadd.f32 %v143_v2, %v41_v14  ;;  %v77_v30 = vmax.f32 %v61_v18, 0.0  ;;  %v78_v31 = vmax.f32 %v62_v19, 0.0 }
   0x8   :  { %v79_v32 = vmax.f32 %v63_v20, 0.0  ;;  %v81_v38 = vmax.f32 %v65_v25, 0.0  ;;  %v82_v39 = vmax.f32 %v66_v26, 0.0  ;;  %v45_v40 = vmul.f32 %v112_v1, %v22_v22 }
   0x9   :  { %92 = vst [vmem:[%s257_s3] sm:$0xff] %v76_v23  ;;  %v80_v37 = vmax.f32 %v64_v24, 0.0  ;;  %93 = vst [vmem:[%s257_s3 + $0x8] sm:$0xff] %v77_v30  ;;  %v83_v42 = vmax.f32 %v67_v33, 0.0  ;;  %v46_v43 = vmul.f32 %v112_v1, %v23_v27  ;;  %v47_v44 = vmul.f32 %v112_v1, %v24_v28 }
   0xa   :  { %94 = vst [vmem:[%s257_s3 + $0x10] sm:$0xff] %v78_v31  ;;  %95 = vst [vmem:[%s257_s3 + $0x18] sm:$0xff] %v79_v32  ;;  %v48_v45 = vmul.f32 %v112_v1, %v25_v29  ;;  %v68_v46 = vadd.f32 %v143_v2, %v45_v40  ;;  %v49_v47 = vmul.f32 %v112_v1, %v26_v34 }
   0xb   :  { %96 = vst [vmem:[%s257_s3 + $0x20] sm:$0xff] %v80_v37  ;;  %97 = vst [vmem:[%s257_s3 + $0x28] sm:$0xff] %v81_v38  ;;  %v50_v48 = vmul.f32 %v112_v1, %v27_v35  ;;  %v51_v49 = vmul.f32 %v112_v1, %v28_v36  ;;  %v69_v50 = vadd.f32 %v143_v2, %v46_v43 }
   0xc   :  { %98 = vst [vmem:[%s257_s3 + $0x30] sm:$0xff] %v82_v39  ;;  %99 = vst [vmem:[%s257_s3 + $0x38] sm:$0xff] %v83_v42  ;;  %v70_v51 = vadd.f32 %v143_v2, %v47_v44  ;;  %v71_v52 = vadd.f32 %v143_v2, %v48_v45  ;;  %v52_v53 = vmul.f32 %v112_v1, %v29_v41  ;;  %v84_v54 = vmax.f32 %v68_v46, 0.0 }
   0xd   :  { %v72_v55 = vadd.f32 %v143_v2, %v49_v47  ;;  %v73_v56 = vadd.f32 %v143_v2, %v50_v48  ;;  %v74_v57 = vadd.f32 %v143_v2, %v51_v49  ;;  %v85_v58 = vmax.f32 %v69_v50, 0.0 }
   0xe   :  { %v86_v59 = vmax.f32 %v70_v51, 0.0  ;;  %v87_v60 = vmax.f32 %v71_v52, 0.0  ;;  %v75_v61 = vadd.f32 %v143_v2, %v52_v53  ;;  %100 = vst [vmem:[%s257_s3 + $0x40] sm:$0xff] %v84_v54 }
   0xf   :  { %v88_v62 = vmax.f32 %v72_v55, 0.0  ;;  %v89_v63 = vmax.f32 %v73_v56, 0.0  ;;  %v90_v0 = vmax.f32 %v74_v57, 0.0  ;;  %101 = vst [vmem:[%s257_s3 + $0x48] sm:$0xff] %v85_v58 }
  0x10   :  { %102 = vst [vmem:[%s257_s3 + $0x50] sm:$0xff] %v86_v59  ;;  %103 = vst [vmem:[%s257_s3 + $0x58] sm:$0xff] %v87_v60  ;;  %v91_v1 = vmax.f32 %v75_v61, 0.0 }
  0x11   :  { %104 = vst [vmem:[%s257_s3 + $0x60] sm:$0xff] %v88_v62  ;;  %105 = vst [vmem:[%s257_s3 + $0x68] sm:$0xff] %v89_v63 }
  0x12   :  { %106 = vst [vmem:[%s257_s3 + $0x70] sm:$0xff] %v90_v0  ;;  %107 = vst [vmem:[%s257_s3 + $0x78] sm:$0xff] %v91_v1 }

// kernel: _lambda_.45
= control target key start
LH: loop header
LB: loop body
LE: loop exit
PB: predicated region body
PF: predicated region fallthrough
CT: control target
= control target key end

     0   :  { %s466_s0 = inlined_call_operand.vmem [shape: f32[128,128], index: 0, kind: input, shape index: {}]   ;;  %s467_s1 = inlined_call_operand.vmem [shape: f32[128,128], index: 1, kind: input, shape index: {}]   ;;  %s468_s2 = inlined_call_operand.vmem [shape: f32[1,128], index: 2, kind: input, shape index: {}]   ;;  %s469_s3 = inlined_call_operand.vmem [shape: f32[1,128], index: 3, kind: input, shape index: {}]   ;;  %s470_s4 = inlined_call_operand.vmem [shape: f32[1,128], index: 4, kind: input, shape index: {}]   ;;  %s471_s5 = inlined_call_operand.vmem [shape: f32[1,128], index: 5, kind: input, shape index: {}]   ;;  %s472_s6 = inlined_call_operand.vmem [shape: f32[128,128], index: 6, kind: output, shape index: {}]  }
   0x1   :  { %v23_v0 = vld [vmem:[%s466_s0] sm:$0xff]  ;;  %v24_v8 = vld [vmem:[%s466_s0 + $0x8] sm:$0xff]  ;;  %v25_v10 = vld [vmem:[%s466_s0 + $0x10] sm:$0xff] }
   0x2   :  { %v244_v1 = vld [vmem:[%s468_s2] ss:$0 sm:$0xff]  ;;  %v86_v9 = vld [vmem:[%s467_s1 + $0x8] sm:$0xff]  ;;  %v87_v15 = vld [vmem:[%s467_s1 + $0x10] sm:$0xff] }
   0x3   :  { %v249_v2 = vld [vmem:[%s469_s3] ss:$0 sm:$0xff]  ;;  %v46_v3 = vmul.f32 %v244_v1, %v23_v0  ;;  %v47_v12 = vmul.f32 %v244_v1, %v24_v8  ;;  %v48_v14 = vmul.f32 %v244_v1, %v25_v10  ;;  %v26_v16 = vld [vmem:[%s466_s0 + $0x18] sm:$0xff]  ;;  %v28_v23 = vld [vmem:[%s466_s0 + $0x28] sm:$0xff] }
   0x4   :  { %v85_v4 = vld [vmem:[%s467_s1] sm:$0xff]  ;;  %v88_v17 = vld [vmem:[%s467_s1 + $0x18] sm:$0xff]  ;;  %v49_v19 = vmul.f32 %v244_v1, %v26_v16  ;;  %v90_v28 = vld [vmem:[%s467_s1 + $0x28] sm:$0xff]  ;;  %v51_v33 = vmul.f32 %v244_v1, %v28_v23 }
   0x5   :  { %v258_v5 = vld [vmem:[%s470_s4] ss:$0 sm:$0xff]  ;;  %v69_v11 = vadd.f32 %v249_v2, %v46_v3  ;;  %v70_v25 = vadd.f32 %v249_v2, %v47_v12  ;;  %v71_v26 = vadd.f32 %v249_v2, %v48_v14  ;;  %v29_v29 = vld [vmem:[%s466_s0 + $0x30] sm:$0xff]  ;;  %v30_v39 = vld [vmem:[%s466_s0 + $0x38] sm:$0xff] }
   0x6   :  { %v108_v6 = vmul.f32 %v258_v5, %v85_v4  ;;  %v264_v7 = vld [vmem:[%s471_s5] ss:$0 sm:$0xff]  ;;  %v109_v13 = vmul.f32 %v258_v5, %v86_v9  ;;  %v110_v18 = vmul.f32 %v258_v5, %v87_v15  ;;  %v111_v20 = vmul.f32 %v258_v5, %v88_v17  ;;  %v91_v30 = vld [vmem:[%s467_s1 + $0x30] sm:$0xff]  ;;  %v92_v44 = vld [vmem:[%s467_s1 + $0x38] sm:$0xff] }
   0x7   :  { %v27_v21 = vld [vmem:[%s466_s0 + $0x20] sm:$0xff]  ;;  %v72_v31 = vadd.f32 %v249_v2, %v49_v19  ;;  %v113_v34 = vmul.f32 %v258_v5, %v90_v28  ;;  %v74_v41 = vadd.f32 %v249_v2, %v51_v33  ;;  %v52_v42 = vmul.f32 %v244_v1, %v29_v29  ;;  %v32_v55 = vld [vmem:[%s466_s0 + $0x48] sm:$0xff]  ;;  %v33_v3 = vld [vmem:[%s466_s0 + $0x50] sm:$0xff] }
   0x8   :  { %v89_v22 = vld [vmem:[%s467_s1 + $0x20] sm:$0xff]  ;;  %v124_v24 = vadd.f32 %v108_v6, %v69_v11  ;;  %v50_v27 = vmul.f32 %v244_v1, %v27_v21  ;;  %v125_v36 = vadd.f32 %v109_v13, %v70_v25  ;;  %v126_v37 = vadd.f32 %v110_v18, %v71_v26  ;;  %v94_v60 = vld [vmem:[%s467_s1 + $0x48] sm:$0xff]  ;;  %v95_v4 = vld [vmem:[%s467_s1 + $0x50] sm:$0xff] }
   0x9   :  { %v112_v32 = vmul.f32 %v258_v5, %v89_v22  ;;  %v127_v40 = vadd.f32 %v111_v20, %v72_v31  ;;  %v114_v43 = vmul.f32 %v258_v5, %v91_v30  ;;  %v129_v50 = vadd.f32 %v113_v34, %v74_v41  ;;  %v31_v53 = vld [vmem:[%s466_s0 + $0x40] sm:$0xff]  ;;  %v34_v11 = vld [vmem:[%s466_s0 + $0x58] sm:$0xff]  ;;  %v36_v23 = vld [vmem:[%s466_s0 + $0x68] sm:$0xff] }
   0xa   :  { %v147_v35 = vadd.f32 %v264_v7, %v124_v24  ;;  %v73_v38 = vadd.f32 %v249_v2, %v50_v27  ;;  %v148_v46 = vadd.f32 %v264_v7, %v125_v36  ;;  %v149_v47 = vadd.f32 %v264_v7, %v126_v37  ;;  %v93_v54 = vld [vmem:[%s467_s1 + $0x40] sm:$0xff]  ;;  %v96_v12 = vld [vmem:[%s467_s1 + $0x58] sm:$0xff]  ;;  %v37_v33 = vld [vmem:[%s466_s0 + $0x70] sm:$0xff] }
   0xb   :  { %v150_v49 = vadd.f32 %v264_v7, %v127_v40  ;;  %v75_v51 = vadd.f32 %v249_v2, %v52_v42  ;;  %v53_v52 = vmul.f32 %v244_v1, %v30_v39  ;;  %v115_v59 = vmul.f32 %v258_v5, %v92_v44  ;;  %v35_v17 = vld [vmem:[%s466_s0 + $0x60] sm:$0xff]  ;;  %v99_v42 = vld [vmem:[%s467_s1 + $0x70] sm:$0xff] }
   0xc   :  { %v163_v45 = vmax.f32 %v147_v35, 0.0  ;;  %v128_v48 = vadd.f32 %v112_v32, %v73_v38  ;;  %v164_v56 = vmax.f32 %v148_v46, 0.0  ;;  %v165_v57 = vmax.f32 %v149_v47, 0.0  ;;  %v97_v22 = vld [vmem:[%s467_s1 + $0x60] sm:$0xff]  ;;  %v98_v32 = vld [vmem:[%s467_s1 + $0x68] sm:$0xff]  ;;  %v38_v47 = vld [vmem:[%s466_s0 + $0x78] sm:$0xff] }
   0xd   :  { %v166_v61 = vmax.f32 %v150_v49, 0.0  ;;  %v152_v62 = vadd.f32 %v264_v7, %v129_v50  ;;  %v130_v63 = vadd.f32 %v114_v43, %v75_v51  ;;  %v76_v0 = vadd.f32 %v249_v2, %v53_v52 }
   0xe   :  { %179 = vst [vmem:[%s472_s6] sm:$0xff] %v163_v45  ;;  %v151_v58 = vadd.f32 %v264_v7, %v128_v48  ;;  %180 = vst [vmem:[%s472_s6 + $0x8] sm:$0xff] %v164_v56  ;;  %v54_v8 = vmul.f32 %v244_v1, %v31_v53  ;;  %v116_v9 = vmul.f32 %v258_v5, %v93_v54  ;;  %v100_v48 = vld [vmem:[%s467_s1 + $0x78] sm:$0xff] }
   0xf   :  { %181 = vst [vmem:[%s472_s6 + $0x10] sm:$0xff] %v165_v57  ;;  %v55_v10 = vmul.f32 %v244_v1, %v32_v55  ;;  %182 = vst [vmem:[%s472_s6 + $0x18] sm:$0xff] %v166_v61  ;;  %v168_v13 = vmax.f32 %v152_v62, 0.0  ;;  %v153_v14 = vadd.f32 %v264_v7, %v130_v63  ;;  %v131_v15 = vadd.f32 %v115_v59, %v76_v0 }
  0x10   :  { %v167_v6 = vmax.f32 %v151_v58, 0.0  ;;  %v117_v16 = vmul.f32 %v258_v5, %v94_v60  ;;  %v77_v18 = vadd.f32 %v249_v2, %v54_v8  ;;  %v56_v20 = vmul.f32 %v244_v1, %v33_v3 }
  0x11   :  { %v78_v19 = vadd.f32 %v249_v2, %v55_v10  ;;  %v118_v21 = vmul.f32 %v258_v5, %v95_v4  ;;  %184 = vst [vmem:[%s472_s6 + $0x28] sm:$0xff] %v168_v13  ;;  %v169_v24 = vmax.f32 %v153_v14, 0.0  ;;  %v154_v25 = vadd.f32 %v264_v7, %v131_v15 }
  0x12   :  { %183 = vst [vmem:[%s472_s6 + $0x20] sm:$0xff] %v167_v6  ;;  %v57_v26 = vmul.f32 %v244_v1, %v34_v11  ;;  %v119_v27 = vmul.f32 %v258_v5, %v96_v12  ;;  %v132_v28 = vadd.f32 %v116_v9, %v77_v18  ;;  %v79_v30 = vadd.f32 %v249_v2, %v56_v20 }
  0x13   :  { %v133_v29 = vadd.f32 %v117_v16, %v78_v19  ;;  %v58_v31 = vmul.f32 %v244_v1, %v35_v17  ;;  %185 = vst [vmem:[%s472_s6 + $0x30] sm:$0xff] %v169_v24  ;;  %v170_v34 = vmax.f32 %v154_v25, 0.0  ;;  %v120_v36 = vmul.f32 %v258_v5, %v97_v22 }
  0x14   :  { %v80_v35 = vadd.f32 %v249_v2, %v57_v26  ;;  %v59_v37 = vmul.f32 %v244_v1, %v36_v23  ;;  %v155_v38 = vadd.f32 %v264_v7, %v132_v28  ;;  %v134_v40 = vadd.f32 %v118_v21, %v79_v30 }
  0x15   :  { %v156_v39 = vadd.f32 %v264_v7, %v133_v29  ;;  %v81_v41 = vadd.f32 %v249_v2, %v58_v31  ;;  %186 = vst [vmem:[%s472_s6 + $0x38] sm:$0xff] %v170_v34  ;;  %v121_v45 = vmul.f32 %v258_v5, %v98_v32  ;;  %v60_v46 = vmul.f32 %v244_v1, %v37_v33 }
  0x16   :  { %v135_v43 = vadd.f32 %v119_v27, %v80_v35  ;;  %v82_v44 = vadd.f32 %v249_v2, %v59_v37  ;;  %v171_v49 = vmax.f32 %v155_v38, 0.0  ;;  %v157_v51 = vadd.f32 %v264_v7, %v134_v40 }
  0x17   :  { %v172_v50 = vmax.f32 %v156_v39, 0.0  ;;  %v136_v52 = vadd.f32 %v120_v36, %v81_v41  ;;  %v83_v55 = vadd.f32 %v249_v2, %v60_v46  ;;  %v122_v56 = vmul.f32 %v258_v5, %v99_v42 }
  0x18   :  { %v158_v53 = vadd.f32 %v264_v7, %v135_v43  ;;  %v137_v54 = vadd.f32 %v121_v45, %v82_v44  ;;  %187 = vst [vmem:[%s472_s6 + $0x40] sm:$0xff] %v171_v49  ;;  %v173_v57 = vmax.f32 %v157_v51, 0.0  ;;  %v61_v59 = vmul.f32 %v244_v1, %v38_v47 }
  0x19   :  { %188 = vst [vmem:[%s472_s6 + $0x48] sm:$0xff] %v172_v50  ;;  %v159_v58 = vadd.f32 %v264_v7, %v136_v52  ;;  %v123_v60 = vmul.f32 %v258_v5, %v100_v48  ;;  %v138_v63 = vadd.f32 %v122_v56, %v83_v55 }
  0x1a   :  { %v174_v61 = vmax.f32 %v158_v53, 0.0  ;;  %v160_v62 = vadd.f32 %v264_v7, %v137_v54  ;;  %189 = vst [vmem:[%s472_s6 + $0x50] sm:$0xff] %v173_v57  ;;  %v84_v3 = vadd.f32 %v249_v2, %v61_v59 }
  0x1b   :  { %v175_v0 = vmax.f32 %v159_v58, 0.0  ;;  %v161_v1 = vadd.f32 %v264_v7, %v138_v63 }
  0x1c   :  { %190 = vst [vmem:[%s472_s6 + $0x58] sm:$0xff] %v174_v61  ;;  %v176_v4 = vmax.f32 %v160_v62, 0.0  ;;  %v139_v5 = vadd.f32 %v123_v60, %v84_v3 }
  0x1d   :  { %191 = vst [vmem:[%s472_s6 + $0x60] sm:$0xff] %v175_v0  ;;  %v177_v6 = vmax.f32 %v161_v1, 0.0 }
  0x1e   :  { %192 = vst [vmem:[%s472_s6 + $0x68] sm:$0xff] %v176_v4  ;;  %v162_v8 = vadd.f32 %v264_v7, %v139_v5 }
  0x1f   :  { %193 = vst [vmem:[%s472_s6 + $0x70] sm:$0xff] %v177_v6 }
  0x20   :  { %v178_v2 = vmax.f32 %v162_v8, 0.0 }
  0x22   :  { %194 = vst [vmem:[%s472_s6 + $0x78] sm:$0xff] %v178_v2 }

// kernel: _lambda_.61
= control target key start
LH: loop header
LB: loop body
LE: loop exit
PB: predicated region body
PF: predicated region fallthrough
CT: control target
= control target key end

     0   :  { %vm169_vm0 = vcmask 1040384   ;;  %s295_s1 = inlined_call_operand.vmem [shape: bf16[128,128], index: 1, kind: input, shape index: {}]   ;;  %s296_s0 = inlined_call_operand.vmem [shape: bf16[32,128], index: 0, kind: input, shape index: {}]   ;;  %s297_s2 = inlined_call_operand.vmem [shape: f32[32,128], index: 2, kind: output, shape index: {0}]   ;;  %s298_s3 = inlined_call_operand.vmem [shape: f32[1,2,128], index: 3, kind: output, shape index: {1}]  }
   0x1   :  { %v220_v0 = vld [vmem:[%s295_s1 + $0x38] sm:$0xff]   ;;  %v221_v1 = vld [vmem:[%s295_s1 + $0x30] sm:$0xff]   ;;  %v222_v2 = vld [vmem:[%s295_s1 + $0x28] sm:$0xff]  }
   0x2   :  { %200 = vmatprep.subr.bf16.mxu0 %v220_v0  ;;  %v223_v3 = vld [vmem:[%s295_s1 + $0x20] sm:$0xff]   ;;  %v224_v5 = vld [vmem:[%s295_s1 + $0x18] sm:$0xff]   ;;  %v225_v6 = vld [vmem:[%s295_s1 + $0x10] sm:$0xff]  }
   0x3   :  { %201 = vmatpush3.bf16.msra.mxu0 %v220_v0  ;;  %v228_v4 = vld [vmem:[%s296_s0] sm:$0xff]   ;;  %v226_v7 = vld [vmem:[%s295_s1 + $0x8] sm:$0xff]  }
   0x4   :  { %202 = vmatprep.subr.bf16.mxu0 %v221_v1  ;;  %216 = vmatprep.mubr.bf16.mxu0 %v228_v4  ;;  %v227_v8 = vld [vmem:[%s295_s1] sm:$0xff]   ;;  %v229_v9 = vld [vmem:[%s296_s0 + $0x8] sm:$0xff]  }
   0x7   :  { %203 = vmatpush3.bf16.msra.mxu0 %v221_v1 }
   0x8   :  { %204 = vmatprep.subr.bf16.mxu0 %v222_v2 }
   0xb   :  { %205 = vmatpush3.bf16.msra.mxu0 %v222_v2 }
   0xc   :  { %206 = vmatprep.subr.bf16.mxu0 %v223_v3 }
   0xf   :  { %207 = vmatpush3.bf16.msra.mxu0 %v223_v3 }
  0x10   :  { %208 = vmatprep.subr.bf16.mxu0 %v224_v5 }
  0x13   :  { %209 = vmatpush3.bf16.msra.mxu0 %v224_v5 }
  0x14   :  { %210 = vmatprep.subr.bf16.mxu0 %v225_v6 }
  0x17   :  { %211 = vmatpush3.bf16.msra.mxu0 %v225_v6 }
  0x18   :  { %212 = vmatprep.subr.bf16.mxu0 %v226_v7 }
  0x1b   :  { %213 = vmatpush3.bf16.msra.mxu0 %v226_v7 }
  0x1c   :  { %214 = vmatprep.subr.bf16.mxu0 %v227_v8 }
  0x1f   :  { %215 = vmatpush3.bf16.msra.mxu0 %v227_v8 }
  0x22   :  { %217 = vmatmul.mubr.bf16.vlgmr.msra.gmra.mxu0 %v229_v9 }
  0xe2   :  { %v218_v10 = vpop.f32.mrf.mxu0 }
  0xe3   :  { %145 = vst [vmem:[%s297_s2 + $0x10] sm:$0xff] %v218_v10  ;;  %v158_v17 = vmul.f32 %v218_v10, %v218_v10 }
  0xe4   :  { %v128_v11 = vpop.f32.mrf.mxu0 }
  0xe5   :  { %143 = vst [vmem:[%s297_s2] sm:$0xff] %v128_v11  ;;  %v156_v14 = vmul.f32 %v128_v11, %v128_v11 }
  0xe6   :  { %v219_v12 = vpop.f32.mrf.mxu0 }
  0xe7   :  { %146 = vst [vmem:[%s297_s2 + $0x18] sm:$0xff] %v219_v12  ;;  %v159_v20 = vmul.f32 %v219_v12, %v219_v12 }
  0xe8   :  { %v131_v13 = vpop.f32.mrf.mxu0 }
  0xe9   :  { %144 = vst [vmem:[%s297_s2 + $0x8] sm:$0xff] %v131_v13  ;;  %v147_v15 = vadd.f32 %v131_v13, %v128_v11  ;;  %v157_v16 = vmul.f32 %v131_v13, %v131_v13 }
  0xeb   :  { %v148_v18 = vadd.f32 %v218_v10, %v147_v15  ;;  %v160_v19 = vadd.f32 %v157_v16, %v156_v14 }
  0xed   :  { %v149_v21 = vadd.f32 %v219_v12, %v148_v18  ;;  %v161_v22 = vadd.f32 %v160_v19, %v158_v17 }
  0xef   :  { %v150_v23 = vrot.slane %v149_v21, 4  ;;  %v162_v24 = vadd.f32 %v161_v22, %v159_v20 }
  0xf1   :  { %v151_v25 = vadd.f32 %v150_v23, %v149_v21  ;;  %v163_v26 = vrot.slane %v162_v24, 4 }
  0xf3   :  { %v152_v27 = vrot.slane %v151_v25, 2  ;;  %v164_v28 = vadd.f32 %v163_v26, %v162_v24 }
  0xf5   :  { %v153_v29 = vadd.f32 %v152_v27, %v151_v25  ;;  %v165_v30 = vrot.slane %v164_v28, 2 }
  0xf7   :  { %v154_v31 = vrot.slane %v153_v29, 1  ;;  %v166_v32 = vadd.f32 %v165_v30, %v164_v28 }
  0xf9   :  { %v167_v33 = vrot.slane %v166_v32, 1  ;;  %v155_v34 = vadd.f32 %v154_v31, %v153_v29 }
  0xfb   :  { %v168_v35 = vadd.f32 %v167_v33, %v166_v32 }
  0xfd   :  { %v170_v36 = vsel %vm169_vm0, %v155_v34, %v168_v35 }
  0xfe   :  { %171 = vst [vmem:[%s298_s3] sm:$0x3] %v170_v36 }

// kernel: _lambda_.41
= control target key start
LH: loop header
LB: loop body
LE: loop exit
PB: predicated region body
PF: predicated region fallthrough
CT: control target
= control target key end

     0   :  { %vm1597_vm0 = vcmask 1040384   ;;  %s2871_s1 = inlined_call_operand.vmem [shape: bf16[1152,128], index: 1, kind: input, shape index: {}]   ;;  %s2872_s0 = inlined_call_operand.vmem [shape: bf16[128,1152], index: 0, kind: input, shape index: {}]   ;;  %s2873_s2 = inlined_call_operand.vmem [shape: f32[128,128], index: 2, kind: output, shape index: {0}]   ;;  %s2874_s3 = inlined_call_operand.vmem [shape: f32[1,2,128], index: 3, kind: output, shape index: {1}]  }
   0x1   :  { %v2072_v0 = vld [vmem:[%s2871_s1 + $0x78] sm:$0xff]   ;;  %v2076_v4 = vld [vmem:[%s2871_s1 + $0x70] sm:$0xff]   ;;  %v2080_v8 = vld [vmem:[%s2871_s1 + $0x68] sm:$0xff]  }
   0x2   :  { %v2073_v1 = vld [vmem:[%s2871_s1 + $0xf8] sm:$0xff]   ;;  %1752 = vmatprep.subr.bf16.mxu0 %v2072_v0  ;;  %v2077_v5 = vld [vmem:[%s2871_s1 + $0xf0] sm:$0xff]   ;;  %v2081_v9 = vld [vmem:[%s2871_s1 + $0xe8] sm:$0xff]  }
   0x3   :  { %v2074_v2 = vld [vmem:[%s2871_s1 + $0x38] sm:$0xff]   ;;  %1816 = vmatprep.subr.bf16.mxu1 %v2073_v1  ;;  %v2078_v6 = vld [vmem:[%s2871_s1 + $0x30] sm:$0xff]   ;;  %v2082_v10 = vld [vmem:[%s2871_s1 + $0x28] sm:$0xff]  }
   0x4   :  { %v2075_v3 = vld [vmem:[%s2871_s1 + $0xb8] sm:$0xff]   ;;  %1753 = vmatpush3.bf16.msra.mxu0 %v2074_v2  ;;  %v2079_v7 = vld [vmem:[%s2871_s1 + $0xb0] sm:$0xff]   ;;  %v2083_v11 = vld [vmem:[%s2871_s1 + $0xa8] sm:$0xff]  }
   0x5   :  { %1817 = vmatpush3.bf16.msra.mxu1 %v2075_v3  ;;  %1754 = vmatprep.subr.bf16.mxu0 %v2076_v4  ;;  %v2084_v12 = vld [vmem:[%s2871_s1 + $0x60] sm:$0xff]   ;;  %v2088_v16 = vld [vmem:[%s2871_s1 + $0x58] sm:$0xff]   ;;  %v2092_v20 = vld [vmem:[%s2871_s1 + $0x50] sm:$0xff]  }
   0x6   :  { %1818 = vmatprep.subr.bf16.mxu1 %v2077_v5  ;;  %v2085_v13 = vld [vmem:[%s2871_s1 + $0xe0] sm:$0xff]   ;;  %v2089_v17 = vld [vmem:[%s2871_s1 + $0xd8] sm:$0xff]   ;;  %v2093_v21 = vld [vmem:[%s2871_s1 + $0xd0] sm:$0xff]  }
   0x7   :  { %v2086_v14 = vld [vmem:[%s2871_s1 + $0x20] sm:$0xff]   ;;  %v2090_v18 = vld [vmem:[%s2871_s1 + $0x18] sm:$0xff]   ;;  %v2094_v22 = vld [vmem:[%s2871_s1 + $0x10] sm:$0xff]  }
   0x8   :  { %1755 = vmatpush3.bf16.msra.mxu0 %v2078_v6  ;;  %v2087_v15 = vld [vmem:[%s2871_s1 + $0xa0] sm:$0xff]   ;;  %v2091_v19 = vld [vmem:[%s2871_s1 + $0x98] sm:$0xff]   ;;  %v2095_v23 = vld [vmem:[%s2871_s1 + $0x90] sm:$0xff]  }
   0x9   :  { %1819 = vmatpush3.bf16.msra.mxu1 %v2079_v7  ;;  %1756 = vmatprep.subr.bf16.mxu0 %v2080_v8  ;;  %v2096_v24 = vld [vmem:[%s2871_s1 + $0x48] sm:$0xff]   ;;  %v2100_v28 = vld [vmem:[%s2871_s1 + $0x40] sm:$0xff]   ;;  %v2110_v36 = vld [vmem:[%s2871_s1 + $0x178] sm:$0xff]  }
   0xa   :  { %1820 = vmatprep.subr.bf16.mxu1 %v2081_v9  ;;  %v2097_v25 = vld [vmem:[%s2871_s1 + $0xc8] sm:$0xff]   ;;  %v2101_v29 = vld [vmem:[%s2871_s1 + $0xc0] sm:$0xff]   ;;  %v2111_v37 = vld [vmem:[%s2871_s1 + $0x138] sm:$0xff]  }
   0xb   :  { %v2098_v26 = vld [vmem:[%s2871_s1 + $0x8] sm:$0xff]   ;;  %v2102_v30 = vld [vmem:[%s2871_s1] sm:$0xff]   ;;  %v2114_v39 = vld [vmem:[%s2872_s0 + $0x54] ss:$36 sps:$4 sm:$0xff]  }
   0xc   :  { %1757 = vmatpush3.bf16.msra.mxu0 %v2082_v10  ;;  %v2099_v27 = vld [vmem:[%s2871_s1 + $0x88] sm:$0xff]   ;;  %v2103_v31 = vld [vmem:[%s2871_s1 + $0x80] sm:$0xff]   ;;  %v2117_v41 = vld [vmem:[%s2872_s0 + $0x50] ss:$36 sps:$4 sm:$0xff]  }
   0xd   :  { %1821 = vmatpush3.bf16.msra.mxu1 %v2083_v11  ;;  %1758 = vmatprep.subr.bf16.mxu0 %v2084_v12  ;;  %v2104_v32 = vld [vmem:[%s2872_s0] ss:$36 sps:$4 sm:$0xff]   ;;  %v2107_v34 = vld [vmem:[%s2872_s0 + $0x8] ss:$36 sps:$4 sm:$0xff]   ;;  %v2118_v42 = vld [vmem:[%s2871_s1 + $0x170] sm:$0xff]  }
   0xe   :  { %1822 = vmatprep.subr.bf16.mxu1 %v2085_v13  ;;  %v2106_v33 = vld [vmem:[%s2872_s0 + $0x4] ss:$36 sps:$4 sm:$0xff]   ;;  %v2109_v35 = vld [vmem:[%s2872_s0 + $0xc] ss:$36 sps:$4 sm:$0xff]   ;;  %v2120_v44 = vld [vmem:[%s2872_s0 + $0x94] ss:$36 sps:$4 sm:$0xff]  }
   0xf   :  { %1070 = vmatprep.mubr.bf16.mxu0 %v2106_v33  ;;  %1167 = vmatprep.mubr.bf16.mxu1 %v2109_v35  ;;  %v2112_v38 = vld [vmem:[%s2872_s0 + $0x4c] ss:$36 sps:$4 sm:$0xff]   ;;  %v2122_v45 = vld [vmem:[%s2872_s0 + $0x9c] ss:$36 sps:$4 sm:$0xff]   ;;  %v2132_v53 = vld [vmem:[%s2872_s0 + $0xe4] ss:$36 sps:$4 sm:$0xff]  }
  0x10   :  { %1759 = vmatpush3.bf16.msra.mxu0 %v2086_v14  ;;  %v2116_v40 = vld [vmem:[%s2872_s0 + $0x48] ss:$36 sps:$4 sm:$0xff]   ;;  %v2119_v43 = vld [vmem:[%s2871_s1 + $0x130] sm:$0xff]   ;;  %v2127_v47 = vld [vmem:[%s2871_s1 + $0x1f8] sm:$0xff]  }
  0x11   :  { %1823 = vmatpush3.bf16.msra.mxu1 %v2087_v15  ;;  %1760 = vmatprep.subr.bf16.mxu0 %v2088_v16  ;;  %v2126_v46 = vld [vmem:[%s2871_s1 + $0x168] sm:$0xff]   ;;  %v2124_v48 = vld [vmem:[%s2872_s0 + $0x90] ss:$36 sps:$4 sm:$0xff]   ;;  %v2129_v50 = vld [vmem:[%s2871_s1 + $0x1b8] sm:$0xff]  }
  0x12   :  { %1824 = vmatprep.subr.bf16.mxu1 %v2089_v17  ;;  %v2128_v49 = vld [vmem:[%s2871_s1 + $0x128] sm:$0xff]   ;;  %v2125_v51 = vld [vmem:[%s2872_s0 + $0x98] ss:$36 sps:$4 sm:$0xff]   ;;  %v2136_v54 = vld [vmem:[%s2871_s1 + $0x160] sm:$0xff]  }
  0x13   :  { %v2130_v52 = vld [vmem:[%s2872_s0 + $0xdc] ss:$36 sps:$4 sm:$0xff]   ;;  %v2137_v55 = vld [vmem:[%s2871_s1 + $0x1f0] sm:$0xff]   ;;  %v2140_v60 = vld [vmem:[%s2872_s0 + $0x124] ss:$36 sps:$4 sm:$0xff]  }
  0x14   :  { %1761 = vmatpush3.bf16.msra.mxu0 %v2090_v18  ;;  %v2138_v56 = vld [vmem:[%s2871_s1 + $0x120] sm:$0xff]   ;;  %v2139_v57 = vld [vmem:[%s2871_s1 + $0x1b0] sm:$0xff]   ;;  %v2134_v58 = vld [vmem:[%s2872_s0 + $0xd8] ss:$36 sps:$4 sm:$0xff]  }
  0x15   :  { %1825 = vmatpush3.bf16.msra.mxu1 %v2091_v19  ;;  %1762 = vmatprep.subr.bf16.mxu0 %v2092_v20  ;;  %v2135_v59 = vld [vmem:[%s2872_s0 + $0xe0] ss:$36 sps:$4 sm:$0xff]   ;;  %v2142_v61 = vld [vmem:[%s2872_s0 + $0x12c] ss:$36 sps:$4 sm:$0xff]   ;;  %v2146_v62 = vld [vmem:[%s2871_s1 + $0x158] sm:$0xff]  }
  0x16   :  { %1826 = vmatprep.subr.bf16.mxu1 %v2093_v21  ;;  %v2147_v63 = vld [vmem:[%s2871_s1 + $0x1e8] sm:$0xff]   ;;  %v2148_v0 = vld [vmem:[%s2871_s1 + $0x118] sm:$0xff]   ;;  %v2144_v2 = vld [vmem:[%s2872_s0 + $0x120] ss:$36 sps:$4 sm:$0xff]  }
  0x17   :  { %v2149_v1 = vld [vmem:[%s2871_s1 + $0x1a8] sm:$0xff]   ;;  %v2152_v5 = vld [vmem:[%s2872_s0 + $0x174] ss:$36 sps:$4 sm:$0xff]   ;;  %v2157_v7 = vld [vmem:[%s2871_s1 + $0x1e0] sm:$0xff]  }
  0x18   :  { %1763 = vmatpush3.bf16.msra.mxu0 %v2094_v22  ;;  %v2145_v3 = vld [vmem:[%s2872_s0 + $0x128] ss:$36 sps:$4 sm:$0xff]   ;;  %v2156_v6 = vld [vmem:[%s2871_s1 + $0x150] sm:$0xff]   ;;  %v2159_v9 = vld [vmem:[%s2871_s1 + $0x1a0] sm:$0xff]  }
  0x19   :  { %1827 = vmatpush3.bf16.msra.mxu1 %v2095_v23  ;;  %1764 = vmatprep.subr.bf16.mxu0 %v2096_v24  ;;  %v2150_v4 = vld [vmem:[%s2872_s0 + $0x16c] ss:$36 sps:$4 sm:$0xff]   ;;  %v2160_v12 = vld [vmem:[%s2872_s0 + $0x1b4] ss:$36 sps:$4 sm:$0xff]   ;;  %v2162_v14 = vld [vmem:[%s2872_s0 + $0x1bc] ss:$36 sps:$4 sm:$0xff]  }
  0x1a   :  { %1828 = vmatprep.subr.bf16.mxu1 %v2097_v25  ;;  %v2158_v8 = vld [vmem:[%s2871_s1 + $0x110] sm:$0xff]   ;;  %v2154_v10 = vld [vmem:[%s2872_s0 + $0x168] ss:$36 sps:$4 sm:$0xff]   ;;  %v2167_v15 = vld [vmem:[%s2871_s1 + $0x1d8] sm:$0xff]  }
  0x1b   :  { %v2155_v11 = vld [vmem:[%s2872_s0 + $0x170] ss:$36 sps:$4 sm:$0xff]   ;;  %v2166_v13 = vld [vmem:[%s2871_s1 + $0x148] sm:$0xff]   ;;  %v2169_v17 = vld [vmem:[%s2871_s1 + $0x198] sm:$0xff]  }
  0x1c   :  { %1765 = vmatpush3.bf16.msra.mxu0 %v2098_v26  ;;  %v2168_v16 = vld [vmem:[%s2871_s1 + $0x108] sm:$0xff]   ;;  %v2170_v18 = vld [vmem:[%s2871_s1 + $0x1d0] sm:$0xff]   ;;  %v2165_v21 = vld [vmem:[%s2872_s0 + $0x1b8] ss:$36 sps:$4 sm:$0xff]  }
  0x1d   :  { %1829 = vmatpush3.bf16.msra.mxu1 %v2099_v27  ;;  %1766 = vmatprep.subr.bf16.mxu0 %v2100_v28  ;;  %v2171_v19 = vld [vmem:[%s2871_s1 + $0x190] sm:$0xff]   ;;  %v2172_v22 = vld [vmem:[%s2872_s0 + $0x1fc] ss:$36 sps:$4 sm:$0xff]   ;;  %v2174_v23 = vld [vmem:[%s2872_s0 + $0x204] ss:$36 sps:$4 sm:$0xff]  }
  0x1e   :  { %1830 = vmatprep.subr.bf16.mxu1 %v2101_v29  ;;  %v2164_v20 = vld [vmem:[%s2872_s0 + $0x1b0] ss:$36 sps:$4 sm:$0xff]   ;;  %v2178_v24 = vld [vmem:[%s2871_s1 + $0x140] sm:$0xff]   ;;  %v2179_v25 = vld [vmem:[%s2871_s1 + $0x1c8] sm:$0xff]  }
  0x1f   :  { %v2180_v26 = vld [vmem:[%s2871_s1 + $0x100] sm:$0xff]   ;;  %v2181_v27 = vld [vmem:[%s2871_s1 + $0x188] sm:$0xff]   ;;  %v2176_v29 = vld [vmem:[%s2872_s0 + $0x1f8] ss:$36 sps:$4 sm:$0xff]  }
  0x20   :  { %1767 = vmatpush3.bf16.msra.mxu0 %v2102_v30  ;;  %v2182_v28 = vld [vmem:[%s2871_s1 + $0x1c0] sm:$0xff]   ;;  %v2186_v33 = vld [vmem:[%s2872_s0 + $0x14] ss:$36 sps:$4 sm:$0xff]  }
  0x21   :  { %1831 = vmatpush3.bf16.msra.mxu1 %v2103_v31  ;;  %1880 = vmatprep.subr.bf16.mxu0 %v2110_v36  ;;  %v2177_v30 = vld [vmem:[%s2872_s0 + $0x200] ss:$36 sps:$4 sm:$0xff]   ;;  %v2184_v35 = vld [vmem:[%s2872_s0 + $0x10] ss:$36 sps:$4 sm:$0xff]   ;;  %v2187_v36 = vld [vmem:[%s2872_s0 + $0x18] ss:$36 sps:$4 sm:$0xff]  }
  0x22   :  { %1944 = vmatprep.subr.bf16.mxu1 %v2127_v47  ;;  %v2183_v31 = vld [vmem:[%s2871_s1 + $0x180] sm:$0xff]  }
  0x23   :  { %1071 = vmatmul.mubr.bf16.vlgmr.msra.gmra.mxu0 %v2104_v32  ;;  %v2190_v32 = vld [vmem:[%s2871_s1 + $0x238] sm:$0xff]   ;;  %v2202_v47 = vld [vmem:[%s2872_s0 + $0xa0] ss:$36 sps:$4 sm:$0xff]  }
  0x24   :  { %1168 = vmatmul.mubr.bf16.vlgmr.msra.gmra.mxu1 %v2107_v34  ;;  %1881 = vmatpush3.bf16.msra.mxu0 %v2111_v37  ;;  %v2189_v34 = vld [vmem:[%s2872_s0 + $0x1c] ss:$36 sps:$4 sm:$0xff]  }
  0x25   :  { %1078 = vmatprep.mubr.bf16.mxu0 %v2112_v38  ;;  %1175 = vmatprep.mubr.bf16.mxu1 %v2114_v39  ;;  %v2191_v37 = vld [vmem:[%s2872_s0 + $0x5c] ss:$36 sps:$4 sm:$0xff]   ;;  %v2193_v38 = vld [vmem:[%s2872_s0 + $0x64] ss:$36 sps:$4 sm:$0xff]   ;;  %v2197_v39 = vld [vmem:[%s2871_s1 + $0x230] sm:$0xff]  }
  0x26   :  { %1882 = vmatprep.subr.bf16.mxu0 %v2118_v42  ;;  %1945 = vmatpush3.bf16.msra.mxu1 %v2129_v50  ;;  %v2196_v42 = vld [vmem:[%s2872_s0 + $0x60] ss:$36 sps:$4 sm:$0xff]   ;;  %v2207_v50 = vld [vmem:[%s2872_s0 + $0xf4] ss:$36 sps:$4 sm:$0xff]  }
  0x27   :  { %1946 = vmatprep.subr.bf16.mxu1 %v2137_v55  ;;  %v2212_v55 = vld [vmem:[%s2872_s0 + $0x134] ss:$36 sps:$4 sm:$0xff]  }
  0x28   :  { %1883 = vmatpush3.bf16.msra.mxu0 %v2119_v43  ;;  %v2198_v43 = vld [vmem:[%s2872_s0 + $0xa4] ss:$36 sps:$4 sm:$0xff]  }
  0x29   :  { %1884 = vmatprep.subr.bf16.mxu0 %v2126_v46  ;;  %v2218_v46 = vld [vmem:[%s2871_s1 + $0x218] sm:$0xff]  }
  0x2a   :  { %1947 = vmatpush3.bf16.msra.mxu1 %v2139_v57  ;;  %v2239_v57 = vld [vmem:[%s2871_s1 + $0x200] sm:$0xff]  }
  0x2b   :  { %1079 = vmatmul.mubr.bf16.gmra.mxu0 %v2116_v40  ;;  %1948 = vmatprep.subr.bf16.mxu1 %v2147_v63  ;;  %v2204_v40 = vld [vmem:[%s2871_s1 + $0x228] sm:$0xff]   ;;  %v2224_v63 = vld [vmem:[%s2872_s0 + $0x180] ss:$36 sps:$4 sm:$0xff]  }
  0x2c   :  { %1176 = vmatmul.mubr.bf16.gmra.mxu1 %v2117_v41  ;;  %1086 = vmatprep.mubr.bf16.mxu0 %v2120_v44  ;;  %v2195_v41 = vld [vmem:[%s2872_s0 + $0x58] ss:$36 sps:$4 sm:$0xff]   ;;  %v2200_v44 = vld [vmem:[%s2872_s0 + $0xac] ss:$36 sps:$4 sm:$0xff]  }
  0x2d   :  { %1183 = vmatprep.mubr.bf16.mxu1 %v2122_v45  ;;  %1885 = vmatpush3.bf16.msra.mxu0 %v2128_v49  ;;  %v2211_v45 = vld [vmem:[%s2871_s1 + $0x220] sm:$0xff]   ;;  %v2205_v49 = vld [vmem:[%s2872_s0 + $0xec] ss:$36 sps:$4 sm:$0xff]  }
  0x2e   :  { %1886 = vmatprep.subr.bf16.mxu0 %v2136_v54  ;;  %1949 = vmatpush3.bf16.msra.mxu1 %v2149_v1  ;;  %v2210_v54 = vld [vmem:[%s2872_s0 + $0xf0] ss:$36 sps:$4 sm:$0xff]  }
  0x2f   :  { %1950 = vmatprep.subr.bf16.mxu1 %v2157_v7  ;;  %v2228_v1 = vld [vmem:[%s2872_s0 + $0x1cc] ss:$36 sps:$4 sm:$0xff]  }
  0x30   :  { %v2238_v7 = vld [vmem:[%s2872_s0 + $0x210] ss:$36 sps:$4 sm:$0xff]  }
  0x31   :  { %1887 = vmatpush3.bf16.msra.mxu0 %v2138_v56  ;;  %v2214_v56 = vld [vmem:[%s2872_s0 + $0x13c] ss:$36 sps:$4 sm:$0xff]  }
  0x32   :  { %1888 = vmatprep.subr.bf16.mxu0 %v2146_v62  ;;  %1951 = vmatpush3.bf16.msra.mxu1 %v2159_v9  ;;  %v2223_v62 = vld [vmem:[%s2872_s0 + $0x178] ss:$36 sps:$4 sm:$0xff]   ;;  %v2241_v9 = vld [vmem:[%s2872_s0 + $0x140] ss:$36 sps:$4 sm:$0xff]  }
  0x33   :  { %1087 = vmatmul.mubr.bf16.gmra.mxu0 %v2124_v48  ;;  %1952 = vmatprep.subr.bf16.mxu1 %v2167_v15  ;;  %v2203_v48 = vld [vmem:[%s2872_s0 + $0xa8] ss:$36 sps:$4 sm:$0xff]   ;;  %v2247_v15 = vld [vmem:[%s2872_s0 + $0x218] ss:$36 sps:$4 sm:$0xff]  }
  0x34   :  { %1184 = vmatmul.mubr.bf16.gmra.mxu1 %v2125_v51  ;;  %1094 = vmatprep.mubr.bf16.mxu0 %v2130_v52  ;;  %v2225_v51 = vld [vmem:[%s2871_s1 + $0x210] sm:$0xff]   ;;  %v2209_v52 = vld [vmem:[%s2872_s0 + $0xe8] ss:$36 sps:$4 sm:$0xff]  }
  0x35   :  { %1191 = vmatprep.mubr.bf16.mxu1 %v2132_v53  ;;  %1889 = vmatpush3.bf16.msra.mxu0 %v2148_v0  ;;  %v2232_v53 = vld [vmem:[%s2871_s1 + $0x208] sm:$0xff]  }
  0x36   :  { %1890 = vmatprep.subr.bf16.mxu0 %v2156_v6  ;;  %1953 = vmatpush3.bf16.msra.mxu1 %v2169_v17  ;;  %v2226_v0 = vld [vmem:[%s2872_s0 + $0x1c4] ss:$36 sps:$4 sm:$0xff]  }
  0x37   :  { %1954 = vmatprep.subr.bf16.mxu1 %v2170_v18  ;;  %v2237_v6 = vld [vmem:[%s2872_s0 + $0x208] ss:$36 sps:$4 sm:$0xff]  }
  0x39   :  { %1891 = vmatpush3.bf16.msra.mxu0 %v2158_v8  ;;  %v2240_v8 = vld [vmem:[%s2872_s0 + $0x20] ss:$36 sps:$4 sm:$0xff]  }
  0x3a   :  { %1892 = vmatprep.subr.bf16.mxu0 %v2166_v13  ;;  %1955 = vmatpush3.bf16.msra.mxu1 %v2171_v19  ;;  %v2245_v13 = vld [vmem:[%s2872_s0 + $0x1d0] ss:$36 sps:$4 sm:$0xff]  }
  0x3b   :  { %1095 = vmatmul.mubr.bf16.gmra.mxu0 %v2134_v58  ;;  %1956 = vmatprep.subr.bf16.mxu1 %v2179_v25  ;;  %v2216_v58 = vld [vmem:[%s2872_s0 + $0x130] ss:$36 sps:$4 sm:$0xff]  }
  0x3c   :  { %1192 = vmatmul.mubr.bf16.gmra.mxu1 %v2135_v59  ;;  %1102 = vmatprep.mubr.bf16.mxu0 %v2140_v60  ;;  %v2217_v59 = vld [vmem:[%s2872_s0 + $0x138] ss:$36 sps:$4 sm:$0xff]  }
  0x3d   :  { %1199 = vmatprep.mubr.bf16.mxu1 %v2142_v61  ;;  %1893 = vmatpush3.bf16.msra.mxu0 %v2168_v16  ;;  %v2219_v60 = vld [vmem:[%s2872_s0 + $0x17c] ss:$36 sps:$4 sm:$0xff]   ;;  %v2221_v61 = vld [vmem:[%s2872_s0 + $0x184] ss:$36 sps:$4 sm:$0xff]  }
  0x3e   :  { %1894 = vmatprep.subr.bf16.mxu0 %v2178_v24  ;;  %1957 = vmatpush3.bf16.msra.mxu1 %v2181_v27 }
  0x3f   :  { %1958 = vmatprep.subr.bf16.mxu1 %v2182_v28 }
  0x41   :  { %1895 = vmatpush3.bf16.msra.mxu0 %v2180_v26 }
  0x42   :  { %2024 = vmatprep.subr.bf16.mxu0 %v2190_v32  ;;  %1959 = vmatpush3.bf16.msra.mxu1 %v2183_v31 }
  0x43   :  { %1103 = vmatmul.mubr.bf16.gmra.mxu0 %v2144_v2  ;;  %2056 = vmatprep.subr.bf16.mxu1 %v2190_v32  ;;  %v2230_v2 = vld [vmem:[%s2872_s0 + $0x1c0] ss:$36 sps:$4 sm:$0xff]  }
  0x44   :  { %1200 = vmatmul.mubr.bf16.gmra.mxu1 %v2145_v3  ;;  %1110 = vmatprep.mubr.bf16.mxu0 %v2150_v4  ;;  %v2231_v3 = vld [vmem:[%s2872_s0 + $0x1c8] ss:$36 sps:$4 sm:$0xff]  }
  0x45   :  { %1207 = vmatprep.mubr.bf16.mxu1 %v2152_v5  ;;  %v2233_v4 = vld [vmem:[%s2872_s0 + $0x20c] ss:$36 sps:$4 sm:$0xff]   ;;  %v2235_v5 = vld [vmem:[%s2872_s0 + $0x214] ss:$36 sps:$4 sm:$0xff]  }
  0x4b   :  { %1111 = vmatmul.mubr.bf16.gmra.mxu0 %v2154_v10  ;;  %v2242_v10 = vld [vmem:[%s2872_s0 + $0x68] ss:$36 sps:$4 sm:$0xff]  }
  0x4c   :  { %1208 = vmatmul.mubr.bf16.gmra.mxu1 %v2155_v11  ;;  %1118 = vmatprep.mubr.bf16.mxu0 %v2160_v12  ;;  %v2243_v11 = vld [vmem:[%s2872_s0 + $0x188] ss:$36 sps:$4 sm:$0xff]   ;;  %v2244_v12 = vld [vmem:[%s2872_s0 + $0xb0] ss:$36 sps:$4 sm:$0xff]  }
  0x4d   :  { %1215 = vmatprep.mubr.bf16.mxu1 %v2162_v14  ;;  %v2246_v14 = vld [vmem:[%s2872_s0 + $0xf8] ss:$36 sps:$4 sm:$0xff]  }
  0x53   :  { %1119 = vmatmul.mubr.bf16.gmra.mxu0 %v2164_v20 }
  0x54   :  { %1216 = vmatmul.mubr.bf16.gmra.mxu1 %v2165_v21  ;;  %1126 = vmatprep.mubr.bf16.mxu0 %v2172_v22 }
  0x55   :  { %1223 = vmatprep.mubr.bf16.mxu1 %v2174_v23 }
  0x5b   :  { %1127 = vmatmul.mubr.bf16.gmra.mxu0 %v2176_v29 }
  0x5c   :  { %1224 = vmatmul.mubr.bf16.gmra.mxu1 %v2177_v30  ;;  %1264 = vmatprep.mubr.bf16.mxu0 %v2186_v33 }
  0x5d   :  { %1361 = vmatprep.mubr.bf16.mxu1 %v2189_v34 }
  0x63   :  { %1265 = vmatmul.mubr.bf16.vlgmr.msra.gmra.mxu0 %v2184_v35 }
  0x64   :  { %1362 = vmatmul.mubr.bf16.vlgmr.msra.gmra.mxu1 %v2187_v36  ;;  %2025 = vmatpush3.bf16.msra.mxu0 %v2190_v32 }
  0x65   :  { %1272 = vmatprep.mubr.bf16.mxu0 %v2191_v37  ;;  %1369 = vmatprep.mubr.bf16.mxu1 %v2193_v38 }
  0x66   :  { %2026 = vmatprep.subr.bf16.mxu0 %v2197_v39  ;;  %2064 = vmatpush3.bf16.msra.mxu1 %v2190_v32 }
  0x67   :  { %2057 = vmatprep.subr.bf16.mxu1 %v2197_v39 }
  0x68   :  { %2027 = vmatpush3.bf16.msra.mxu0 %v2197_v39 }
  0x69   :  { %2028 = vmatprep.subr.bf16.mxu0 %v2204_v40 }
  0x6a   :  { %2065 = vmatpush3.bf16.msra.mxu1 %v2197_v39 }
  0x6b   :  { %1273 = vmatmul.mubr.bf16.gmra.mxu0 %v2195_v41  ;;  %2058 = vmatprep.subr.bf16.mxu1 %v2204_v40 }
  0x6c   :  { %1370 = vmatmul.mubr.bf16.gmra.mxu1 %v2196_v42  ;;  %1280 = vmatprep.mubr.bf16.mxu0 %v2198_v43 }
  0x6d   :  { %1377 = vmatprep.mubr.bf16.mxu1 %v2200_v44  ;;  %2029 = vmatpush3.bf16.msra.mxu0 %v2204_v40 }
  0x6e   :  { %2030 = vmatprep.subr.bf16.mxu0 %v2211_v45  ;;  %2066 = vmatpush3.bf16.msra.mxu1 %v2204_v40 }
  0x6f   :  { %2059 = vmatprep.subr.bf16.mxu1 %v2211_v45 }
  0x71   :  { %2031 = vmatpush3.bf16.msra.mxu0 %v2211_v45 }
  0x72   :  { %2032 = vmatprep.subr.bf16.mxu0 %v2218_v46  ;;  %2067 = vmatpush3.bf16.msra.mxu1 %v2211_v45 }
  0x73   :  { %1281 = vmatmul.mubr.bf16.gmra.mxu0 %v2202_v47  ;;  %2060 = vmatprep.subr.bf16.mxu1 %v2218_v46 }
  0x74   :  { %1378 = vmatmul.mubr.bf16.gmra.mxu1 %v2203_v48  ;;  %1288 = vmatprep.mubr.bf16.mxu0 %v2205_v49 }
  0x75   :  { %1385 = vmatprep.mubr.bf16.mxu1 %v2207_v50  ;;  %2033 = vmatpush3.bf16.msra.mxu0 %v2218_v46 }
  0x76   :  { %2034 = vmatprep.subr.bf16.mxu0 %v2225_v51  ;;  %2068 = vmatpush3.bf16.msra.mxu1 %v2218_v46 }
  0x77   :  { %2061 = vmatprep.subr.bf16.mxu1 %v2225_v51 }
  0x79   :  { %2035 = vmatpush3.bf16.msra.mxu0 %v2225_v51 }
  0x7a   :  { %2036 = vmatprep.subr.bf16.mxu0 %v2232_v53  ;;  %2069 = vmatpush3.bf16.msra.mxu1 %v2225_v51 }
  0x7b   :  { %1289 = vmatmul.mubr.bf16.gmra.mxu0 %v2209_v52  ;;  %2062 = vmatprep.subr.bf16.mxu1 %v2232_v53 }
  0x7c   :  { %1386 = vmatmul.mubr.bf16.gmra.mxu1 %v2210_v54  ;;  %1296 = vmatprep.mubr.bf16.mxu0 %v2212_v55 }
  0x7d   :  { %1393 = vmatprep.mubr.bf16.mxu1 %v2214_v56  ;;  %2037 = vmatpush3.bf16.msra.mxu0 %v2232_v53 }
  0x7e   :  { %2038 = vmatprep.subr.bf16.mxu0 %v2239_v57  ;;  %2070 = vmatpush3.bf16.msra.mxu1 %v2232_v53 }
  0x7f   :  { %2063 = vmatprep.subr.bf16.mxu1 %v2239_v57 }
  0x81   :  { %2039 = vmatpush3.bf16.msra.mxu0 %v2239_v57 }
  0x82   :  { %2071 = vmatpush3.bf16.msra.mxu1 %v2239_v57 }
  0x83   :  { %1297 = vmatmul.mubr.bf16.gmra.mxu0 %v2216_v58 }
  0x84   :  { %1394 = vmatmul.mubr.bf16.gmra.mxu1 %v2217_v59  ;;  %1304 = vmatprep.mubr.bf16.mxu0 %v2219_v60 }
  0x85   :  { %1401 = vmatprep.mubr.bf16.mxu1 %v2221_v61 }
  0x8b   :  { %1305 = vmatmul.mubr.bf16.gmra.mxu0 %v2223_v62 }
  0x8c   :  { %1402 = vmatmul.mubr.bf16.gmra.mxu1 %v2224_v63  ;;  %1312 = vmatprep.mubr.bf16.mxu0 %v2226_v0 }
  0x8d   :  { %1409 = vmatprep.mubr.bf16.mxu1 %v2228_v1 }
  0x93   :  { %1313 = vmatmul.mubr.bf16.gmra.mxu0 %v2230_v2 }
  0x94   :  { %1410 = vmatmul.mubr.bf16.gmra.mxu1 %v2231_v3  ;;  %1320 = vmatprep.mubr.bf16.mxu0 %v2233_v4 }
  0x95   :  { %1417 = vmatprep.mubr.bf16.mxu1 %v2235_v5 }
  0x9b   :  { %1321 = vmatmul.mubr.bf16.gmra.mxu0 %v2237_v6 }
  0x9c   :  { %1418 = vmatmul.mubr.bf16.gmra.mxu1 %v2238_v7  ;;  %2040 = vmatprep.mubr.bf16.mxu0 %v2240_v8 }
  0x9d   :  { %2048 = vmatprep.mubr.bf16.mxu1 %v2241_v9 }
  0xa3   :  { %2041 = vmatmul.mubr.bf16.vlgmr.msra.gmra.mxu0 %v2242_v10 }
  0xa4   :  { %2049 = vmatmul.mubr.bf16.vlgmr.msra.gmra.mxu1 %v2243_v11  ;;  %2044 = vmatprep.mubr.bf16.mxu0 %v2244_v12 }
  0xa5   :  { %2052 = vmatprep.mubr.bf16.mxu1 %v2245_v13 }
  0xab   :  { %2045 = vmatmul.mubr.bf16.gmra.mxu0 %v2246_v14 }
  0xac   :  { %2053 = vmatmul.mubr.bf16.gmra.mxu1 %v2247_v15 }
  0xe3   :  { %v1768_v16 = vpop.f32.mrf.mxu0 }
  0xe4   :  { %v1832_v17 = vpop.f32.mrf.mxu1 }
  0xe5   :  { %v1769_v18 = vpop.f32.mrf.mxu0 }
  0xe6   :  { %v1770_v19 = vadd.f32 %v1769_v18, %v1768_v16  ;;  %v1833_v20 = vpop.f32.mrf.mxu1 }
  0xe7   :  { %v1834_v21 = vadd.f32 %v1833_v20, %v1832_v17  ;;  %v1771_v22 = vpop.f32.mrf.mxu0 }
  0xe8   :  { %v1835_v23 = vpop.f32.mrf.mxu1 }
  0xe9   :  { %v2700_v24 = vadd.f32 %v1834_v21, %v1770_v19  ;;  %v1772_v25 = vpop.f32.mrf.mxu0 }
  0xea   :  { %v1773_v26 = vadd.f32 %v1772_v25, %v1771_v22  ;;  %v1836_v27 = vpop.f32.mrf.mxu1 }
  0xeb   :  { %v1837_v28 = vadd.f32 %v1836_v27, %v1835_v23  ;;  %v1774_v29 = vpop.f32.mrf.mxu0 }
  0xec   :  { %v1838_v30 = vpop.f32.mrf.mxu1 }
  0xed   :  { %v2702_v31 = vadd.f32 %v1837_v28, %v1773_v26  ;;  %v1775_v32 = vpop.f32.mrf.mxu0 }
  0xee   :  { %v1776_v33 = vadd.f32 %v1775_v32, %v1774_v29  ;;  %v1839_v34 = vpop.f32.mrf.mxu1 }
  0xef   :  { %v1840_v35 = vadd.f32 %v1839_v34, %v1838_v30  ;;  %v1777_v36 = vpop.f32.mrf.mxu0 }
  0xf0   :  { %v1841_v37 = vpop.f32.mrf.mxu1 }
  0xf1   :  { %v2704_v38 = vadd.f32 %v1840_v35, %v1776_v33  ;;  %v1778_v39 = vpop.f32.mrf.mxu0 }
  0xf2   :  { %v1779_v40 = vadd.f32 %v1778_v39, %v1777_v36  ;;  %v1842_v41 = vpop.f32.mrf.mxu1 }
  0xf3   :  { %v1843_v42 = vadd.f32 %v1842_v41, %v1841_v37  ;;  %v1780_v43 = vpop.f32.mrf.mxu0 }
  0xf4   :  { %v1844_v44 = vpop.f32.mrf.mxu1 }
  0xf5   :  { %v2706_v45 = vadd.f32 %v1843_v42, %v1779_v40  ;;  %v1781_v46 = vpop.f32.mrf.mxu0 }
  0xf6   :  { %v1782_v47 = vadd.f32 %v1781_v46, %v1780_v43  ;;  %v1845_v48 = vpop.f32.mrf.mxu1 }
  0xf7   :  { %v1846_v49 = vadd.f32 %v1845_v48, %v1844_v44  ;;  %v1783_v50 = vpop.f32.mrf.mxu0 }
  0xf8   :  { %v1847_v51 = vpop.f32.mrf.mxu1 }
  0xf9   :  { %v2708_v52 = vadd.f32 %v1846_v49, %v1782_v47  ;;  %v1784_v53 = vpop.f32.mrf.mxu0 }
  0xfa   :  { %v1785_v54 = vadd.f32 %v1784_v53, %v1783_v50  ;;  %v1848_v55 = vpop.f32.mrf.mxu1 }
  0xfb   :  { %v1849_v56 = vadd.f32 %v1848_v55, %v1847_v51  ;;  %v1786_v57 = vpop.f32.mrf.mxu0 }
  0xfc   :  { %v1850_v58 = vpop.f32.mrf.mxu1 }
  0xfd   :  { %v2710_v59 = vadd.f32 %v1849_v56, %v1785_v54  ;;  %v1787_v60 = vpop.f32.mrf.mxu0 }
  0xfe   :  { %v1788_v61 = vadd.f32 %v1787_v60, %v1786_v57  ;;  %v1851_v62 = vpop.f32.mrf.mxu1 }
  0xff   :  { %2875 = vst [vmem:[#allocation2_spill] sm:$0xff] %v2710_v59  ;;  %v1852_v63 = vadd.f32 %v1851_v62, %v1850_v58  ;;  %v1789_v0 = vpop.f32.mrf.mxu0 }
 0x100   :  { %v1853_v1 = vpop.f32.mrf.mxu1 }
 0x101   :  { %v2712_v2 = vadd.f32 %v1852_v63, %v1788_v61  ;;  %v1790_v3 = vpop.f32.mrf.mxu0 }
 0x102   :  { %v1791_v4 = vadd.f32 %v1790_v3, %v1789_v0  ;;  %v1854_v5 = vpop.f32.mrf.mxu1 }
 0x103   :  { %2876 = vst [vmem:[#allocation3_spill] sm:$0xff] %v2712_v2  ;;  %v1855_v6 = vadd.f32 %v1854_v5, %v1853_v1  ;;  %v1792_v7 = vpop.f32.mrf.mxu0 }
 0x104   :  { %v1856_v8 = vpop.f32.mrf.mxu1 }
 0x105   :  { %v2714_v9 = vadd.f32 %v1855_v6, %v1791_v4  ;;  %v1793_v10 = vpop.f32.mrf.mxu0 }
 0x106   :  { %v1794_v11 = vadd.f32 %v1793_v10, %v1792_v7  ;;  %v1857_v12 = vpop.f32.mrf.mxu1 }
 0x107   :  { %2877 = vst [vmem:[#allocation4_spill] sm:$0xff] %v2714_v9  ;;  %v1858_v13 = vadd.f32 %v1857_v12, %v1856_v8  ;;  %v1795_v14 = vpop.f32.mrf.mxu0 }
 0x108   :  { %v1859_v15 = vpop.f32.mrf.mxu1 }
 0x109   :  { %v2716_v16 = vadd.f32 %v1858_v13, %v1794_v11  ;;  %v1796_v17 = vpop.f32.mrf.mxu0 }
 0x10a   :  { %v1797_v18 = vadd.f32 %v1796_v17, %v1795_v14  ;;  %v1860_v19 = vpop.f32.mrf.mxu1 }
 0x10b   :  { %v1861_v20 = vadd.f32 %v1860_v19, %v1859_v15  ;;  %v1798_v21 = vpop.f32.mrf.mxu0 }
 0x10c   :  { %v1862_v22 = vpop.f32.mrf.mxu1 }
 0x10d   :  { %v2718_v23 = vadd.f32 %v1861_v20, %v1797_v18  ;;  %v1799_v25 = vpop.f32.mrf.mxu0 }
 0x10e   :  { %v1800_v26 = vadd.f32 %v1799_v25, %v1798_v21  ;;  %v1863_v27 = vpop.f32.mrf.mxu1 }
 0x10f   :  { %2878 = vst [vmem:[#allocation5_spill] sm:$0xff] %v2718_v23  ;;  %v1864_v28 = vadd.f32 %v1863_v27, %v1862_v22  ;;  %v1801_v29 = vpop.f32.mrf.mxu0 }
 0x110   :  { %v1865_v30 = vpop.f32.mrf.mxu1 }
 0x111   :  { %v2720_v32 = vadd.f32 %v1864_v28, %v1800_v26  ;;  %v1802_v33 = vpop.f32.mrf.mxu0 }
 0x112   :  { %v1803_v34 = vadd.f32 %v1802_v33, %v1801_v29  ;;  %v1866_v35 = vpop.f32.mrf.mxu1 }
 0x113   :  { %v1867_v36 = vadd.f32 %v1866_v35, %v1865_v30  ;;  %v1804_v37 = vpop.f32.mrf.mxu0 }
 0x114   :  { %v1868_v39 = vpop.f32.mrf.mxu1 }
 0x115   :  { %v2722_v40 = vadd.f32 %v1867_v36, %v1803_v34  ;;  %v1805_v41 = vpop.f32.mrf.mxu0 }
 0x116   :  { %v1806_v42 = vadd.f32 %v1805_v41, %v1804_v37  ;;  %v1869_v43 = vpop.f32.mrf.mxu1 }
 0x117   :  { %v1870_v44 = vadd.f32 %v1869_v43, %v1868_v39  ;;  %v1807_v46 = vpop.f32.mrf.mxu0 }
 0x118   :  { %v1871_v47 = vpop.f32.mrf.mxu1 }
 0x119   :  { %v2724_v48 = vadd.f32 %v1870_v44, %v1806_v42  ;;  %v1808_v49 = vpop.f32.mrf.mxu0 }
 0x11a   :  { %v1809_v50 = vadd.f32 %v1808_v49, %v1807_v46  ;;  %v1872_v51 = vpop.f32.mrf.mxu1 }
 0x11b   :  { %2879 = vst [vmem:[#allocation6_spill] sm:$0xff] %v2724_v48  ;;  %v1873_v53 = vadd.f32 %v1872_v51, %v1871_v47  ;;  %v1810_v54 = vpop.f32.mrf.mxu0 }
 0x11c   :  { %v1874_v55 = vpop.f32.mrf.mxu1 }
 0x11d   :  { %v2726_v56 = vadd.f32 %v1873_v53, %v1809_v50  ;;  %v1811_v57 = vpop.f32.mrf.mxu0 }
 0x11e   :  { %v1812_v58 = vadd.f32 %v1811_v57, %v1810_v54  ;;  %v1875_v60 = vpop.f32.mrf.mxu1 }
 0x11f   :  { %2880 = vst [vmem:[#allocation7_spill] sm:$0xff] %v2726_v56  ;;  %v1876_v61 = vadd.f32 %v1875_v60, %v1874_v55  ;;  %v1813_v62 = vpop.f32.mrf.mxu0 }
 0x120   :  { %v1877_v63 = vpop.f32.mrf.mxu1 }
 0x121   :  { %v2728_v0 = vadd.f32 %v1876_v61, %v1812_v58  ;;  %v1814_v1 = vpop.f32.mrf.mxu0 }
 0x122   :  { %v1815_v3 = vadd.f32 %v1814_v1, %v1813_v62  ;;  %v1878_v4 = vpop.f32.mrf.mxu1 }
 0x123   :  { %2881 = vst [vmem:[#allocation8_spill] sm:$0xff] %v2728_v0  ;;  %v1879_v5 = vadd.f32 %v1878_v4, %v1877_v63  ;;  %v1896_v6 = vpop.f32.mrf.mxu0 }
 0x124   :  { %v1960_v7 = vpop.f32.mrf.mxu1 }
 0x125   :  { %v2730_v8 = vadd.f32 %v1879_v5, %v1815_v3  ;;  %v1897_v10 = vpop.f32.mrf.mxu0 }
 0x126   :  { %v1961_v11 = vpop.f32.mrf.mxu1 }
 0x127   :  { %2882 = vst [vmem:[#allocation9_spill] sm:$0xff] %v2730_v8  ;;  %v1899_v12 = vpop.f32.mrf.mxu0  ;;  %v1962_v23 = vadd.f32 %v1961_v11, %v1960_v7 }
 0x128   :  { %v1963_v13 = vpop.f32.mrf.mxu1 }
 0x129   :  { %v1900_v14 = vpop.f32.mrf.mxu0 }
 0x12a   :  { %v1964_v15 = vpop.f32.mrf.mxu1  ;;  %v1901_v0 = vadd.f32 %v1900_v14, %v1899_v12 }
 0x12b   :  { %v1902_v17 = vpop.f32.mrf.mxu0 }
 0x12c   :  { %v1966_v18 = vpop.f32.mrf.mxu1 }
 0x12d   :  { %v1903_v19 = vpop.f32.mrf.mxu0 }
 0x12e   :  { %v1967_v20 = vpop.f32.mrf.mxu1 }
 0x12f   :  { %v1905_v21 = vpop.f32.mrf.mxu0 }
 0x130   :  { %v1969_v22 = vpop.f32.mrf.mxu1 }
 0x131   :  { %v1906_v25 = vpop.f32.mrf.mxu0 }
 0x132   :  { %v1970_v26 = vpop.f32.mrf.mxu1  ;;  %v1907_v9 = vadd.f32 %v1906_v25, %v1905_v21 }
 0x133   :  { %v1908_v27 = vpop.f32.mrf.mxu0 }
 0x134   :  { %v2732_v28 = vpop.f32.mrf.mxu1  ;;  %v1278_v14 = vadd.f32 %v1907_v9, %v2706_v45 }
 0x135   :  { %v1909_v29 = vpop.f32.mrf.mxu0 }
 0x136   :  { %v2734_v30 = vpop.f32.mrf.mxu1 }
 0x137   :  { %v2736_v33 = vpop.f32.mrf.mxu0 }
 0x138   :  { %v2738_v34 = vpop.f32.mrf.mxu1 }
 0x139   :  { %2883 = vst [vmem:[#allocation10_spill] sm:$0xff] %v2738_v34  ;;  %v2740_v35 = vpop.f32.mrf.mxu0 }
 0x13a   :  { %v2742_v36 = vpop.f32.mrf.mxu1 }
 0x13b   :  { %2884 = vst [vmem:[#allocation11_spill] sm:$0xff] %v2742_v36  ;;  %v1914_v37 = vpop.f32.mrf.mxu0  ;;  %v1898_v36 = vadd.f32 %v1897_v10, %v1896_v6  ;;  %v1968_v10 = vadd.f32 %v1967_v20, %v1966_v18  ;;  %v1974_v20 = vadd.f32 %v2734_v30, %v2732_v28 }
 0x13c   :  { %v2744_v39 = vpop.f32.mrf.mxu1 }
 0x13d   :  { %2885 = vst [vmem:[#allocation12_spill] sm:$0xff] %v2744_v39  ;;  %v1915_v41 = vpop.f32.mrf.mxu0  ;;  %v1270_v39 = vadd.f32 %v1901_v0, %v2702_v31 }
 0x13e   :  { %v2746_v42 = vpop.f32.mrf.mxu1 }
 0x13f   :  { %2886 = vst [vmem:[#allocation13_spill] sm:$0xff] %v2746_v42  ;;  %v1917_v43 = vpop.f32.mrf.mxu0 }
 0x140   :  { %v2748_v44 = vpop.f32.mrf.mxu1 }
 0x141   :  { %2887 = vst [vmem:[#allocation14_spill] sm:$0xff] %v2748_v44  ;;  %v1918_v46 = vpop.f32.mrf.mxu0 }
 0x142   :  { %v2750_v47 = vpop.f32.mrf.mxu1 }
 0x143   :  { %2888 = vst [vmem:[#allocation15_spill] sm:$0xff] %v2750_v47  ;;  %v1920_v49 = vpop.f32.mrf.mxu0  ;;  %v1904_v47 = vadd.f32 %v1903_v19, %v1902_v17  ;;  %v1971_v17 = vadd.f32 %v1970_v26, %v1969_v22  ;;  %v1919_v22 = vadd.f32 %v1918_v46, %v1917_v43  ;;  %v2900_v46 = vld [vmem:[#allocation3_spill] sm:$0xff] }
 0x144   :  { %v1984_v50 = vpop.f32.mrf.mxu1 }
 0x145   :  { %v1921_v51 = vpop.f32.mrf.mxu0  ;;  %v1275_v6 = vadd.f32 %v1904_v47, %v2704_v38  ;;  %v1916_v38 = vadd.f32 %v1915_v41, %v1914_v37  ;;  %v1375_v9 = vadd.f32 %v1971_v17, %v1278_v14  ;;  %v2897_v47 = vld [vmem:[#allocation5_spill] sm:$0xff] }
 0x146   :  { %v1985_v53 = vpop.f32.mrf.mxu1  ;;  %v1922_v19 = vadd.f32 %v1921_v51, %v1920_v49  ;;  %v2896_v41 = vld [vmem:[#allocation13_spill] sm:$0xff] }
 0x147   :  { %v1923_v54 = vpop.f32.mrf.mxu0  ;;  %v1372_v31 = vadd.f32 %v1968_v10, %v1275_v6  ;;  %v1986_v18 = vadd.f32 %v1985_v53, %v1984_v50  ;;  %v1291_v51 = vadd.f32 %v1916_v38, %v2900_v46  ;;  %v2905_v6 = vld [vmem:[#allocation10_spill] sm:$0xff]  ;;  %v2906_v10 = vld [vmem:[#allocation11_spill] sm:$0xff] }
 0x148   :  { %v2752_v55 = vpop.f32.mrf.mxu1  ;;  %v1977_v14 = vadd.f32 %v2906_v10, %v2905_v6  ;;  %v2910_v38 = vld [vmem:[#allocation2_spill] sm:$0xff] }
 0x149   :  { %2889 = vst [vmem:[#allocation16_spill] sm:$0xff] %v2752_v55  ;;  %v1924_v57 = vpop.f32.mrf.mxu0  ;;  %v1267_v55 = vadd.f32 %v1898_v36, %v2700_v24 }
 0x14a   :  { %v2754_v58 = vpop.f32.mrf.mxu1  ;;  %v1925_v36 = vadd.f32 %v1924_v57, %v1923_v54  ;;  %v2903_v57 = vld [vmem:[#allocation15_spill] sm:$0xff] }
 0x14b   :  { %2890 = vst [vmem:[#allocation17_spill] sm:$0xff] %v2754_v58  ;;  %v1926_v60 = vpop.f32.mrf.mxu0  ;;  %v1364_v0 = vadd.f32 %v1962_v23, %v1267_v55  ;;  %v1913_v23 = vadd.f32 %v2740_v35, %v2736_v33  ;;  %v2902_v55 = vld [vmem:[#allocation14_spill] sm:$0xff] }
 0x14c   :  { %v1990_v61 = vpop.f32.mrf.mxu1  ;;  %v1302_v49 = vadd.f32 %v1925_v36, %v2897_v47 }
 0x14d   :  { %v1927_v62 = vpop.f32.mrf.mxu0 }
 0x14e   :  { %v1991_v63 = vpop.f32.mrf.mxu1  ;;  %v1928_v42 = vadd.f32 %v1927_v62, %v1926_v60 }
 0x14f   :  { %v1929_v1 = vpop.f32.mrf.mxu0  ;;  %v1992_v7 = vadd.f32 %v1991_v63, %v1990_v61 }
 0x150   :  { %v1993_v3 = vpop.f32.mrf.mxu1  ;;  %v1307_v24 = vadd.f32 %v1928_v42, %v2720_v32  ;;  %v2898_v50 = vld [vmem:[#allocation16_spill] sm:$0xff] }
 0x151   :  { %v1930_v4 = vpop.f32.mrf.mxu0 }
 0x152   :  { %v1994_v5 = vpop.f32.mrf.mxu1  ;;  %v1931_v25 = vadd.f32 %v1930_v4, %v1929_v1  ;;  %v2899_v28 = vld [vmem:[#allocation17_spill] sm:$0xff]  ;;  %v2904_v1 = vld [vmem:[#allocation8_spill] sm:$0xff] }
 0x153   :  { %v1932_v56 = vpop.f32.mrf.mxu0  ;;  %v1995_v32 = vadd.f32 %v1994_v5, %v1993_v3  ;;  %v1989_v30 = vadd.f32 %v2899_v28, %v2898_v50 }
 0x154   :  { %v2756_v8 = vpop.f32.mrf.mxu1  ;;  %v1310_v26 = vadd.f32 %v1931_v25, %v2722_v40 }
 0x155   :  { %2891 = vst [vmem:[#allocation18_spill] sm:$0xff] %v2756_v8  ;;  %v1933_v59 = vpop.f32.mrf.mxu0 }
 0x156   :  { %v2758_v48 = vpop.f32.mrf.mxu1  ;;  %v1934_v53 = vadd.f32 %v1933_v59, %v1932_v56  ;;  %v1407_v63 = vadd.f32 %v1995_v32, %v1310_v26 }
 0x157   :  { %2892 = vst [vmem:[#allocation19_spill] sm:$0xff] %v2758_v48  ;;  %v2760_v34 = vpop.f32.mrf.mxu0  ;;  %v1965_v48 = vadd.f32 %v1964_v15, %v1963_v13  ;;  %v1299_v15 = vadd.f32 %v1922_v19, %v2716_v16  ;;  %v2895_v16 = vld [vmem:[#allocation12_spill] sm:$0xff] }
 0x158   :  { %v2762_v44 = vpop.f32.mrf.mxu1  ;;  %v1980_v42 = vadd.f32 %v2896_v41, %v2895_v16  ;;  %v2912_v16 = vld [vmem:[#allocation7_spill] sm:$0xff] }
 0x159   :  { %2893 = vst [vmem:[#allocation20_spill] sm:$0xff] %v2762_v44  ;;  %v2764_v2 = vpop.f32.mrf.mxu0  ;;  %v1367_v13 = vadd.f32 %v1965_v48, %v1270_v39  ;;  %v1404_v39 = vadd.f32 %v1992_v7, %v1307_v24  ;;  %v1396_v33 = vadd.f32 %v1986_v18, %v1299_v15  ;;  %v1286_v15 = vadd.f32 %v1913_v23, %v2910_v38 }
 0x15a   :  { %v2766_v58 = vpop.f32.mrf.mxu1  ;;  %v1937_v36 = vadd.f32 %v2764_v2, %v2760_v34 }
 0x15b   :  { %2894 = vst [vmem:[#allocation21_spill] sm:$0xff] %v2766_v58  ;;  %v1938_v8 = vpop.f32.mrf.mxu0  ;;  %v1910_v58 = vadd.f32 %v1909_v29, %v1908_v27 }
 0x15c   :  { %v2002_v12 = vpop.f32.mrf.mxu1  ;;  %v2908_v24 = vld [vmem:[#allocation18_spill] sm:$0xff]  ;;  %v1318_v41 = vadd.f32 %v1937_v36, %v2912_v16 }
 0x15d   :  { %v1939_v21 = vpop.f32.mrf.mxu0  ;;  %v1283_v29 = vadd.f32 %v1910_v58, %v2708_v52  ;;  %v1983_v58 = vadd.f32 %v2903_v57, %v2902_v55 }
 0x15e   :  { %v2003_v44 = vpop.f32.mrf.mxu1  ;;  %v1940_v48 = vadd.f32 %v1939_v21, %v1938_v8  ;;  %v2901_v8 = vld [vmem:[#allocation4_spill] sm:$0xff]  ;;  %v1399_v21 = vadd.f32 %v1989_v30, %v1302_v49  ;;  %v2909_v7 = vld [vmem:[#allocation19_spill] sm:$0xff] }
 0x15f   :  { %v1941_v11 = vpop.f32.mrf.mxu0  ;;  %v1294_v35 = vadd.f32 %v1919_v22, %v2901_v8  ;;  %v2004_v4 = vadd.f32 %v2003_v44, %v2002_v12  ;;  %v1380_v44 = vadd.f32 %v1974_v20, %v1283_v29  ;;  %v2907_v12 = vld [vmem:[#allocation6_spill] sm:$0xff]  ;;  %v2911_v22 = vld [vmem:[#allocation9_spill] sm:$0xff]  ;;  %v1383_v8 = vadd.f32 %v1977_v14, %v1286_v15 }
 0x160   :  { %v2005_v60 = vpop.f32.mrf.mxu1  ;;  %v1323_v3 = vadd.f32 %v1940_v48, %v2904_v1  ;;  %v1315_v25 = vadd.f32 %v1934_v53, %v2907_v12 }
 0x161   :  { %v1942_v45 = vpop.f32.mrf.mxu0  ;;  %v1391_v20 = vadd.f32 %v1983_v58, %v1294_v35 }
 0x162   :  { %v2006_v27 = vpop.f32.mrf.mxu1  ;;  %v1943_v59 = vadd.f32 %v1942_v45, %v1941_v11  ;;  %v1998_v11 = vadd.f32 %v2909_v7, %v2908_v24  ;;  %v1420_v29 = vadd.f32 %v2004_v4, %v1323_v3 }
 0x163   :  { %v2042_v37 = vpop.f32.mrf.mxu0  ;;  %v2007_v34 = vadd.f32 %v2006_v27, %v2005_v60  ;;  %v2913_v60 = vld [vmem:[#allocation20_spill] sm:$0xff]  ;;  %v2914_v27 = vld [vmem:[#allocation21_spill] sm:$0xff] }
 0x164   :  { %v1469_v43 = vadd.f32 %v2042_v37, %v1372_v31  ;;  %v2050_v40 = vpop.f32.mrf.mxu1  ;;  %v1326_v2 = vadd.f32 %v1943_v59, %v2911_v22  ;;  %v1412_v50 = vadd.f32 %v1998_v11, %v1315_v25 }
 0x165   :  { %v2786_v52 = vadd.f32 %v2050_v40, %v1404_v39  ;;  %v1460_v54 = vpop.f32.mrf.mxu0 }
 0x166   :  { %1525 = vst [vmem:[%s2873_s2 + $0x10] sm:$0xff] %v1469_v43  ;;  %v1461_v61 = vadd.f32 %v1460_v54, %v1364_v0  ;;  %v1492_v62 = vpop.f32.mrf.mxu1  ;;  %v1562_v28 = vmul.f32 %v1469_v43, %v1469_v43 }
 0x167   :  { %1533 = vst [vmem:[%s2873_s2 + $0x50] sm:$0xff] %v2786_v52  ;;  %v2799_v56 = vadd.f32 %v1492_v62, %v1396_v33  ;;  %v2043_v5 = vpop.f32.mrf.mxu0  ;;  %v1423_v33 = vadd.f32 %v2007_v34, %v1326_v2 }
 0x168   :  { %1523 = vst [vmem:[%s2873_s2] sm:$0xff] %v1461_v61  ;;  %v1472_v17 = vadd.f32 %v2043_v5, %v1375_v9  ;;  %v2051_v19 = vpop.f32.mrf.mxu1  ;;  %v1388_v9 = vadd.f32 %v1980_v42, %v1291_v51  ;;  %v1560_v23 = vmul.f32 %v1461_v61, %v1461_v61  ;;  %v2001_v42 = vadd.f32 %v2914_v27, %v2913_v60 }
 0x169   :  { %1531 = vst [vmem:[%s2873_s2 + $0x40] sm:$0xff] %v2799_v56  ;;  %v2815_v31 = vadd.f32 %v2051_v19, %v1407_v63  ;;  %v1463_v0 = vpop.f32.mrf.mxu0  ;;  %v1568_v7 = vmul.f32 %v2799_v56, %v2799_v56 }
 0x16a   :  { %1526 = vst [vmem:[%s2873_s2 + $0x18] sm:$0xff] %v1472_v17  ;;  %v1464_v18 = vadd.f32 %v1463_v0, %v1367_v13  ;;  %v1495_v45 = vpop.f32.mrf.mxu1  ;;  %v1563_v35 = vmul.f32 %v1472_v17, %v1472_v17  ;;  %v1415_v63 = vadd.f32 %v2001_v42, %v1318_v41 }
 0x16b   :  { %1534 = vst [vmem:[%s2873_s2 + $0x58] sm:$0xff] %v2815_v31  ;;  %v1496_v26 = vadd.f32 %v1495_v45, %v1399_v21  ;;  %v2046_v32 = vpop.f32.mrf.mxu0 }
 0x16c   :  { %1524 = vst [vmem:[%s2873_s2 + $0x8] sm:$0xff] %v1464_v18  ;;  %v1539_v13 = vadd.f32 %v1464_v18, %v1461_v61  ;;  %v1561_v48 = vmul.f32 %v1464_v18, %v1464_v18  ;;  %v1485_v37 = vadd.f32 %v2046_v32, %v1388_v9  ;;  %v2054_v39 = vpop.f32.mrf.mxu1  ;;  %v1570_v18 = vmul.f32 %v2786_v52, %v2786_v52 }
 0x16d   :  { %1532 = vst [vmem:[%s2873_s2 + $0x48] sm:$0xff] %v1496_v26  ;;  %v1517_v47 = vadd.f32 %v2054_v39, %v1420_v29  ;;  %v1476_v49 = vpop.f32.mrf.mxu0  ;;  %v1569_v0 = vmul.f32 %v1496_v26, %v1496_v26 }
 0x16e   :  { %v1540_v30 = vadd.f32 %v1539_v13, %v1469_v43  ;;  %v1576_v40 = vadd.f32 %v1561_v48, %v1560_v23  ;;  %1529 = vst [vmem:[%s2873_s2 + $0x30] sm:$0xff] %v1485_v37  ;;  %v1477_v46 = vadd.f32 %v1476_v49, %v1380_v44  ;;  %v1508_v51 = vpop.f32.mrf.mxu1  ;;  %v1566_v19 = vmul.f32 %v1485_v37, %v1485_v37 }
 0x16f   :  { %1537 = vst [vmem:[%s2873_s2 + $0x70] sm:$0xff] %v1517_v47  ;;  %v1509_v53 = vadd.f32 %v1508_v51, %v1412_v50  ;;  %v2047_v54 = vpop.f32.mrf.mxu0  ;;  %v1574_v48 = vmul.f32 %v1517_v47, %v1517_v47 }
 0x170   :  { %v1577_v55 = vadd.f32 %v1576_v40, %v1562_v28  ;;  %1527 = vst [vmem:[%s2873_s2 + $0x20] sm:$0xff] %v1477_v46  ;;  %v1541_v43 = vadd.f32 %v1540_v30, %v1472_v17  ;;  %v1488_v57 = vadd.f32 %v2047_v54, %v1391_v20  ;;  %v2055_v58 = vpop.f32.mrf.mxu1  ;;  %v1564_v3 = vmul.f32 %v1477_v46, %v1477_v46 }
 0x171   :  { %1535 = vst [vmem:[%s2873_s2 + $0x60] sm:$0xff] %v1509_v53  ;;  %v1520_v61 = vadd.f32 %v2055_v58, %v1423_v33  ;;  %v1479_v62 = vpop.f32.mrf.mxu0  ;;  %v1571_v20 = vmul.f32 %v2815_v31, %v2815_v31  ;;  %v1572_v34 = vmul.f32 %v1509_v53, %v1509_v53 }
 0x172   :  { %v1542_v1 = vadd.f32 %v1541_v43, %v1477_v46  ;;  %v1578_v4 = vadd.f32 %v1577_v55, %v1563_v35  ;;  %1530 = vst [vmem:[%s2873_s2 + $0x38] sm:$0xff] %v1488_v57  ;;  %v1480_v59 = vadd.f32 %v1479_v62, %v1383_v8  ;;  %v1511_v5 = vpop.f32.mrf.mxu1  ;;  %v1567_v12 = vmul.f32 %v1488_v57, %v1488_v57 }
 0x173   :  { %1538 = vst [vmem:[%s2873_s2 + $0x78] sm:$0xff] %v1520_v61  ;;  %v1512_v6 = vadd.f32 %v1511_v5, %v1415_v63  ;;  %v1575_v39 = vmul.f32 %v1520_v61, %v1520_v61 }
 0x174   :  { %v1579_v10 = vadd.f32 %v1578_v4, %v1564_v3  ;;  %1528 = vst [vmem:[%s2873_s2 + $0x28] sm:$0xff] %v1480_v59  ;;  %v1543_v14 = vadd.f32 %v1542_v1, %v1480_v59  ;;  %v1565_v17 = vmul.f32 %v1480_v59, %v1480_v59 }
 0x175   :  { %1536 = vst [vmem:[%s2873_s2 + $0x68] sm:$0xff] %v1512_v6  ;;  %v1573_v23 = vmul.f32 %v1512_v6, %v1512_v6 }
 0x176   :  { %v1544_v21 = vadd.f32 %v1543_v14, %v1485_v37  ;;  %v1580_v44 = vadd.f32 %v1579_v10, %v1565_v17 }
 0x178   :  { %v1545_v25 = vadd.f32 %v1544_v21, %v1488_v57  ;;  %v1581_v24 = vadd.f32 %v1580_v44, %v1566_v19 }
 0x17a   :  { %v1546_v11 = vadd.f32 %v1545_v25, %v2799_v56  ;;  %v1582_v36 = vadd.f32 %v1581_v24, %v1567_v12 }
 0x17c   :  { %v1583_v38 = vadd.f32 %v1582_v36, %v1568_v7  ;;  %v1547_v15 = vadd.f32 %v1546_v11, %v1496_v26 }
 0x17e   :  { %v1548_v45 = vadd.f32 %v1547_v15, %v2786_v52  ;;  %v1584_v9 = vadd.f32 %v1583_v38, %v1569_v0 }
 0x180   :  { %v1549_v22 = vadd.f32 %v1548_v45, %v2815_v31  ;;  %v1585_v2 = vadd.f32 %v1584_v9, %v1570_v18 }
 0x182   :  { %v1550_v32 = vadd.f32 %v1549_v22, %v1509_v53  ;;  %v1586_v29 = vadd.f32 %v1585_v2, %v1571_v20 }
 0x184   :  { %v1551_v56 = vadd.f32 %v1550_v32, %v1512_v6  ;;  %v1587_v13 = vadd.f32 %v1586_v29, %v1572_v34 }
 0x186   :  { %v1552_v26 = vadd.f32 %v1551_v56, %v1517_v47  ;;  %v1588_v37 = vadd.f32 %v1587_v13, %v1573_v23 }
 0x188   :  { %v1553_v16 = vadd.f32 %v1552_v26, %v1520_v61  ;;  %v1589_v41 = vadd.f32 %v1588_v37, %v1574_v48 }
 0x18a   :  { %v1554_v52 = vrot.slane %v1553_v16, 4  ;;  %v1590_v60 = vadd.f32 %v1589_v41, %v1575_v39 }
 0x18c   :  { %v1555_v27 = vadd.f32 %v1554_v52, %v1553_v16  ;;  %v1591_v42 = vrot.slane %v1590_v60, 4 }
 0x18e   :  { %v1556_v49 = vrot.slane %v1555_v27, 2  ;;  %v1592_v50 = vadd.f32 %v1591_v42, %v1590_v60 }
 0x190   :  { %v1557_v31 = vadd.f32 %v1556_v49, %v1555_v27  ;;  %v1593_v28 = vrot.slane %v1592_v50, 2 }
 0x192   :  { %v1558_v30 = vrot.slane %v1557_v31, 1  ;;  %v1594_v40 = vadd.f32 %v1593_v28, %v1592_v50 }
 0x194   :  { %v1595_v46 = vrot.slane %v1594_v40, 1  ;;  %v1559_v51 = vadd.f32 %v1558_v30, %v1557_v31 }
 0x196   :  { %v1596_v53 = vadd.f32 %v1595_v46, %v1594_v40 }
 0x198   :  { %v1598_v54 = vsel %vm1597_vm0, %v1559_v51, %v1596_v53 }
 0x199   :  { %1599 = vst [vmem:[%s2874_s3] sm:$0x3] %v1598_v54 }

// kernel: _lambda_.59
= control target key start
LH: loop header
LB: loop body
LE: loop exit
PB: predicated region body
PF: predicated region fallthrough
CT: control target
= control target key end

     0   :  { %s104_s0 = inlined_call_operand.vmem [shape: f32[32,128], index: 0, kind: input, shape index: {}]   ;;  %s105_s1 = inlined_call_operand.vmem [shape: f32[1,128], index: 1, kind: input, shape index: {}]   ;;  %s106_s2 = inlined_call_operand.vmem [shape: f32[1,128], index: 2, kind: input, shape index: {}]   ;;  %s107_s3 = inlined_call_operand.vmem [shape: f32[32,128], index: 3, kind: output, shape index: {}]  }
   0x1   :  { %v14_v0 = vld [vmem:[%s104_s0] sm:$0xff]  ;;  %v15_v4 = vld [vmem:[%s104_s0 + $0x8] sm:$0xff]  ;;  %v16_v5 = vld [vmem:[%s104_s0 + $0x10] sm:$0xff] }
   0x2   :  { %v52_v1 = vld [vmem:[%s105_s1] ss:$0 sm:$0xff]  ;;  %v17_v6 = vld [vmem:[%s104_s0 + $0x18] sm:$0xff] }
   0x3   :  { %v53_v2 = vld [vmem:[%s106_s2] ss:$0 sm:$0xff]  ;;  %v25_v3 = vmul.f32 %v52_v1, %v14_v0  ;;  %v26_v7 = vmul.f32 %v52_v1, %v15_v4  ;;  %v27_v8 = vmul.f32 %v52_v1, %v16_v5  ;;  %v28_v9 = vmul.f32 %v52_v1, %v17_v6 }
   0x5   :  { %v36_v10 = vadd.f32 %v53_v2, %v25_v3  ;;  %v37_v11 = vadd.f32 %v53_v2, %v26_v7  ;;  %v38_v12 = vadd.f32 %v53_v2, %v27_v8  ;;  %v39_v13 = vadd.f32 %v53_v2, %v28_v9 }
   0x7   :  { %v40_v14 = vmax.f32 %v36_v10, 0.0  ;;  %v41_v15 = vmax.f32 %v37_v11, 0.0  ;;  %v42_v16 = vmax.f32 %v38_v12, 0.0  ;;  %v43_v17 = vmax.f32 %v39_v13, 0.0 }
   0x9   :  { %44 = vst [vmem:[%s107_s3] sm:$0xff] %v40_v14  ;;  %45 = vst [vmem:[%s107_s3 + $0x8] sm:$0xff] %v41_v15 }
   0xa   :  { %46 = vst [vmem:[%s107_s3 + $0x10] sm:$0xff] %v42_v16  ;;  %47 = vst [vmem:[%s107_s3 + $0x18] sm:$0xff] %v43_v17 }

// kernel: _lambda_.62
= control target key start
LH: loop header
LB: loop body
LE: loop exit
PB: predicated region body
PF: predicated region fallthrough
CT: control target
= control target key end

     0   :  { %s178_s0 = inlined_call_operand.vmem [shape: f32[32,128], index: 0, kind: input, shape index: {}]   ;;  %s179_s1 = inlined_call_operand.vmem [shape: f32[32,128], index: 1, kind: input, shape index: {}]   ;;  %s180_s2 = inlined_call_operand.vmem [shape: f32[1,128], index: 2, kind: input, shape index: {}]   ;;  %s181_s3 = inlined_call_operand.vmem [shape: f32[1,128], index: 3, kind: input, shape index: {}]   ;;  %s182_s4 = inlined_call_operand.vmem [shape: f32[1,128], index: 4, kind: input, shape index: {}]   ;;  %s183_s5 = inlined_call_operand.vmem [shape: f32[1,128], index: 5, kind: input, shape index: {}]   ;;  %s184_s6 = inlined_call_operand.vmem [shape: f32[32,128], index: 6, kind: output, shape index: {}]  }
   0x1   :  { %v23_v0 = vld [vmem:[%s178_s0] sm:$0xff]  ;;  %v24_v7 = vld [vmem:[%s178_s0 + $0x8] sm:$0xff]  ;;  %v25_v9 = vld [vmem:[%s178_s0 + $0x10] sm:$0xff] }
   0x2   :  { %v91_v1 = vld [vmem:[%s180_s2] ss:$0 sm:$0xff]  ;;  %v50_v8 = vld [vmem:[%s179_s1 + $0x8] sm:$0xff]  ;;  %v51_v14 = vld [vmem:[%s179_s1 + $0x10] sm:$0xff] }
   0x3   :  { %v92_v2 = vld [vmem:[%s181_s3] ss:$0 sm:$0xff]  ;;  %v34_v3 = vmul.f32 %v91_v1, %v23_v0  ;;  %v35_v11 = vmul.f32 %v91_v1, %v24_v7  ;;  %v36_v13 = vmul.f32 %v91_v1, %v25_v9  ;;  %v26_v15 = vld [vmem:[%s178_s0 + $0x18] sm:$0xff] }
   0x4   :  { %v49_v4 = vld [vmem:[%s179_s1] sm:$0xff]  ;;  %v52_v16 = vld [vmem:[%s179_s1 + $0x18] sm:$0xff]  ;;  %v37_v19 = vmul.f32 %v91_v1, %v26_v15 }
   0x5   :  { %v93_v5 = vld [vmem:[%s182_s4] ss:$0 sm:$0xff]  ;;  %v45_v10 = vadd.f32 %v92_v2, %v34_v3  ;;  %v46_v22 = vadd.f32 %v92_v2, %v35_v11  ;;  %v47_v23 = vadd.f32 %v92_v2, %v36_v13 }
   0x6   :  { %v60_v6 = vmul.f32 %v93_v5, %v49_v4  ;;  %v61_v12 = vmul.f32 %v93_v5, %v50_v8  ;;  %v94_v17 = vld [vmem:[%s183_s5] ss:$0 sm:$0xff]  ;;  %v62_v18 = vmul.f32 %v93_v5, %v51_v14  ;;  %v63_v20 = vmul.f32 %v93_v5, %v52_v16 }
   0x7   :  { %v48_v24 = vadd.f32 %v92_v2, %v37_v19 }
   0x8   :  { %v64_v21 = vadd.f32 %v60_v6, %v45_v10  ;;  %v65_v26 = vadd.f32 %v61_v12, %v46_v22  ;;  %v66_v27 = vadd.f32 %v62_v18, %v47_v23 }
   0x9   :  { %v67_v28 = vadd.f32 %v63_v20, %v48_v24 }
   0xa   :  { %v75_v25 = vadd.f32 %v94_v17, %v64_v21  ;;  %v76_v30 = vadd.f32 %v94_v17, %v65_v26  ;;  %v77_v31 = vadd.f32 %v94_v17, %v66_v27 }
   0xb   :  { %v78_v32 = vadd.f32 %v94_v17, %v67_v28 }
   0xc   :  { %v79_v29 = vmax.f32 %v75_v25, 0.0  ;;  %v80_v33 = vmax.f32 %v76_v30, 0.0  ;;  %v81_v34 = vmax.f32 %v77_v31, 0.0 }
   0xd   :  { %v82_v35 = vmax.f32 %v78_v32, 0.0 }
   0xe   :  { %83 = vst [vmem:[%s184_s6] sm:$0xff] %v79_v29  ;;  %84 = vst [vmem:[%s184_s6 + $0x8] sm:$0xff] %v80_v33 }
   0xf   :  { %85 = vst [vmem:[%s184_s6 + $0x10] sm:$0xff] %v81_v34  ;;  %86 = vst [vmem:[%s184_s6 + $0x18] sm:$0xff] %v82_v35 }

// kernel: _lambda_.58
= control target key start
LH: loop header
LB: loop body
LE: loop exit
PB: predicated region body
PF: predicated region fallthrough
CT: control target
= control target key end

     0   :  { %vm973_vm0 = vcmask 1040384   ;;  %s1619_s1 = inlined_call_operand.vmem [shape: bf16[1152,128], index: 1, kind: input, shape index: {}]   ;;  %s1620_s0 = inlined_call_operand.vmem [shape: bf16[32,1152], index: 0, kind: input, shape index: {}]   ;;  %s1621_s2 = inlined_call_operand.vmem [shape: f32[32,128], index: 2, kind: output, shape index: {0}]   ;;  %s1622_s3 = inlined_call_operand.vmem [shape: f32[1,2,128], index: 3, kind: output, shape index: {1}]  }
   0x1   :  { %v1216_v0 = vld [vmem:[%s1619_s1 + $0x78] sm:$0xff]   ;;  %v1220_v4 = vld [vmem:[%s1619_s1 + $0x70] sm:$0xff]   ;;  %v1224_v8 = vld [vmem:[%s1619_s1 + $0x68] sm:$0xff]  }
   0x2   :  { %v1217_v1 = vld [vmem:[%s1619_s1 + $0xf8] sm:$0xff]   ;;  %1074 = vmatprep.subr.bf16.mxu0 %v1216_v0  ;;  %v1221_v5 = vld [vmem:[%s1619_s1 + $0xf0] sm:$0xff]   ;;  %v1225_v9 = vld [vmem:[%s1619_s1 + $0xe8] sm:$0xff]  }
   0x3   :  { %v1218_v2 = vld [vmem:[%s1619_s1 + $0x38] sm:$0xff]   ;;  %1102 = vmatprep.subr.bf16.mxu1 %v1217_v1  ;;  %v1222_v6 = vld [vmem:[%s1619_s1 + $0x30] sm:$0xff]   ;;  %v1226_v10 = vld [vmem:[%s1619_s1 + $0x28] sm:$0xff]  }
   0x4   :  { %v1219_v3 = vld [vmem:[%s1619_s1 + $0xb8] sm:$0xff]   ;;  %1075 = vmatpush3.bf16.msra.mxu0 %v1218_v2  ;;  %v1223_v7 = vld [vmem:[%s1619_s1 + $0xb0] sm:$0xff]   ;;  %v1227_v11 = vld [vmem:[%s1619_s1 + $0xa8] sm:$0xff]  }
   0x5   :  { %1103 = vmatpush3.bf16.msra.mxu1 %v1219_v3  ;;  %1076 = vmatprep.subr.bf16.mxu0 %v1220_v4  ;;  %v1228_v12 = vld [vmem:[%s1619_s1 + $0x60] sm:$0xff]   ;;  %v1232_v16 = vld [vmem:[%s1619_s1 + $0x58] sm:$0xff]   ;;  %v1236_v20 = vld [vmem:[%s1619_s1 + $0x50] sm:$0xff]  }
   0x6   :  { %1104 = vmatprep.subr.bf16.mxu1 %v1221_v5  ;;  %v1229_v13 = vld [vmem:[%s1619_s1 + $0xe0] sm:$0xff]   ;;  %v1233_v17 = vld [vmem:[%s1619_s1 + $0xd8] sm:$0xff]   ;;  %v1237_v21 = vld [vmem:[%s1619_s1 + $0xd0] sm:$0xff]  }
   0x7   :  { %v1230_v14 = vld [vmem:[%s1619_s1 + $0x20] sm:$0xff]   ;;  %v1234_v18 = vld [vmem:[%s1619_s1 + $0x18] sm:$0xff]   ;;  %v1238_v22 = vld [vmem:[%s1619_s1 + $0x10] sm:$0xff]  }
   0x8   :  { %1077 = vmatpush3.bf16.msra.mxu0 %v1222_v6  ;;  %v1231_v15 = vld [vmem:[%s1619_s1 + $0xa0] sm:$0xff]   ;;  %v1235_v19 = vld [vmem:[%s1619_s1 + $0x98] sm:$0xff]   ;;  %v1239_v23 = vld [vmem:[%s1619_s1 + $0x90] sm:$0xff]  }
   0x9   :  { %1105 = vmatpush3.bf16.msra.mxu1 %v1223_v7  ;;  %1078 = vmatprep.subr.bf16.mxu0 %v1224_v8  ;;  %v1240_v24 = vld [vmem:[%s1619_s1 + $0x48] sm:$0xff]   ;;  %v1244_v28 = vld [vmem:[%s1619_s1 + $0x40] sm:$0xff]   ;;  %v1254_v36 = vld [vmem:[%s1619_s1 + $0x178] sm:$0xff]  }
   0xa   :  { %1106 = vmatprep.subr.bf16.mxu1 %v1225_v9  ;;  %v1241_v25 = vld [vmem:[%s1619_s1 + $0xc8] sm:$0xff]   ;;  %v1245_v29 = vld [vmem:[%s1619_s1 + $0xc0] sm:$0xff]   ;;  %v1255_v37 = vld [vmem:[%s1619_s1 + $0x138] sm:$0xff]  }
   0xb   :  { %v1242_v26 = vld [vmem:[%s1619_s1 + $0x8] sm:$0xff]   ;;  %v1246_v30 = vld [vmem:[%s1619_s1] sm:$0xff]   ;;  %v1256_v38 = vld [vmem:[%s1619_s1 + $0x1f8] sm:$0xff]  }
   0xc   :  { %1079 = vmatpush3.bf16.msra.mxu0 %v1226_v10  ;;  %v1243_v27 = vld [vmem:[%s1619_s1 + $0x88] sm:$0xff]   ;;  %v1247_v31 = vld [vmem:[%s1619_s1 + $0x80] sm:$0xff]   ;;  %v1257_v39 = vld [vmem:[%s1619_s1 + $0x1b8] sm:$0xff]  }
   0xd   :  { %1107 = vmatpush3.bf16.msra.mxu1 %v1227_v11  ;;  %1080 = vmatprep.subr.bf16.mxu0 %v1228_v12  ;;  %v1248_v32 = vld [vmem:[%s1620_s0] ss:$36 sps:$4 sm:$0xff]   ;;  %v1251_v34 = vld [vmem:[%s1620_s0 + $0x8] ss:$36 sps:$4 sm:$0xff]   ;;  %v1258_v40 = vld [vmem:[%s1619_s1 + $0x170] sm:$0xff]  }
   0xe   :  { %1108 = vmatprep.subr.bf16.mxu1 %v1229_v13  ;;  %v1250_v33 = vld [vmem:[%s1620_s0 + $0x4] ss:$36 sps:$4 sm:$0xff]   ;;  %v1253_v35 = vld [vmem:[%s1620_s0 + $0xc] ss:$36 sps:$4 sm:$0xff]   ;;  %v1270_v52 = vld [vmem:[%s1619_s1 + $0x158] sm:$0xff]  }
   0xf   :  { %734 = vmatprep.mubr.bf16.mxu0 %v1250_v33  ;;  %783 = vmatprep.mubr.bf16.mxu1 %v1253_v35  ;;  %v1259_v41 = vld [vmem:[%s1619_s1 + $0x130] sm:$0xff]   ;;  %v1262_v44 = vld [vmem:[%s1619_s1 + $0x168] sm:$0xff]   ;;  %v1266_v48 = vld [vmem:[%s1619_s1 + $0x160] sm:$0xff]  }
  0x10   :  { %1081 = vmatpush3.bf16.msra.mxu0 %v1230_v14  ;;  %v1260_v42 = vld [vmem:[%s1619_s1 + $0x1f0] sm:$0xff]   ;;  %v1263_v45 = vld [vmem:[%s1619_s1 + $0x128] sm:$0xff]   ;;  %v1267_v49 = vld [vmem:[%s1619_s1 + $0x120] sm:$0xff]  }
  0x11   :  { %1109 = vmatpush3.bf16.msra.mxu1 %v1231_v15  ;;  %1082 = vmatprep.subr.bf16.mxu0 %v1232_v16  ;;  %v1261_v43 = vld [vmem:[%s1619_s1 + $0x1b0] sm:$0xff]   ;;  %v1264_v46 = vld [vmem:[%s1619_s1 + $0x1e8] sm:$0xff]   ;;  %v1268_v50 = vld [vmem:[%s1619_s1 + $0x1e0] sm:$0xff]  }
  0x12   :  { %1110 = vmatprep.subr.bf16.mxu1 %v1233_v17  ;;  %v1265_v47 = vld [vmem:[%s1619_s1 + $0x1a8] sm:$0xff]   ;;  %v1269_v51 = vld [vmem:[%s1619_s1 + $0x1a0] sm:$0xff]   ;;  %v1271_v53 = vld [vmem:[%s1619_s1 + $0x118] sm:$0xff]  }
  0x13   :  { %v1272_v54 = vld [vmem:[%s1620_s0 + $0x4c] ss:$36 sps:$4 sm:$0xff]   ;;  %v1274_v55 = vld [vmem:[%s1620_s0 + $0x54] ss:$36 sps:$4 sm:$0xff]   ;;  %v1288_v4 = vld [vmem:[%s1619_s1 + $0x140] sm:$0xff]  }
  0x14   :  { %1083 = vmatpush3.bf16.msra.mxu0 %v1234_v18  ;;  %v1276_v56 = vld [vmem:[%s1619_s1 + $0x1d8] sm:$0xff]   ;;  %v1277_v57 = vld [vmem:[%s1620_s0 + $0x48] ss:$36 sps:$4 sm:$0xff]   ;;  %v1278_v58 = vld [vmem:[%s1620_s0 + $0x50] ss:$36 sps:$4 sm:$0xff]  }
  0x15   :  { %1111 = vmatpush3.bf16.msra.mxu1 %v1235_v19  ;;  %1084 = vmatprep.subr.bf16.mxu0 %v1236_v20  ;;  %v1279_v59 = vld [vmem:[%s1619_s1 + $0x198] sm:$0xff]   ;;  %v1280_v60 = vld [vmem:[%s1619_s1 + $0x150] sm:$0xff]   ;;  %v1284_v0 = vld [vmem:[%s1619_s1 + $0x148] sm:$0xff]  }
  0x16   :  { %1112 = vmatprep.subr.bf16.mxu1 %v1237_v21  ;;  %v1281_v61 = vld [vmem:[%s1619_s1 + $0x110] sm:$0xff]   ;;  %v1285_v1 = vld [vmem:[%s1619_s1 + $0x108] sm:$0xff]   ;;  %v1289_v5 = vld [vmem:[%s1619_s1 + $0x100] sm:$0xff]  }
  0x17   :  { %v1282_v62 = vld [vmem:[%s1619_s1 + $0x1d0] sm:$0xff]   ;;  %v1286_v2 = vld [vmem:[%s1619_s1 + $0x1c8] sm:$0xff]   ;;  %v1290_v6 = vld [vmem:[%s1619_s1 + $0x1c0] sm:$0xff]  }
  0x18   :  { %1085 = vmatpush3.bf16.msra.mxu0 %v1238_v22  ;;  %v1283_v63 = vld [vmem:[%s1619_s1 + $0x190] sm:$0xff]   ;;  %v1287_v3 = vld [vmem:[%s1619_s1 + $0x188] sm:$0xff]   ;;  %v1294_v9 = vld [vmem:[%s1619_s1 + $0x180] sm:$0xff]  }
  0x19   :  { %1113 = vmatpush3.bf16.msra.mxu1 %v1239_v23  ;;  %1086 = vmatprep.subr.bf16.mxu0 %v1240_v24  ;;  %v1291_v7 = vld [vmem:[%s1620_s0 + $0x10] ss:$36 sps:$4 sm:$0xff]   ;;  %v1295_v10 = vld [vmem:[%s1619_s1 + $0x238] sm:$0xff]   ;;  %v1303_v16 = vld [vmem:[%s1619_s1 + $0x228] sm:$0xff]  }
  0x1a   :  { %1114 = vmatprep.subr.bf16.mxu1 %v1241_v25  ;;  %v1293_v8 = vld [vmem:[%s1620_s0 + $0x14] ss:$36 sps:$4 sm:$0xff]   ;;  %v1298_v12 = vld [vmem:[%s1620_s0 + $0x1c] ss:$36 sps:$4 sm:$0xff]   ;;  %v1304_v17 = vld [vmem:[%s1620_s0 + $0x64] ss:$36 sps:$4 sm:$0xff]  }
  0x1b   :  { %v1296_v11 = vld [vmem:[%s1620_s0 + $0x18] ss:$36 sps:$4 sm:$0xff]   ;;  %v1299_v13 = vld [vmem:[%s1619_s1 + $0x230] sm:$0xff]   ;;  %v1306_v18 = vld [vmem:[%s1620_s0 + $0x60] ss:$36 sps:$4 sm:$0xff]  }
  0x1c   :  { %1087 = vmatpush3.bf16.msra.mxu0 %v1242_v26  ;;  %v1300_v14 = vld [vmem:[%s1620_s0 + $0x5c] ss:$36 sps:$4 sm:$0xff]   ;;  %v1309_v22 = vld [vmem:[%s1619_s1 + $0x210] sm:$0xff]   ;;  %v1310_v23 = vld [vmem:[%s1619_s1 + $0x208] sm:$0xff]  }
  0x1d   :  { %1115 = vmatpush3.bf16.msra.mxu1 %v1243_v27  ;;  %1088 = vmatprep.subr.bf16.mxu0 %v1244_v28  ;;  %v1302_v15 = vld [vmem:[%s1620_s0 + $0x58] ss:$36 sps:$4 sm:$0xff]   ;;  %v1307_v19 = vld [vmem:[%s1619_s1 + $0x220] sm:$0xff]   ;;  %v1313_v25 = vld [vmem:[%s1620_s0 + $0x68] ss:$36 sps:$4 sm:$0xff]  }
  0x1e   :  { %1116 = vmatprep.subr.bf16.mxu1 %v1245_v29  ;;  %v1308_v20 = vld [vmem:[%s1619_s1 + $0x218] sm:$0xff]   ;;  %v1312_v21 = vld [vmem:[%s1620_s0 + $0x20] ss:$36 sps:$4 sm:$0xff]  }
  0x1f   :  { %v1311_v24 = vld [vmem:[%s1619_s1 + $0x200] sm:$0xff]  }
  0x20   :  { %1089 = vmatpush3.bf16.msra.mxu0 %v1246_v30 }
  0x21   :  { %1117 = vmatpush3.bf16.msra.mxu1 %v1247_v31  ;;  %1130 = vmatprep.subr.bf16.mxu0 %v1254_v36 }
  0x22   :  { %1158 = vmatprep.subr.bf16.mxu1 %v1256_v38 }
  0x23   :  { %735 = vmatmul.mubr.bf16.vlgmr.msra.gmra.mxu0 %v1248_v32 }
  0x24   :  { %784 = vmatmul.mubr.bf16.vlgmr.msra.gmra.mxu1 %v1251_v34  ;;  %1131 = vmatpush3.bf16.msra.mxu0 %v1255_v37 }
  0x25   :  { %1159 = vmatpush3.bf16.msra.mxu1 %v1257_v39  ;;  %1132 = vmatprep.subr.bf16.mxu0 %v1258_v40 }
  0x26   :  { %1160 = vmatprep.subr.bf16.mxu1 %v1260_v42  ;;  %742 = vmatprep.mubr.bf16.mxu0 %v1272_v54 }
  0x27   :  { %791 = vmatprep.mubr.bf16.mxu1 %v1274_v55 }
  0x28   :  { %1133 = vmatpush3.bf16.msra.mxu0 %v1259_v41 }
  0x29   :  { %1161 = vmatpush3.bf16.msra.mxu1 %v1261_v43  ;;  %1134 = vmatprep.subr.bf16.mxu0 %v1262_v44 }
  0x2a   :  { %1162 = vmatprep.subr.bf16.mxu1 %v1264_v46 }
  0x2b   :  { %743 = vmatmul.mubr.bf16.gmra.mxu0 %v1277_v57 }
  0x2c   :  { %1135 = vmatpush3.bf16.msra.mxu0 %v1263_v45  ;;  %792 = vmatmul.mubr.bf16.gmra.mxu1 %v1278_v58 }
  0x2d   :  { %1163 = vmatpush3.bf16.msra.mxu1 %v1265_v47  ;;  %1136 = vmatprep.subr.bf16.mxu0 %v1266_v48 }
  0x2e   :  { %1164 = vmatprep.subr.bf16.mxu1 %v1268_v50  ;;  %832 = vmatprep.mubr.bf16.mxu0 %v1293_v8 }
  0x2f   :  { %881 = vmatprep.mubr.bf16.mxu1 %v1298_v12 }
  0x30   :  { %1137 = vmatpush3.bf16.msra.mxu0 %v1267_v49 }
  0x31   :  { %1165 = vmatpush3.bf16.msra.mxu1 %v1269_v51  ;;  %1138 = vmatprep.subr.bf16.mxu0 %v1270_v52 }
  0x32   :  { %1166 = vmatprep.subr.bf16.mxu1 %v1276_v56 }
  0x34   :  { %1139 = vmatpush3.bf16.msra.mxu0 %v1271_v53 }
  0x35   :  { %1167 = vmatpush3.bf16.msra.mxu1 %v1279_v59  ;;  %1140 = vmatprep.subr.bf16.mxu0 %v1280_v60 }
  0x36   :  { %1168 = vmatprep.subr.bf16.mxu1 %v1282_v62 }
  0x38   :  { %1141 = vmatpush3.bf16.msra.mxu0 %v1281_v61 }
  0x39   :  { %1169 = vmatpush3.bf16.msra.mxu1 %v1283_v63  ;;  %1142 = vmatprep.subr.bf16.mxu0 %v1284_v0 }
  0x3a   :  { %1170 = vmatprep.subr.bf16.mxu1 %v1286_v2 }
  0x3c   :  { %1143 = vmatpush3.bf16.msra.mxu0 %v1285_v1 }
  0x3d   :  { %1171 = vmatpush3.bf16.msra.mxu1 %v1287_v3  ;;  %1144 = vmatprep.subr.bf16.mxu0 %v1288_v4 }
  0x3e   :  { %1172 = vmatprep.subr.bf16.mxu1 %v1290_v6 }
  0x40   :  { %1145 = vmatpush3.bf16.msra.mxu0 %v1289_v5 }
  0x41   :  { %1173 = vmatpush3.bf16.msra.mxu1 %v1294_v9  ;;  %1196 = vmatprep.subr.bf16.mxu0 %v1295_v10 }
  0x43   :  { %833 = vmatmul.mubr.bf16.vlgmr.msra.gmra.mxu0 %v1291_v7 }
  0x44   :  { %1197 = vmatpush3.bf16.msra.mxu0 %v1295_v10  ;;  %882 = vmatmul.mubr.bf16.vlgmr.msra.gmra.mxu1 %v1296_v11 }
  0x45   :  { %1198 = vmatprep.subr.bf16.mxu0 %v1299_v13  ;;  %840 = vmatprep.mubr.bf16.mxu0 %v1300_v14 }
  0x46   :  { %889 = vmatprep.mubr.bf16.mxu1 %v1304_v17 }
  0x48   :  { %1199 = vmatpush3.bf16.msra.mxu0 %v1299_v13 }
  0x49   :  { %1200 = vmatprep.subr.bf16.mxu0 %v1303_v16 }
  0x4b   :  { %841 = vmatmul.mubr.bf16.gmra.mxu0 %v1302_v15 }
  0x4c   :  { %1201 = vmatpush3.bf16.msra.mxu0 %v1303_v16  ;;  %890 = vmatmul.mubr.bf16.gmra.mxu1 %v1306_v18 }
  0x4d   :  { %1202 = vmatprep.subr.bf16.mxu0 %v1307_v19  ;;  %1212 = vmatprep.mubr.bf16.mxu0 %v1312_v21 }
  0x50   :  { %1203 = vmatpush3.bf16.msra.mxu0 %v1307_v19 }
  0x51   :  { %1204 = vmatprep.subr.bf16.mxu0 %v1308_v20 }
  0x54   :  { %1205 = vmatpush3.bf16.msra.mxu0 %v1308_v20 }
  0x55   :  { %1206 = vmatprep.subr.bf16.mxu0 %v1309_v22 }
  0x58   :  { %1207 = vmatpush3.bf16.msra.mxu0 %v1309_v22 }
  0x59   :  { %1208 = vmatprep.subr.bf16.mxu0 %v1310_v23 }
  0x5c   :  { %1209 = vmatpush3.bf16.msra.mxu0 %v1310_v23 }
  0x5d   :  { %1210 = vmatprep.subr.bf16.mxu0 %v1311_v24 }
  0x60   :  { %1211 = vmatpush3.bf16.msra.mxu0 %v1311_v24 }
  0x63   :  { %1213 = vmatmul.mubr.bf16.vlgmr.msra.gmra.mxu0 %v1313_v25 }
  0xe3   :  { %v1090_v26 = vpop.f32.mrf.mxu0 }
  0xe4   :  { %v1118_v27 = vpop.f32.mrf.mxu1 }
  0xe5   :  { %v1091_v28 = vpop.f32.mrf.mxu0 }
  0xe6   :  { %v1119_v29 = vpop.f32.mrf.mxu1  ;;  %v1092_v57 = vadd.f32 %v1091_v28, %v1090_v26 }
  0xe7   :  { %v1093_v30 = vpop.f32.mrf.mxu0  ;;  %v1120_v58 = vadd.f32 %v1119_v29, %v1118_v27 }
  0xe8   :  { %v1121_v31 = vpop.f32.mrf.mxu1 }
  0xe9   :  { %v1094_v32 = vpop.f32.mrf.mxu0  ;;  %v786_v2 = vadd.f32 %v1120_v58, %v1092_v57 }
  0xea   :  { %v1122_v34 = vpop.f32.mrf.mxu1  ;;  %v1095_v3 = vadd.f32 %v1094_v32, %v1093_v30 }
  0xeb   :  { %v1096_v33 = vpop.f32.mrf.mxu0  ;;  %v1123_v4 = vadd.f32 %v1122_v34, %v1121_v31 }
  0xec   :  { %v1124_v35 = vpop.f32.mrf.mxu1 }
  0xed   :  { %v1097_v36 = vpop.f32.mrf.mxu0  ;;  %v789_v13 = vadd.f32 %v1123_v4, %v1095_v3 }
  0xee   :  { %v1125_v37 = vpop.f32.mrf.mxu1  ;;  %v1098_v55 = vadd.f32 %v1097_v36, %v1096_v33 }
  0xef   :  { %v1099_v38 = vpop.f32.mrf.mxu0  ;;  %v1126_v56 = vadd.f32 %v1125_v37, %v1124_v35 }
  0xf0   :  { %v1127_v39 = vpop.f32.mrf.mxu1 }
  0xf1   :  { %v1100_v40 = vpop.f32.mrf.mxu0  ;;  %v794_v62 = vadd.f32 %v1126_v56, %v1098_v55 }
  0xf2   :  { %v1128_v42 = vpop.f32.mrf.mxu1  ;;  %v1101_v63 = vadd.f32 %v1100_v40, %v1099_v38 }
  0xf3   :  { %v1129_v0 = vadd.f32 %v1128_v42, %v1127_v39 }
  0xf5   :  { %v797_v9 = vadd.f32 %v1129_v0, %v1101_v63 }
 0x103   :  { %v1146_v41 = vpop.f32.mrf.mxu0 }
 0x104   :  { %v1174_v44 = vpop.f32.mrf.mxu1 }
 0x105   :  { %v1147_v43 = vpop.f32.mrf.mxu0 }
 0x106   :  { %v1175_v46 = vpop.f32.mrf.mxu1  ;;  %v1148_v1 = vadd.f32 %v1147_v43, %v1146_v41 }
 0x107   :  { %v1149_v45 = vpop.f32.mrf.mxu0  ;;  %v1176_v11 = vadd.f32 %v1175_v46, %v1174_v44 }
 0x108   :  { %v1177_v48 = vpop.f32.mrf.mxu1  ;;  %v835_v10 = vadd.f32 %v1148_v1, %v786_v2 }
 0x109   :  { %v1150_v47 = vpop.f32.mrf.mxu0 }
 0x10a   :  { %v1178_v50 = vpop.f32.mrf.mxu1  ;;  %v1151_v12 = vadd.f32 %v1150_v47, %v1149_v45  ;;  %v884_v21 = vadd.f32 %v1176_v11, %v835_v10 }
 0x10b   :  { %v1152_v49 = vpop.f32.mrf.mxu0  ;;  %v1179_v19 = vadd.f32 %v1178_v50, %v1177_v48 }
 0x10c   :  { %v1180_v52 = vpop.f32.mrf.mxu1  ;;  %v838_v18 = vadd.f32 %v1151_v12, %v789_v13 }
 0x10d   :  { %v1153_v51 = vpop.f32.mrf.mxu0 }
 0x10e   :  { %v1181_v54 = vpop.f32.mrf.mxu1  ;;  %v1154_v59 = vadd.f32 %v1153_v51, %v1152_v49  ;;  %v887_v27 = vadd.f32 %v1179_v19, %v838_v18 }
 0x10f   :  { %v1155_v53 = vpop.f32.mrf.mxu0  ;;  %v1182_v6 = vadd.f32 %v1181_v54, %v1180_v52 }
 0x110   :  { %v1183_v61 = vpop.f32.mrf.mxu1  ;;  %v843_v5 = vadd.f32 %v1154_v59, %v794_v62 }
 0x111   :  { %v1156_v60 = vpop.f32.mrf.mxu0 }
 0x112   :  { %v1157_v7 = vadd.f32 %v1156_v60, %v1155_v53  ;;  %v1184_v8 = vpop.f32.mrf.mxu1  ;;  %v892_v16 = vadd.f32 %v1182_v6, %v843_v5 }
 0x113   :  { %v1185_v15 = vadd.f32 %v1184_v8, %v1183_v61 }
 0x114   :  { %v846_v14 = vadd.f32 %v1157_v7, %v797_v9 }
 0x116   :  { %v895_v24 = vadd.f32 %v1185_v15, %v846_v14 }
 0x123   :  { %v1214_v17 = vpop.f32.mrf.mxu0 }
 0x124   :  { %v941_v20 = vadd.f32 %v1214_v17, %v892_v16 }
 0x125   :  { %v932_v22 = vpop.f32.mrf.mxu0 }
 0x126   :  { %949 = vst [vmem:[%s1621_s2 + $0x10] sm:$0xff] %v941_v20  ;;  %v933_v23 = vadd.f32 %v932_v22, %v884_v21  ;;  %v962_v33 = vmul.f32 %v941_v20, %v941_v20 }
 0x127   :  { %v1215_v25 = vpop.f32.mrf.mxu0 }
 0x128   :  { %947 = vst [vmem:[%s1621_s2] sm:$0xff] %v933_v23  ;;  %v944_v26 = vadd.f32 %v1215_v25, %v895_v24  ;;  %v960_v30 = vmul.f32 %v933_v23, %v933_v23 }
 0x129   :  { %v935_v28 = vpop.f32.mrf.mxu0 }
 0x12a   :  { %950 = vst [vmem:[%s1621_s2 + $0x18] sm:$0xff] %v944_v26  ;;  %v936_v29 = vadd.f32 %v935_v28, %v887_v27  ;;  %v963_v36 = vmul.f32 %v944_v26, %v944_v26 }
 0x12c   :  { %948 = vst [vmem:[%s1621_s2 + $0x8] sm:$0xff] %v936_v29  ;;  %v951_v31 = vadd.f32 %v936_v29, %v933_v23  ;;  %v961_v32 = vmul.f32 %v936_v29, %v936_v29 }
 0x12e   :  { %v952_v34 = vadd.f32 %v951_v31, %v941_v20  ;;  %v964_v35 = vadd.f32 %v961_v32, %v960_v30 }
 0x130   :  { %v953_v37 = vadd.f32 %v952_v34, %v944_v26  ;;  %v965_v38 = vadd.f32 %v964_v35, %v962_v33 }
 0x132   :  { %v954_v39 = vrot.slane %v953_v37, 4  ;;  %v966_v40 = vadd.f32 %v965_v38, %v963_v36 }
 0x134   :  { %v955_v41 = vadd.f32 %v954_v39, %v953_v37  ;;  %v967_v42 = vrot.slane %v966_v40, 4 }
 0x136   :  { %v956_v43 = vrot.slane %v955_v41, 2  ;;  %v968_v44 = vadd.f32 %v967_v42, %v966_v40 }
 0x138   :  { %v957_v45 = vadd.f32 %v956_v43, %v955_v41  ;;  %v969_v46 = vrot.slane %v968_v44, 2 }
 0x13a   :  { %v958_v47 = vrot.slane %v957_v45, 1  ;;  %v970_v48 = vadd.f32 %v969_v46, %v968_v44 }
 0x13c   :  { %v971_v49 = vrot.slane %v970_v48, 1  ;;  %v959_v50 = vadd.f32 %v958_v47, %v957_v45 }
 0x13e   :  { %v972_v51 = vadd.f32 %v971_v49, %v970_v48 }
 0x140   :  { %v974_v52 = vsel %vm973_vm0, %v959_v50, %v972_v51 }
 0x141   :  { %975 = vst [vmem:[%s1622_s3] sm:$0x3] %v974_v52 }

// kernel: _lambda_.70
= control target key start
LH: loop header
LB: loop body
LE: loop exit
PB: predicated region body
PF: predicated region fallthrough
CT: control target
= control target key end

     0   :  { %v191_v0 = vmov 0.0   ;;  %vm192_vm0 = vmmov 0   ;;  %vm133_vm1 = vcmask 1040384   ;;  %s246_s1 = inlined_call_operand.vmem [shape: bf16[128,128], index: 1, kind: input, shape index: {}]   ;;  %s247_s0 = inlined_call_operand.vmem [shape: bf16[8,128], index: 0, kind: input, shape index: {}]   ;;  %s248_s2 = inlined_call_operand.vmem [shape: f32[8,128], index: 2, kind: output, shape index: {0}]   ;;  %s249_s3 = inlined_call_operand.vmem [shape: f32[1,2,128], index: 3, kind: output, shape index: {1}]  }
   0x1   :  { %161 = vmatprep.subr.bf16.mxu0 %v191_v0  ;;  %v183_v1 = vld [vmem:[%s246_s1 + $0x38] sm:$0xff]   ;;  %177 = vmatprep.mubr.msk.bf16.mxu0 %vm192_vm0, %v191_v0  ;;  %v184_v2 = vld [vmem:[%s246_s1 + $0x30] sm:$0xff]   ;;  %v185_v3 = vld [vmem:[%s246_s1 + $0x28] sm:$0xff]  }
   0x2   :  { %162 = vmatpush3.bf16.msra.mxu0 %v183_v1  ;;  %v186_v4 = vld [vmem:[%s246_s1 + $0x20] sm:$0xff]   ;;  %v187_v5 = vld [vmem:[%s246_s1 + $0x18] sm:$0xff]   ;;  %v188_v6 = vld [vmem:[%s246_s1 + $0x10] sm:$0xff]  }
   0x3   :  { %163 = vmatprep.subr.bf16.mxu0 %v191_v0  ;;  %v189_v7 = vld [vmem:[%s246_s1 + $0x8] sm:$0xff]   ;;  %v190_v8 = vld [vmem:[%s246_s1] sm:$0xff]  }
   0x4   :  { %v14_v9 = vld [vmem:[%s247_s0] sm:$0xf] }
   0x6   :  { %164 = vmatpush3.bf16.msra.mxu0 %v184_v2 }
   0x7   :  { %165 = vmatprep.subr.bf16.mxu0 %v191_v0 }
   0xa   :  { %166 = vmatpush3.bf16.msra.mxu0 %v185_v3 }
   0xb   :  { %167 = vmatprep.subr.bf16.mxu0 %v191_v0 }
   0xe   :  { %168 = vmatpush3.bf16.msra.mxu0 %v186_v4 }
   0xf   :  { %169 = vmatprep.subr.bf16.mxu0 %v191_v0 }
  0x12   :  { %170 = vmatpush3.bf16.msra.mxu0 %v187_v5 }
  0x13   :  { %171 = vmatprep.subr.bf16.mxu0 %v191_v0 }
  0x16   :  { %172 = vmatpush3.bf16.msra.mxu0 %v188_v6 }
  0x17   :  { %173 = vmatprep.subr.bf16.mxu0 %v191_v0 }
  0x1a   :  { %174 = vmatpush3.bf16.msra.mxu0 %v189_v7 }
  0x1b   :  { %175 = vmatprep.subr.bf16.mxu0 %v191_v0 }
  0x1e   :  { %176 = vmatpush3.bf16.msra.mxu0 %v190_v8 }
  0x21   :  { %178 = vmatmul.mubr.bf16.vlgmr.msra.gmra.mxu0 %v14_v9 }
  0xe1   :  { %v113_v10 = vpop.f32.mrf.mxu0 }
  0xe2   :  { %119 = vst [vmem:[%s248_s2] sm:$0xff] %v113_v10  ;;  %v120_v11 = vrot.slane %v113_v10, 4  ;;  %v126_v12 = vmul.f32 %v113_v10, %v113_v10 }
  0xe3   :  { %v179_v13 = vpop.f32.mrf.mxu0 }
  0xe4   :  { %v121_v14 = vadd.f32 %v120_v11, %v113_v10  ;;  %v127_v15 = vrot.slane %v126_v12, 4 }
  0xe5   :  { %v116_v16 = vpop.f32.mrf.mxu0 }
  0xe6   :  { %v122_v17 = vrot.slane %v121_v14, 2  ;;  %v128_v18 = vadd.f32 %v127_v15, %v126_v12 }
  0xe7   :  { %v180_v19 = vpop.f32.mrf.mxu0 }
  0xe8   :  { %v123_v20 = vadd.f32 %v122_v17, %v121_v14  ;;  %v129_v21 = vrot.slane %v128_v18, 2 }
  0xea   :  { %v124_v22 = vrot.slane %v123_v20, 1  ;;  %v130_v23 = vadd.f32 %v129_v21, %v128_v18 }
  0xec   :  { %v131_v24 = vrot.slane %v130_v23, 1  ;;  %v125_v25 = vadd.f32 %v124_v22, %v123_v20 }
  0xee   :  { %v132_v26 = vadd.f32 %v131_v24, %v130_v23 }
  0xf0   :  { %v134_v27 = vsel %vm133_vm1, %v125_v25, %v132_v26 }
  0xf1   :  { %135 = vst [vmem:[%s249_s3] sm:$0x3] %v134_v27 }

// kernel: _lambda_.68
= control target key start
LH: loop header
LB: loop body
LE: loop exit
PB: predicated region body
PF: predicated region fallthrough
CT: control target
= control target key end

     0   :  { %s71_s0 = inlined_call_operand.vmem [shape: f32[8,128], index: 0, kind: input, shape index: {}]   ;;  %s72_s1 = inlined_call_operand.vmem [shape: f32[1,128], index: 1, kind: input, shape index: {}]   ;;  %s73_s2 = inlined_call_operand.vmem [shape: f32[1,128], index: 2, kind: input, shape index: {}]   ;;  %s74_s3 = inlined_call_operand.vmem [shape: f32[8,128], index: 3, kind: output, shape index: {}]  }
   0x1   :  { %v14_v0 = vld [vmem:[%s71_s0] sm:$0xff] }
   0x2   :  { %v37_v1 = vld [vmem:[%s72_s1] ss:$0 sm:$0xff] }
   0x3   :  { %v38_v2 = vld [vmem:[%s73_s2] ss:$0 sm:$0xff]  ;;  %v22_v3 = vmul.f32 %v37_v1, %v14_v0 }
   0x5   :  { %v30_v4 = vadd.f32 %v38_v2, %v22_v3 }
   0x7   :  { %v31_v5 = vmax.f32 %v30_v4, 0.0 }
   0x9   :  { %32 = vst [vmem:[%s74_s3] sm:$0xff] %v31_v5 }

// kernel: _lambda_.71
= control target key start
LH: loop header
LB: loop body
LE: loop exit
PB: predicated region body
PF: predicated region fallthrough
CT: control target
= control target key end

     0   :  { %s124_s0 = inlined_call_operand.vmem [shape: f32[8,128], index: 0, kind: input, shape index: {}]   ;;  %s125_s1 = inlined_call_operand.vmem [shape: f32[8,128], index: 1, kind: input, shape index: {}]   ;;  %s126_s2 = inlined_call_operand.vmem [shape: f32[1,128], index: 2, kind: input, shape index: {}]   ;;  %s127_s3 = inlined_call_operand.vmem [shape: f32[1,128], index: 3, kind: input, shape index: {}]   ;;  %s128_s4 = inlined_call_operand.vmem [shape: f32[1,128], index: 4, kind: input, shape index: {}]   ;;  %s129_s5 = inlined_call_operand.vmem [shape: f32[1,128], index: 5, kind: input, shape index: {}]   ;;  %s130_s6 = inlined_call_operand.vmem [shape: f32[8,128], index: 6, kind: output, shape index: {}]  }
   0x1   :  { %v23_v0 = vld [vmem:[%s124_s0] sm:$0xff] }
   0x2   :  { %v64_v1 = vld [vmem:[%s126_s2] ss:$0 sm:$0xff] }
   0x3   :  { %v65_v2 = vld [vmem:[%s127_s3] ss:$0 sm:$0xff]  ;;  %v31_v3 = vmul.f32 %v64_v1, %v23_v0 }
   0x4   :  { %v40_v4 = vld [vmem:[%s125_s1] sm:$0xff] }
   0x5   :  { %v66_v5 = vld [vmem:[%s128_s4] ss:$0 sm:$0xff]  ;;  %v39_v7 = vadd.f32 %v65_v2, %v31_v3 }
   0x6   :  { %v48_v6 = vmul.f32 %v66_v5, %v40_v4  ;;  %v67_v8 = vld [vmem:[%s129_s5] ss:$0 sm:$0xff] }
   0x8   :  { %v49_v9 = vadd.f32 %v48_v6, %v39_v7 }
   0xa   :  { %v57_v10 = vadd.f32 %v67_v8, %v49_v9 }
   0xc   :  { %v58_v11 = vmax.f32 %v57_v10, 0.0 }
   0xe   :  { %59 = vst [vmem:[%s130_s6] sm:$0xff] %v58_v11 }

// kernel: _lambda_.67
= control target key start
LH: loop header
LB: loop body
LE: loop exit
PB: predicated region body
PF: predicated region fallthrough
CT: control target
= control target key end

     0   :  { %vm1134_vm0 = vmmov 0   ;;  %vm841_vm1 = vcmask 1040384   ;;  %s1392_s1 = inlined_call_operand.vmem [shape: bf16[1152,128], index: 1, kind: input, shape index: {}]   ;;  %s1393_s0 = inlined_call_operand.vmem [shape: bf16[8,1152], index: 0, kind: input, shape index: {}]   ;;  %s1394_s2 = inlined_call_operand.vmem [shape: f32[8,128], index: 2, kind: output, shape index: {0}]   ;;  %s1395_s3 = inlined_call_operand.vmem [shape: f32[1,2,128], index: 3, kind: output, shape index: {1}]  }
   0x1   :  { %v1052_v0 = vld [vmem:[%s1392_s1 + $0x78] sm:$0xff]   ;;  %v1056_v4 = vld [vmem:[%s1392_s1 + $0x70] sm:$0xff]   ;;  %v1060_v8 = vld [vmem:[%s1392_s1 + $0x68] sm:$0xff]  }
   0x2   :  { %v1053_v1 = vld [vmem:[%s1392_s1 + $0xf8] sm:$0xff]   ;;  %933 = vmatprep.subr.bf16.mxu0 %v1052_v0  ;;  %v1057_v5 = vld [vmem:[%s1392_s1 + $0xf0] sm:$0xff]   ;;  %v1061_v9 = vld [vmem:[%s1392_s1 + $0xe8] sm:$0xff]  }
   0x3   :  { %v1054_v2 = vld [vmem:[%s1392_s1 + $0x38] sm:$0xff]   ;;  %955 = vmatprep.subr.bf16.mxu1 %v1053_v1  ;;  %v1058_v6 = vld [vmem:[%s1392_s1 + $0x30] sm:$0xff]   ;;  %v1062_v10 = vld [vmem:[%s1392_s1 + $0x28] sm:$0xff]  }
   0x4   :  { %v1055_v3 = vld [vmem:[%s1392_s1 + $0xb8] sm:$0xff]   ;;  %934 = vmatpush3.bf16.msra.mxu0 %v1054_v2  ;;  %v1059_v7 = vld [vmem:[%s1392_s1 + $0xb0] sm:$0xff]   ;;  %v1063_v11 = vld [vmem:[%s1392_s1 + $0xa8] sm:$0xff]  }
   0x5   :  { %956 = vmatpush3.bf16.msra.mxu1 %v1055_v3  ;;  %935 = vmatprep.subr.bf16.mxu0 %v1056_v4  ;;  %v1064_v12 = vld [vmem:[%s1392_s1 + $0x60] sm:$0xff]   ;;  %v1068_v16 = vld [vmem:[%s1392_s1 + $0x58] sm:$0xff]   ;;  %v1072_v20 = vld [vmem:[%s1392_s1 + $0x50] sm:$0xff]  }
   0x6   :  { %957 = vmatprep.subr.bf16.mxu1 %v1057_v5  ;;  %v1065_v13 = vld [vmem:[%s1392_s1 + $0xe0] sm:$0xff]   ;;  %v1069_v17 = vld [vmem:[%s1392_s1 + $0xd8] sm:$0xff]   ;;  %v1073_v21 = vld [vmem:[%s1392_s1 + $0xd0] sm:$0xff]  }
   0x7   :  { %v1066_v14 = vld [vmem:[%s1392_s1 + $0x20] sm:$0xff]   ;;  %v1070_v18 = vld [vmem:[%s1392_s1 + $0x18] sm:$0xff]   ;;  %v1074_v22 = vld [vmem:[%s1392_s1 + $0x10] sm:$0xff]  }
   0x8   :  { %936 = vmatpush3.bf16.msra.mxu0 %v1058_v6  ;;  %v1067_v15 = vld [vmem:[%s1392_s1 + $0xa0] sm:$0xff]   ;;  %v1071_v19 = vld [vmem:[%s1392_s1 + $0x98] sm:$0xff]   ;;  %v1075_v23 = vld [vmem:[%s1392_s1 + $0x90] sm:$0xff]  }
   0x9   :  { %958 = vmatpush3.bf16.msra.mxu1 %v1059_v7  ;;  %937 = vmatprep.subr.bf16.mxu0 %v1060_v8  ;;  %v1076_v24 = vld [vmem:[%s1392_s1 + $0x48] sm:$0xff]   ;;  %v1080_v28 = vld [vmem:[%s1392_s1 + $0x40] sm:$0xff]   ;;  %v1088_v38 = vld [vmem:[%s1392_s1 + $0x178] sm:$0xff]  }
   0xa   :  { %959 = vmatprep.subr.bf16.mxu1 %v1061_v9  ;;  %v1077_v25 = vld [vmem:[%s1392_s1 + $0xc8] sm:$0xff]   ;;  %v1081_v29 = vld [vmem:[%s1392_s1 + $0xc0] sm:$0xff]   ;;  %v1089_v39 = vld [vmem:[%s1392_s1 + $0x138] sm:$0xff]  }
   0xb   :  { %v1078_v26 = vld [vmem:[%s1392_s1 + $0x8] sm:$0xff]   ;;  %v1082_v30 = vld [vmem:[%s1392_s1] sm:$0xff]   ;;  %v1090_v40 = vld [vmem:[%s1392_s1 + $0x1f8] sm:$0xff]  }
   0xc   :  { %938 = vmatpush3.bf16.msra.mxu0 %v1062_v10  ;;  %v1079_v27 = vld [vmem:[%s1392_s1 + $0x88] sm:$0xff]   ;;  %v1083_v31 = vld [vmem:[%s1392_s1 + $0x80] sm:$0xff]   ;;  %v1091_v41 = vld [vmem:[%s1392_s1 + $0x1b8] sm:$0xff]  }
   0xd   :  { %960 = vmatpush3.bf16.msra.mxu1 %v1063_v11  ;;  %939 = vmatprep.subr.bf16.mxu0 %v1064_v12  ;;  %v14_v32 = vld [vmem:[%s1393_s0] sm:$0xff]  ;;  %v15_v33 = vld [vmem:[%s1393_s0 + $0x8] sm:$0xff]  ;;  %v1092_v42 = vld [vmem:[%s1392_s1 + $0x170] sm:$0xff]  }
   0xe   :  { %961 = vmatprep.subr.bf16.mxu1 %v1065_v13  ;;  %v852_v34 = vcombine.low %v14_v32, %v14_v32  ;;  %v853_v35 = vcombine.high %v14_v32, %v14_v32  ;;  %v854_v36 = vcombine.low %v15_v33, %v15_v33  ;;  %v855_v37 = vcombine.high %v15_v33, %v15_v33  ;;  %v1093_v43 = vld [vmem:[%s1392_s1 + $0x130] sm:$0xff]   ;;  %v1096_v46 = vld [vmem:[%s1392_s1 + $0x168] sm:$0xff]   ;;  %v1100_v50 = vld [vmem:[%s1392_s1 + $0x160] sm:$0xff]  }
   0xf   :  { %v1094_v44 = vld [vmem:[%s1392_s1 + $0x1f0] sm:$0xff]   ;;  %v1097_v47 = vld [vmem:[%s1392_s1 + $0x128] sm:$0xff]   ;;  %v1101_v51 = vld [vmem:[%s1392_s1 + $0x120] sm:$0xff]   ;;  %v1133_v13 = vmov 0.0  }
  0x10   :  { %940 = vmatpush3.bf16.msra.mxu0 %v1066_v14  ;;  %659 = vmatprep.mubr.bf16.mxu0 %v853_v35  ;;  %v1095_v45 = vld [vmem:[%s1392_s1 + $0x1b0] sm:$0xff]   ;;  %v1098_v48 = vld [vmem:[%s1392_s1 + $0x1e8] sm:$0xff]   ;;  %v1102_v52 = vld [vmem:[%s1392_s1 + $0x1e0] sm:$0xff]  }
  0x11   :  { %962 = vmatpush3.bf16.msra.mxu1 %v1067_v15  ;;  %941 = vmatprep.subr.bf16.mxu0 %v1068_v16  ;;  %v1099_v49 = vld [vmem:[%s1392_s1 + $0x1a8] sm:$0xff]   ;;  %v1103_v53 = vld [vmem:[%s1392_s1 + $0x1a0] sm:$0xff]   ;;  %v1104_v54 = vld [vmem:[%s1392_s1 + $0x158] sm:$0xff]  }
  0x12   :  { %963 = vmatprep.subr.bf16.mxu1 %v1069_v17  ;;  %699 = vmatprep.mubr.bf16.mxu1 %v855_v37  ;;  %v1105_v55 = vld [vmem:[%s1392_s1 + $0x118] sm:$0xff]   ;;  %v1108_v58 = vld [vmem:[%s1392_s1 + $0x150] sm:$0xff]   ;;  %v1112_v62 = vld [vmem:[%s1392_s1 + $0x148] sm:$0xff]  }
  0x13   :  { %v1106_v56 = vld [vmem:[%s1392_s1 + $0x1d8] sm:$0xff]   ;;  %v1109_v59 = vld [vmem:[%s1392_s1 + $0x110] sm:$0xff]   ;;  %v1113_v63 = vld [vmem:[%s1392_s1 + $0x108] sm:$0xff]  }
  0x14   :  { %942 = vmatpush3.bf16.msra.mxu0 %v1070_v18  ;;  %v1107_v57 = vld [vmem:[%s1392_s1 + $0x198] sm:$0xff]   ;;  %v1110_v60 = vld [vmem:[%s1392_s1 + $0x1d0] sm:$0xff]   ;;  %v1114_v0 = vld [vmem:[%s1392_s1 + $0x1c8] sm:$0xff]  }
  0x15   :  { %964 = vmatpush3.bf16.msra.mxu1 %v1071_v19  ;;  %943 = vmatprep.subr.bf16.mxu0 %v1072_v20  ;;  %v1111_v61 = vld [vmem:[%s1392_s1 + $0x190] sm:$0xff]   ;;  %v1115_v1 = vld [vmem:[%s1392_s1 + $0x188] sm:$0xff]   ;;  %v1116_v2 = vld [vmem:[%s1392_s1 + $0x140] sm:$0xff]  }
  0x16   :  { %965 = vmatprep.subr.bf16.mxu1 %v1073_v21  ;;  %v1117_v3 = vld [vmem:[%s1392_s1 + $0x100] sm:$0xff]   ;;  %v16_v5 = vld [vmem:[%s1393_s0 + $0x10] sm:$0xff]  ;;  %v17_v9 = vld [vmem:[%s1393_s0 + $0x18] sm:$0xff] }
  0x17   :  { %v1118_v4 = vld [vmem:[%s1392_s1 + $0x1c0] sm:$0xff]   ;;  %v857_v6 = vcombine.high %v16_v5, %v16_v5  ;;  %v856_v8 = vcombine.low %v16_v5, %v16_v5  ;;  %v858_v10 = vcombine.low %v17_v9, %v17_v9  ;;  %v859_v11 = vcombine.high %v17_v9, %v17_v9  ;;  %v1124_v12 = vld [vmem:[%s1392_s1 + $0x238] sm:$0xff]   ;;  %v1125_v14 = vld [vmem:[%s1392_s1 + $0x230] sm:$0xff]  }
  0x18   :  { %944 = vmatpush3.bf16.msra.mxu0 %v1074_v22  ;;  %v1121_v7 = vld [vmem:[%s1392_s1 + $0x180] sm:$0xff]   ;;  %v1126_v15 = vld [vmem:[%s1392_s1 + $0x228] sm:$0xff]   ;;  %v1128_v17 = vld [vmem:[%s1392_s1 + $0x218] sm:$0xff]  }
  0x19   :  { %966 = vmatpush3.bf16.msra.mxu1 %v1075_v23  ;;  %945 = vmatprep.subr.bf16.mxu0 %v1076_v24  ;;  %v1127_v16 = vld [vmem:[%s1392_s1 + $0x220] sm:$0xff]   ;;  %v1129_v18 = vld [vmem:[%s1392_s1 + $0x210] sm:$0xff]   ;;  %v1130_v19 = vld [vmem:[%s1392_s1 + $0x208] sm:$0xff]  }
  0x1a   :  { %967 = vmatprep.subr.bf16.mxu1 %v1077_v25  ;;  %v1131_v20 = vld [vmem:[%s1392_s1 + $0x200] sm:$0xff]  }
  0x1b   :  { %v1132_v21 = vld [vmem:[%s1393_s0 + $0x20] ss:$0 sps:$4 sm:$0xff]  }
  0x1c   :  { %946 = vmatpush3.bf16.msra.mxu0 %v1078_v26 }
  0x1d   :  { %968 = vmatpush3.bf16.msra.mxu1 %v1079_v27  ;;  %947 = vmatprep.subr.bf16.mxu0 %v1080_v28 }
  0x1e   :  { %969 = vmatprep.subr.bf16.mxu1 %v1081_v29 }
  0x20   :  { %948 = vmatpush3.bf16.msra.mxu0 %v1082_v30 }
  0x21   :  { %970 = vmatpush3.bf16.msra.mxu1 %v1083_v31  ;;  %977 = vmatprep.subr.bf16.mxu0 %v1088_v38 }
  0x22   :  { %999 = vmatprep.subr.bf16.mxu1 %v1090_v40 }
  0x23   :  { %660 = vmatmul.mubr.bf16.vlgmr.msra.gmra.mxu0 %v852_v34 }
  0x24   :  { %700 = vmatmul.mubr.bf16.vlgmr.msra.gmra.mxu1 %v854_v36  ;;  %978 = vmatpush3.bf16.msra.mxu0 %v1089_v39 }
  0x25   :  { %1000 = vmatpush3.bf16.msra.mxu1 %v1091_v41  ;;  %979 = vmatprep.subr.bf16.mxu0 %v1092_v42 }
  0x26   :  { %1001 = vmatprep.subr.bf16.mxu1 %v1094_v44  ;;  %739 = vmatprep.mubr.bf16.mxu0 %v857_v6 }
  0x27   :  { %779 = vmatprep.mubr.bf16.mxu1 %v859_v11 }
  0x28   :  { %980 = vmatpush3.bf16.msra.mxu0 %v1093_v43 }
  0x29   :  { %1002 = vmatpush3.bf16.msra.mxu1 %v1095_v45  ;;  %981 = vmatprep.subr.bf16.mxu0 %v1096_v46 }
  0x2a   :  { %1003 = vmatprep.subr.bf16.mxu1 %v1098_v48 }
  0x2c   :  { %982 = vmatpush3.bf16.msra.mxu0 %v1097_v47 }
  0x2d   :  { %1004 = vmatpush3.bf16.msra.mxu1 %v1099_v49  ;;  %983 = vmatprep.subr.bf16.mxu0 %v1100_v50 }
  0x2e   :  { %1005 = vmatprep.subr.bf16.mxu1 %v1102_v52 }
  0x30   :  { %984 = vmatpush3.bf16.msra.mxu0 %v1101_v51 }
  0x31   :  { %1006 = vmatpush3.bf16.msra.mxu1 %v1103_v53  ;;  %985 = vmatprep.subr.bf16.mxu0 %v1104_v54 }
  0x32   :  { %1007 = vmatprep.subr.bf16.mxu1 %v1106_v56 }
  0x34   :  { %986 = vmatpush3.bf16.msra.mxu0 %v1105_v55 }
  0x35   :  { %1008 = vmatpush3.bf16.msra.mxu1 %v1107_v57  ;;  %987 = vmatprep.subr.bf16.mxu0 %v1108_v58 }
  0x36   :  { %1009 = vmatprep.subr.bf16.mxu1 %v1110_v60 }
  0x38   :  { %988 = vmatpush3.bf16.msra.mxu0 %v1109_v59 }
  0x39   :  { %1010 = vmatpush3.bf16.msra.mxu1 %v1111_v61  ;;  %989 = vmatprep.subr.bf16.mxu0 %v1112_v62 }
  0x3a   :  { %1011 = vmatprep.subr.bf16.mxu1 %v1114_v0 }
  0x3c   :  { %990 = vmatpush3.bf16.msra.mxu0 %v1113_v63 }
  0x3d   :  { %1012 = vmatpush3.bf16.msra.mxu1 %v1115_v1  ;;  %991 = vmatprep.subr.bf16.mxu0 %v1116_v2 }
  0x3e   :  { %1013 = vmatprep.subr.bf16.mxu1 %v1118_v4 }
  0x40   :  { %992 = vmatpush3.bf16.msra.mxu0 %v1117_v3 }
  0x41   :  { %1014 = vmatpush3.bf16.msra.mxu1 %v1121_v7  ;;  %1030 = vmatprep.subr.bf16.mxu0 %v1133_v13 }
  0x43   :  { %740 = vmatmul.mubr.bf16.vlgmr.msra.gmra.mxu0 %v856_v8 }
  0x44   :  { %1031 = vmatpush3.bf16.msra.mxu0 %v1124_v12  ;;  %780 = vmatmul.mubr.bf16.vlgmr.msra.gmra.mxu1 %v858_v10 }
  0x45   :  { %1032 = vmatprep.subr.bf16.mxu0 %v1133_v13  ;;  %1046 = vmatprep.mubr.msk.bf16.mxu0 %vm1134_vm0, %v1133_v13 }
  0x48   :  { %1033 = vmatpush3.bf16.msra.mxu0 %v1125_v14 }
  0x49   :  { %1034 = vmatprep.subr.bf16.mxu0 %v1133_v13 }
  0x4c   :  { %1035 = vmatpush3.bf16.msra.mxu0 %v1126_v15 }
  0x4d   :  { %1036 = vmatprep.subr.bf16.mxu0 %v1133_v13 }
  0x50   :  { %1037 = vmatpush3.bf16.msra.mxu0 %v1127_v16 }
  0x51   :  { %1038 = vmatprep.subr.bf16.mxu0 %v1133_v13 }
  0x54   :  { %1039 = vmatpush3.bf16.msra.mxu0 %v1128_v17 }
  0x55   :  { %1040 = vmatprep.subr.bf16.mxu0 %v1133_v13 }
  0x58   :  { %1041 = vmatpush3.bf16.msra.mxu0 %v1129_v18 }
  0x59   :  { %1042 = vmatprep.subr.bf16.mxu0 %v1133_v13 }
  0x5c   :  { %1043 = vmatpush3.bf16.msra.mxu0 %v1130_v19 }
  0x5d   :  { %1044 = vmatprep.subr.bf16.mxu0 %v1133_v13 }
  0x60   :  { %1045 = vmatpush3.bf16.msra.mxu0 %v1131_v20 }
  0x63   :  { %1047 = vmatmul.mubr.bf16.vlgmr.msra.gmra.mxu0 %v1132_v21 }
  0xe3   :  { %v949_v22 = vpop.f32.mrf.mxu0 }
  0xe4   :  { %v971_v23 = vpop.f32.mrf.mxu1 }
  0xe5   :  { %v950_v24 = vpop.f32.mrf.mxu0 }
  0xe6   :  { %v972_v25 = vpop.f32.mrf.mxu1  ;;  %v951_v38 = vadd.f32 %v950_v24, %v949_v22 }
  0xe7   :  { %v952_v26 = vpop.f32.mrf.mxu0  ;;  %v973_v39 = vadd.f32 %v972_v25, %v971_v23 }
  0xe8   :  { %v974_v27 = vpop.f32.mrf.mxu1 }
  0xe9   :  { %v953_v28 = vpop.f32.mrf.mxu0  ;;  %v702_v41 = vadd.f32 %v973_v39, %v951_v38 }
  0xea   :  { %v975_v29 = vpop.f32.mrf.mxu1 }
 0x103   :  { %v993_v30 = vpop.f32.mrf.mxu0 }
 0x104   :  { %v1015_v31 = vpop.f32.mrf.mxu1 }
 0x105   :  { %v994_v32 = vpop.f32.mrf.mxu0 }
 0x106   :  { %v1016_v33 = vpop.f32.mrf.mxu1  ;;  %v995_v40 = vadd.f32 %v994_v32, %v993_v30 }
 0x107   :  { %v996_v34 = vpop.f32.mrf.mxu0  ;;  %v1017_v43 = vadd.f32 %v1016_v33, %v1015_v31 }
 0x108   :  { %v1018_v35 = vpop.f32.mrf.mxu1  ;;  %v742_v42 = vadd.f32 %v995_v40, %v702_v41 }
 0x109   :  { %v997_v36 = vpop.f32.mrf.mxu0 }
 0x10a   :  { %v1019_v37 = vpop.f32.mrf.mxu1  ;;  %v782_v44 = vadd.f32 %v1017_v43, %v742_v42 }
 0x123   :  { %v821_v45 = vpop.f32.mrf.mxu0 }
 0x124   :  { %v822_v46 = vadd.f32 %v821_v45, %v782_v44 }
 0x125   :  { %v1048_v47 = vpop.f32.mrf.mxu0 }
 0x126   :  { %827 = vst [vmem:[%s1394_s2] sm:$0xff] %v822_v46  ;;  %v828_v48 = vrot.slane %v822_v46, 4  ;;  %v834_v49 = vmul.f32 %v822_v46, %v822_v46 }
 0x127   :  { %v824_v50 = vpop.f32.mrf.mxu0 }
 0x128   :  { %v829_v51 = vadd.f32 %v828_v48, %v822_v46  ;;  %v835_v52 = vrot.slane %v834_v49, 4 }
 0x129   :  { %v1049_v53 = vpop.f32.mrf.mxu0 }
 0x12a   :  { %v830_v54 = vrot.slane %v829_v51, 2  ;;  %v836_v55 = vadd.f32 %v835_v52, %v834_v49 }
 0x12c   :  { %v831_v56 = vadd.f32 %v830_v54, %v829_v51  ;;  %v837_v57 = vrot.slane %v836_v55, 2 }
 0x12e   :  { %v832_v58 = vrot.slane %v831_v56, 1  ;;  %v838_v59 = vadd.f32 %v837_v57, %v836_v55 }
 0x130   :  { %v839_v60 = vrot.slane %v838_v59, 1  ;;  %v833_v61 = vadd.f32 %v832_v58, %v831_v56 }
 0x132   :  { %v840_v62 = vadd.f32 %v839_v60, %v838_v59 }
 0x134   :  { %v842_v63 = vsel %vm841_vm1, %v833_v61, %v840_v62 }
 0x135   :  { %843 = vst [vmem:[%s1395_s3] sm:$0x3] %v842_v63 }

// kernel: _lambda_.77
= control target key start
LH: loop header
LB: loop body
LE: loop exit
PB: predicated region body
PF: predicated region fallthrough
CT: control target
= control target key end

     0   :  { %v181_v0 = vmov 0.0   ;;  %vm182_vm0 = vmmov 0   ;;  %vm127_vm1 = vcmask 156672   ;;  %s236_s1 = inlined_call_operand.vmem [shape: bf16[128,20], index: 1, kind: input, shape index: {}]   ;;  %s237_s0 = inlined_call_operand.vmem [shape: bf16[2,128], index: 0, kind: input, shape index: {}]   ;;  %s238_s2 = inlined_call_operand.vmem [shape: f32[1,20], index: 2, kind: input, shape index: {}]   ;;  %s239_s3 = inlined_call_operand.vmem [shape: f32[2,20], index: 3, kind: output, shape index: {}]  }
   0x1   :  { %151 = vmatprep.subr.bf16.mxu0 %v181_v0  ;;  %v173_v1 = vld [vmem:[%s236_s1 + $0x38] sm:$0xff]   ;;  %167 = vmatprep.mubr.msk.bf16.mxu0 %vm182_vm0, %v181_v0  ;;  %v174_v2 = vld [vmem:[%s236_s1 + $0x30] sm:$0xff]   ;;  %v175_v3 = vld [vmem:[%s236_s1 + $0x28] sm:$0xff]  }
   0x2   :  { %152 = vmatpush3.bf16.msra.mxu0 %v173_v1  ;;  %v176_v4 = vld [vmem:[%s236_s1 + $0x20] sm:$0xff]   ;;  %v177_v5 = vld [vmem:[%s236_s1 + $0x18] sm:$0xff]   ;;  %v178_v6 = vld [vmem:[%s236_s1 + $0x10] sm:$0xff]  }
   0x3   :  { %153 = vmatprep.subr.bf16.mxu0 %v181_v0  ;;  %v179_v7 = vld [vmem:[%s236_s1 + $0x8] sm:$0xff]   ;;  %v180_v8 = vld [vmem:[%s236_s1] sm:$0xff]  }
   0x4   :  { %v15_v9 = vld [vmem:[%s237_s0] sm:$0x1] }
   0x5   :  { %v133_v10 = vld [vmem:[%s238_s2] ss:$0 sm:$0xff] }
   0x6   :  { %154 = vmatpush3.bf16.msra.mxu0 %v174_v2 }
   0x7   :  { %155 = vmatprep.subr.bf16.mxu0 %v181_v0 }
   0xa   :  { %156 = vmatpush3.bf16.msra.mxu0 %v175_v3 }
   0xb   :  { %157 = vmatprep.subr.bf16.mxu0 %v181_v0 }
   0xe   :  { %158 = vmatpush3.bf16.msra.mxu0 %v176_v4 }
   0xf   :  { %159 = vmatprep.subr.bf16.mxu0 %v181_v0 }
  0x12   :  { %160 = vmatpush3.bf16.msra.mxu0 %v177_v5 }
  0x13   :  { %161 = vmatprep.subr.bf16.mxu0 %v181_v0 }
  0x16   :  { %162 = vmatpush3.bf16.msra.mxu0 %v178_v6 }
  0x17   :  { %163 = vmatprep.subr.bf16.mxu0 %v181_v0 }
  0x1a   :  { %164 = vmatpush3.bf16.msra.mxu0 %v179_v7 }
  0x1b   :  { %165 = vmatprep.subr.bf16.mxu0 %v181_v0 }
  0x1e   :  { %166 = vmatpush3.bf16.msra.mxu0 %v180_v8 }
  0x21   :  { %168 = vmatmul.mubr.bf16.vlgmr.msra.gmra.mxu0 %v15_v9 }
  0xe1   :  { %v121_v11 = vpop.f32.mrf.mxu0 }
  0xe2   :  { %v122_v12 = vadd.f32 %v133_v10, %v121_v11 }
  0xe3   :  { %v169_v13 = vpop.f32.mrf.mxu0 }
  0xe4   :  { %128 = vst.msk [vmem:[%s239_s3] sm:$0x3] %vm127_vm1, %v122_v12 }
  0xe5   :  { %v124_v14 = vpop.f32.mrf.mxu0 }
  0xe7   :  { %v170_v15 = vpop.f32.mrf.mxu0 }

</bundles_post_ra>
